<compile_context>
chip_gen: v5e
topology: v5e:2x2
jax: 0.10.0
libtpu: 0.0.40
codegen_flags: <defaults>
</compile_context>

<pallas_src>
import jax
import jax.numpy as jnp
from jax.experimental import pallas as pl
from jax.experimental.pallas import tpu as pltpu


# ---------------------------------------------------------------------------
# In-kernel helper: 3x3 conv (stride 1) from an already zero-padded VMEM plane,
# expressed as a single im2col matmul, fused with bias + ReLU.
# ---------------------------------------------------------------------------
def _conv3x3_relu_from_padded(pad_ref, w_ref, b_ref, H, W):
    # pad_ref: (H+2, W+2, Cin) zero-padded activation plane (VMEM scratch)
    # w_ref  : (9*Cin, Cout)   weights, rows ordered (kh, kw, ci)
    # b_ref  : (1, Cout)
    cin = pad_ref.shape[-1]
    cols = []
    for kh in range(3):                      # static 3x3 taps -> im2col columns
        for kw in range(3):
            patch = pad_ref[pl.ds(kh, H), pl.ds(kw, W), :]      # (H, W, Cin)
            cols.append(patch.reshape(H * W, cin))              # merge leading dims
    lhs = jnp.concatenate(cols, axis=-1)                        # (H*W, 9*Cin)
    y = jnp.dot(lhs, w_ref[...], preferred_element_type=jnp.float32)
    y = y + b_ref[...]                                          # bias broadcast
    return jnp.maximum(y, 0.0)                                  # fused ReLU, (H*W, Cout)


# ---------------------------------------------------------------------------
# Fused kernel: conv1+ReLU -> conv2+ReLU -> maxpool2x2, one image per grid step.
# Intermediates stay in VMEM; only the pooled output is written to HBM.
# ---------------------------------------------------------------------------
def fused_conv_net_kernel(x_ref, w1_ref, b1_ref, w2_ref, b2_ref, o_ref,
                          pad1_ref, pad2_ref):
    # x_ref : (1, H, W, Cin)
    # o_ref : (1, Ho, Wo*C2)
    H, W = x_ref.shape[1], x_ref.shape[2]
    Ho, Wo = H // 2, W // 2
    C1 = w1_ref.shape[-1]
    C2 = w2_ref.shape[-1]

    # ---- conv1 + ReLU (in-kernel zero padding, replaces XLA-side jnp.pad) ----
    pad1_ref[...] = jnp.zeros(pad1_ref.shape, pad1_ref.dtype)
    pad1_ref[pl.ds(1, H), pl.ds(1, W), :] = x_ref[0]
    y1 = _conv3x3_relu_from_padded(pad1_ref, w1_ref, b1_ref, H, W)   # (H*W, C1)

    # ---- conv2 + ReLU (pad the VMEM-resident conv1 output, no HBM round trip) ----
    pad2_ref[...] = jnp.zeros(pad2_ref.shape, pad2_ref.dtype)
    pad2_ref[pl.ds(1, H), pl.ds(1, W), :] = y1.reshape(H, W, C1)
    y2 = _conv3x3_relu_from_padded(pad2_ref, w2_ref, b2_ref, H, W)   # (H*W, C2)

    # ---- 2x2 maxpool on the resident conv2 output (no strided ref reads) ----
    # TODO(synk): MaxPool2d(return_indices=True) also yields argmax indices; the
    #             reference forward() discards them, so only pooled values are produced.
    y2 = y2.reshape(Ho, 2, Wo, 2, C2)                 # rows were ordered h*W + w
    p = jnp.maximum(y2[:, 0], y2[:, 1])               # pool over h-pairs  -> (Ho, Wo, 2, C2)
    p = jnp.maximum(p[:, :, 0], p[:, :, 1])           # pool over w-pairs  -> (Ho, Wo, C2)

    o_ref[0] = p.reshape(Ho, Wo * C2).astype(o_ref.dtype)   # lane-merged store


# ---------------------------------------------------------------------------
# Forward pass (matches CustomConvNet.forward semantics).
# ---------------------------------------------------------------------------
def custom_conv_net_forward(x_nchw, params):
    N, Cin, H, W = x_nchw.shape
    w1, b1 = params["w1"], params["b1"]     # (3,3,Cin,C1), (C1,)
    w2, b2 = params["w2"], params["b2"]     # (3,3,C1,C2),  (C2,)
    C1, C2 = w1.shape[-1], w2.shape[-1]
    Ho, Wo = H // 2, W // 2

    x = jnp.transpose(x_nchw, (0, 2, 3, 1))         # NCHW -> NHWC
    w1m = w1.reshape(9 * Cin, C1)                   # rows ordered (kh, kw, ci)
    w2m = w2.reshape(9 * C1, C2)
    b1m = b1.reshape(1, C1)
    b2m = b2.reshape(1, C2)

    out = pl.pallas_call(
        fused_conv_net_kernel,
        out_shape=jax.ShapeDtypeStruct((N, Ho, Wo * C2), x.dtype),
        grid_spec=pltpu.PrefetchScalarGridSpec(
            num_scalar_prefetch=0,
            grid=(N,),
            in_specs=[
                pl.BlockSpec((1, H, W, Cin), lambda n: (n, 0, 0, 0)),
                pl.BlockSpec((9 * Cin, C1), lambda n: (0, 0)),
                pl.BlockSpec((1, C1), lambda n: (0, 0)),
                pl.BlockSpec((9 * C1, C2), lambda n: (0, 0)),
                pl.BlockSpec((1, C2), lambda n: (0, 0)),
            ],
            out_specs=pl.BlockSpec((1, Ho, Wo * C2), lambda n: (n, 0, 0)),
            scratch_shapes=[
                pltpu.VMEM((H + 2, W + 2, Cin), jnp.float32),   # padded conv1 input
                pltpu.VMEM((H + 2, W + 2, C1), jnp.float32),    # padded conv2 input
            ],
        ),
        compiler_params=pltpu.CompilerParams(dimension_semantics=("parallel",)),
    )(x, w1m, b1m, w2m, b2m)

    out = out.reshape(N, Ho, Wo, C2)                # un-merge the lane-dense store
    return jnp.transpose(out, (0, 3, 1, 2))         # NHWC -> NCHW


# Pure-JAX reference for correctness check.
def reference_forward(x_nchw, params):
    x = jnp.transpose(x_nchw, (0, 2, 3, 1))
    for w, b in ((params["w1"], params["b1"]), (params["w2"], params["b2"])):
        x = jax.lax.conv_general_dilated(
            x, w, window_strides=(1, 1), padding="SAME",
            dimension_numbers=("NHWC", "HWIO", "NHWC"))
        x = jax.nn.relu(x + b)
    x = jax.lax.reduce_window(x, -jnp.inf, jax.lax.max,
                              window_dimensions=(1, 2, 2, 1),
                              window_strides=(1, 2, 2, 1), padding="VALID")
    return jnp.transpose(x, (0, 3, 1, 2))


if __name__ == "__main__":
    key = jax.random.PRNGKey(0)
    kx, k1, k2, k3, k4 = jax.random.split(key, 5)

    N, Cin, H, W = 2, 4, 16, 16
    C1 = C2 = 8

    x = jax.random.normal(kx, (N, Cin, H, W), dtype=jnp.float32)   # NCHW input

    # Deterministic parameter init (kept directly in HWIO = (KH,KW,Cin,Cout)).
    params = {
        "w1": jax.random.normal(k1, (3, 3, Cin, C1), jnp.float32) * 0.1,
        "b1": jax.random.normal(k2, (C1,), jnp.float32) * 0.1,
        "w2": jax.random.normal(k3, (3, 3, C1, C2), jnp.float32) * 0.1,
        "b2": jax.random.normal(k4, (C2,), jnp.float32) * 0.1,
    }

    fwd = jax.jit(custom_conv_net_forward)
    out = jax.block_until_ready(fwd(x, params))

    ref = jax.block_until_ready(reference_forward(x, params))
    assert out.shape == (N, C2, H // 2, W // 2), out.shape
    assert jnp.allclose(out, ref, atol=1e-3, rtol=1e-3), "mismatch vs JAX reference"

    print("KERNEL_OK")
</pallas_src>

<mosaic_0001>
module attributes {stable_mosaic.version = 11 : i64} {
  func.func @fused_conv_net_kernel(%arg0: i32, %arg1: memref<1x16x16x4xf32, #tpu.memory_space<vmem>>, %arg2: memref<36x8xf32, #tpu.memory_space<vmem>>, %arg3: memref<1x8xf32, #tpu.memory_space<vmem>>, %arg4: memref<72x8xf32, #tpu.memory_space<vmem>>, %arg5: memref<1x8xf32, #tpu.memory_space<vmem>>, %arg6: memref<1x8x64xf32, #tpu.memory_space<vmem>>, %arg7: memref<18x18x4xf32, #tpu.memory_space<vmem>>, %arg8: memref<18x18x8xf32, #tpu.memory_space<vmem>>) attributes {dimension_semantics = [#tpu.dimension_semantics<parallel>], iteration_bounds = array<i64: 2>, scalar_prefetch = 0 : i64, scratch_operands = 2 : i64, tpu.core_type = #tpu.core_type<tc>, window_params = [{transform_indices = @transform_0, window_bounds = array<i64: 1, 16, 16, 4>}, {pipeline_mode = #tpu.pipeline_mode<synchronous>, transform_indices = @transform_1, window_bounds = array<i64: 36, 8>}, {pipeline_mode = #tpu.pipeline_mode<synchronous>, transform_indices = @transform_2, window_bounds = array<i64: 1, 8>}, {pipeline_mode = #tpu.pipeline_mode<synchronous>, transform_indices = @transform_3, window_bounds = array<i64: 72, 8>}, {pipeline_mode = #tpu.pipeline_mode<synchronous>, transform_indices = @transform_4, window_bounds = array<i64: 1, 8>}, {transform_indices = @transform_5, window_bounds = array<i64: 1, 8, 64>}]} {
    %cst = arith.constant 0.000000e+00 : f32
    %0 = vector.broadcast %cst : f32 to vector<18x18x4xf32>
    %c0 = arith.constant 0 : index
    %c0_0 = arith.constant 0 : index
    %c0_1 = arith.constant 0 : index
    %1 = vector.load %arg7[%c0, %c0_0, %c0_1] : memref<18x18x4xf32, #tpu.memory_space<vmem>>, vector<18x18x4xf32>
    tpu.vector_store %arg7[%c0, %c0_0, %c0_1], %0 {strides = array<i32>} : memref<18x18x4xf32, #tpu.memory_space<vmem>>, vector<18x18x4xf32>,
    %c0_2 = arith.constant 0 : index
    %c0_3 = arith.constant 0 : index
    %c0_4 = arith.constant 0 : index
    %c0_5 = arith.constant 0 : index
    %2 = vector.load %arg1[%c0_2, %c0_3, %c0_4, %c0_5] : memref<1x16x16x4xf32, #tpu.memory_space<vmem>>, vector<1x16x16x4xf32>
    %3 = vector.shape_cast %2 : vector<1x16x16x4xf32> to vector<16x16x4xf32>
    %c1 = arith.constant 1 : index
    %c1_6 = arith.constant 1 : index
    %c0_7 = arith.constant 0 : index
    %4 = vector.load %arg7[%c1, %c1_6, %c0_7] : memref<18x18x4xf32, #tpu.memory_space<vmem>>, vector<16x16x4xf32>
    tpu.vector_store %arg7[%c1, %c1_6, %c0_7], %3 {strides = array<i32>} : memref<18x18x4xf32, #tpu.memory_space<vmem>>, vector<16x16x4xf32>,
    %c0_8 = arith.constant 0 : index
    %c0_9 = arith.constant 0 : index
    %c0_10 = arith.constant 0 : index
    %5 = vector.load %arg7[%c0_8, %c0_9, %c0_10] : memref<18x18x4xf32, #tpu.memory_space<vmem>>, vector<16x16x4xf32>
    %6 = vector.shape_cast %5 : vector<16x16x4xf32> to vector<256x4xf32>
    %c0_11 = arith.constant 0 : index
    %c1_12 = arith.constant 1 : index
    %c0_13 = arith.constant 0 : index
    %7 = vector.load %arg7[%c0_11, %c1_12, %c0_13] : memref<18x18x4xf32, #tpu.memory_space<vmem>>, vector<16x16x4xf32>
    %8 = vector.shape_cast %7 : vector<16x16x4xf32> to vector<256x4xf32>
    %c0_14 = arith.constant 0 : index
    %c2 = arith.constant 2 : index
    %c0_15 = arith.constant 0 : index
    %9 = vector.load %arg7[%c0_14, %c2, %c0_15] : memref<18x18x4xf32, #tpu.memory_space<vmem>>, vector<16x16x4xf32>
    %10 = vector.shape_cast %9 : vector<16x16x4xf32> to vector<256x4xf32>
    %c1_16 = arith.constant 1 : index
    %c0_17 = arith.constant 0 : index
    %c0_18 = arith.constant 0 : index
    %11 = vector.load %arg7[%c1_16, %c0_17, %c0_18] : memref<18x18x4xf32, #tpu.memory_space<vmem>>, vector<16x16x4xf32>
    %12 = vector.shape_cast %11 : vector<16x16x4xf32> to vector<256x4xf32>
    %c1_19 = arith.constant 1 : index
    %c1_20 = arith.constant 1 : index
    %c0_21 = arith.constant 0 : index
    %13 = vector.load %arg7[%c1_19, %c1_20, %c0_21] : memref<18x18x4xf32, #tpu.memory_space<vmem>>, vector<16x16x4xf32>
    %14 = vector.shape_cast %13 : vector<16x16x4xf32> to vector<256x4xf32>
    %c1_22 = arith.constant 1 : index
    %c2_23 = arith.constant 2 : index
    %c0_24 = arith.constant 0 : index
    %15 = vector.load %arg7[%c1_22, %c2_23, %c0_24] : memref<18x18x4xf32, #tpu.memory_space<vmem>>, vector<16x16x4xf32>
    %16 = vector.shape_cast %15 : vector<16x16x4xf32> to vector<256x4xf32>
    %c2_25 = arith.constant 2 : index
    %c0_26 = arith.constant 0 : index
    %c0_27 = arith.constant 0 : index
    %17 = vector.load %arg7[%c2_25, %c0_26, %c0_27] : memref<18x18x4xf32, #tpu.memory_space<vmem>>, vector<16x16x4xf32>
    %18 = vector.shape_cast %17 : vector<16x16x4xf32> to vector<256x4xf32>
    %c2_28 = arith.constant 2 : index
    %c1_29 = arith.constant 1 : index
    %c0_30 = arith.constant 0 : index
    %19 = vector.load %arg7[%c2_28, %c1_29, %c0_30] : memref<18x18x4xf32, #tpu.memory_space<vmem>>, vector<16x16x4xf32>
    %20 = vector.shape_cast %19 : vector<16x16x4xf32> to vector<256x4xf32>
    %c2_31 = arith.constant 2 : index
    %c2_32 = arith.constant 2 : index
    %c0_33 = arith.constant 0 : index
    %21 = vector.load %arg7[%c2_31, %c2_32, %c0_33] : memref<18x18x4xf32, #tpu.memory_space<vmem>>, vector<16x16x4xf32>
    %22 = vector.shape_cast %21 : vector<16x16x4xf32> to vector<256x4xf32>
    %23 = tpu.concatenate %6, %8, %10, %12, %14, %16, %18, %20, %22 in 1 : vector<256x4xf32>, vector<256x4xf32>, vector<256x4xf32>, vector<256x4xf32>, vector<256x4xf32>, vector<256x4xf32>, vector<256x4xf32>, vector<256x4xf32>, vector<256x4xf32> -> vector<256x36xf32>
    %c0_34 = arith.constant 0 : index
    %c0_35 = arith.constant 0 : index
    %24 = vector.load %arg2[%c0_34, %c0_35] : memref<36x8xf32, #tpu.memory_space<vmem>>, vector<36x8xf32>
    %cst_36 = arith.constant dense<0.000000e+00> : vector<256x8xf32>
    %25 = tpu.matmul %23, %24, %cst_36 {dimension_numbers = #tpu.dot_dimension_numbers<[1], [0], [0], [1], [0, 0, 1, 1], [], []>} : vector<256x36xf32>, vector<36x8xf32>, vector<256x8xf32> -> vector<256x8xf32>
    %c0_37 = arith.constant 0 : index
    %c0_38 = arith.constant 0 : index
    %26 = vector.load %arg3[%c0_37, %c0_38] : memref<1x8xf32, #tpu.memory_space<vmem>>, vector<1x8xf32>
    %27 = vector.broadcast %26 : vector<1x8xf32> to vector<256x8xf32>
    %28 = arith.addf %25, %27 : vector<256x8xf32>
    %cst_39 = arith.constant 0.000000e+00 : f32
    %29 = vector.broadcast %cst_39 : f32 to vector<256x8xf32>
    %30 = arith.maximumf %28, %29 : vector<256x8xf32>
    %cst_40 = arith.constant 0.000000e+00 : f32
    %31 = vector.broadcast %cst_40 : f32 to vector<18x18x8xf32>
    %c0_41 = arith.constant 0 : index
    %c0_42 = arith.constant 0 : index
    %c0_43 = arith.constant 0 : index
    %32 = vector.load %arg8[%c0_41, %c0_42, %c0_43] : memref<18x18x8xf32, #tpu.memory_space<vmem>>, vector<18x18x8xf32>
    tpu.vector_store %arg8[%c0_41, %c0_42, %c0_43], %31 {strides = array<i32>} : memref<18x18x8xf32, #tpu.memory_space<vmem>>, vector<18x18x8xf32>,
    %33 = vector.shape_cast %30 : vector<256x8xf32> to vector<16x16x8xf32>
    %c1_44 = arith.constant 1 : index
    %c1_45 = arith.constant 1 : index
    %c0_46 = arith.constant 0 : index
    %34 = vector.load %arg8[%c1_44, %c1_45, %c0_46] : memref<18x18x8xf32, #tpu.memory_space<vmem>>, vector<16x16x8xf32>
    tpu.vector_store %arg8[%c1_44, %c1_45, %c0_46], %33 {strides = array<i32>} : memref<18x18x8xf32, #tpu.memory_space<vmem>>, vector<16x16x8xf32>,
    %c0_47 = arith.constant 0 : index
    %c0_48 = arith.constant 0 : index
    %c0_49 = arith.constant 0 : index
    %35 = vector.load %arg8[%c0_47, %c0_48, %c0_49] : memref<18x18x8xf32, #tpu.memory_space<vmem>>, vector<16x16x8xf32>
    %36 = vector.shape_cast %35 : vector<16x16x8xf32> to vector<256x8xf32>
    %c0_50 = arith.constant 0 : index
    %c1_51 = arith.constant 1 : index
    %c0_52 = arith.constant 0 : index
    %37 = vector.load %arg8[%c0_50, %c1_51, %c0_52] : memref<18x18x8xf32, #tpu.memory_space<vmem>>, vector<16x16x8xf32>
    %38 = vector.shape_cast %37 : vector<16x16x8xf32> to vector<256x8xf32>
    %c0_53 = arith.constant 0 : index
    %c2_54 = arith.constant 2 : index
    %c0_55 = arith.constant 0 : index
    %39 = vector.load %arg8[%c0_53, %c2_54, %c0_55] : memref<18x18x8xf32, #tpu.memory_space<vmem>>, vector<16x16x8xf32>
    %40 = vector.shape_cast %39 : vector<16x16x8xf32> to vector<256x8xf32>
    %c1_56 = arith.constant 1 : index
    %c0_57 = arith.constant 0 : index
    %c0_58 = arith.constant 0 : index
    %41 = vector.load %arg8[%c1_56, %c0_57, %c0_58] : memref<18x18x8xf32, #tpu.memory_space<vmem>>, vector<16x16x8xf32>
    %42 = vector.shape_cast %41 : vector<16x16x8xf32> to vector<256x8xf32>
    %c1_59 = arith.constant 1 : index
    %c1_60 = arith.constant 1 : index
    %c0_61 = arith.constant 0 : index
    %43 = vector.load %arg8[%c1_59, %c1_60, %c0_61] : memref<18x18x8xf32, #tpu.memory_space<vmem>>, vector<16x16x8xf32>
    %44 = vector.shape_cast %43 : vector<16x16x8xf32> to vector<256x8xf32>
    %c1_62 = arith.constant 1 : index
    %c2_63 = arith.constant 2 : index
    %c0_64 = arith.constant 0 : index
    %45 = vector.load %arg8[%c1_62, %c2_63, %c0_64] : memref<18x18x8xf32, #tpu.memory_space<vmem>>, vector<16x16x8xf32>
    %46 = vector.shape_cast %45 : vector<16x16x8xf32> to vector<256x8xf32>
    %c2_65 = arith.constant 2 : index
    %c0_66 = arith.constant 0 : index
    %c0_67 = arith.constant 0 : index
    %47 = vector.load %arg8[%c2_65, %c0_66, %c0_67] : memref<18x18x8xf32, #tpu.memory_space<vmem>>, vector<16x16x8xf32>
    %48 = vector.shape_cast %47 : vector<16x16x8xf32> to vector<256x8xf32>
    %c2_68 = arith.constant 2 : index
    %c1_69 = arith.constant 1 : index
    %c0_70 = arith.constant 0 : index
    %49 = vector.load %arg8[%c2_68, %c1_69, %c0_70] : memref<18x18x8xf32, #tpu.memory_space<vmem>>, vector<16x16x8xf32>
    %50 = vector.shape_cast %49 : vector<16x16x8xf32> to vector<256x8xf32>
    %c2_71 = arith.constant 2 : index
    %c2_72 = arith.constant 2 : index
    %c0_73 = arith.constant 0 : index
    %51 = vector.load %arg8[%c2_71, %c2_72, %c0_73] : memref<18x18x8xf32, #tpu.memory_space<vmem>>, vector<16x16x8xf32>
    %52 = vector.shape_cast %51 : vector<16x16x8xf32> to vector<256x8xf32>
    %53 = tpu.concatenate %36, %38, %40, %42, %44, %46, %48, %50, %52 in 1 : vector<256x8xf32>, vector<256x8xf32>, vector<256x8xf32>, vector<256x8xf32>, vector<256x8xf32>, vector<256x8xf32>, vector<256x8xf32>, vector<256x8xf32>, vector<256x8xf32> -> vector<256x72xf32>
    %c0_74 = arith.constant 0 : index
    %c0_75 = arith.constant 0 : index
    %54 = vector.load %arg4[%c0_74, %c0_75] : memref<72x8xf32, #tpu.memory_space<vmem>>, vector<72x8xf32>
    %cst_76 = arith.constant dense<0.000000e+00> : vector<256x8xf32>
    %55 = tpu.matmul %53, %54, %cst_76 {dimension_numbers = #tpu.dot_dimension_numbers<[1], [0], [0], [1], [0, 0, 1, 1], [], []>} : vector<256x72xf32>, vector<72x8xf32>, vector<256x8xf32> -> vector<256x8xf32>
    %c0_77 = arith.constant 0 : index
    %c0_78 = arith.constant 0 : index
    %56 = vector.load %arg5[%c0_77, %c0_78] : memref<1x8xf32, #tpu.memory_space<vmem>>, vector<1x8xf32>
    %57 = vector.broadcast %56 : vector<1x8xf32> to vector<256x8xf32>
    %58 = arith.addf %55, %57 : vector<256x8xf32>
    %cst_79 = arith.constant 0.000000e+00 : f32
    %59 = vector.broadcast %cst_79 : f32 to vector<256x8xf32>
    %60 = arith.maximumf %58, %59 : vector<256x8xf32>
    %61 = vector.shape_cast %60 : vector<256x8xf32> to vector<8x2x8x2x8xf32>
    %62 = vector.extract_strided_slice %61 {offsets = [0, 0, 0, 0, 0], sizes = [8, 1, 8, 2, 8], strides = [1, 1, 1, 1, 1]} : vector<8x2x8x2x8xf32> to vector<8x1x8x2x8xf32>
    %63 = vector.shape_cast %62 : vector<8x1x8x2x8xf32> to vector<8x8x2x8xf32>
    %64 = vector.extract_strided_slice %61 {offsets = [0, 1, 0, 0, 0], sizes = [8, 1, 8, 2, 8], strides = [1, 1, 1, 1, 1]} : vector<8x2x8x2x8xf32> to vector<8x1x8x2x8xf32>
    %65 = vector.shape_cast %64 : vector<8x1x8x2x8xf32> to vector<8x8x2x8xf32>
    %66 = arith.maximumf %63, %65 : vector<8x8x2x8xf32>
    %67 = vector.extract_strided_slice %66 {offsets = [0, 0, 0, 0], sizes = [8, 8, 1, 8], strides = [1, 1, 1, 1]} : vector<8x8x2x8xf32> to vector<8x8x1x8xf32>
    %68 = vector.shape_cast %67 : vector<8x8x1x8xf32> to vector<8x8x8xf32>
    %69 = vector.extract_strided_slice %66 {offsets = [0, 0, 1, 0], sizes = [8, 8, 1, 8], strides = [1, 1, 1, 1]} : vector<8x8x2x8xf32> to vector<8x8x1x8xf32>
    %70 = vector.shape_cast %69 : vector<8x8x1x8xf32> to vector<8x8x8xf32>
    %71 = arith.maximumf %68, %70 : vector<8x8x8xf32>
    %72 = vector.shape_cast %71 : vector<8x8x8xf32> to vector<8x64xf32>
    %c0_80 = arith.constant 0 : index
    %c0_81 = arith.constant 0 : index
    %c0_82 = arith.constant 0 : index
    %73 = vector.load %arg6[%c0_80, %c0_81, %c0_82] : memref<1x8x64xf32, #tpu.memory_space<vmem>>, vector<1x8x64xf32>
    %74 = vector.shape_cast %73 : vector<1x8x64xf32> to vector<8x64xf32>
    %75 = vector.shape_cast %72 : vector<8x64xf32> to vector<1x8x64xf32>
    tpu.vector_store %arg6[%c0_80, %c0_81, %c0_82], %75 {strides = array<i32>} : memref<1x8x64xf32, #tpu.memory_space<vmem>>, vector<1x8x64xf32>,
    return
  }
  func.func @transform_0(%arg0: i32) -> (i32, i32, i32, i32) {
    %c0_i32 = arith.constant 0 : i32
    %c0_i32_0 = arith.constant 0 : i32
    %c0_i32_1 = arith.constant 0 : i32
    %c0_i32_2 = arith.constant 0 : i32
    return %arg0, %c0_i32, %c0_i32_0, %c0_i32_1 : i32, i32, i32, i32
  }
  func.func @transform_1(%arg0: i32) -> (i32, i32) {
    %c0_i32 = arith.constant 0 : i32
    %c0_i32_0 = arith.constant 0 : i32
    %c0_i32_1 = arith.constant 0 : i32
    return %c0_i32, %c0_i32_0 : i32, i32
  }
  func.func @transform_2(%arg0: i32) -> (i32, i32) {
    %c0_i32 = arith.constant 0 : i32
    %c0_i32_0 = arith.constant 0 : i32
    %c0_i32_1 = arith.constant 0 : i32
    return %c0_i32, %c0_i32_0 : i32, i32
  }
  func.func @transform_3(%arg0: i32) -> (i32, i32) {
    %c0_i32 = arith.constant 0 : i32
    %c0_i32_0 = arith.constant 0 : i32
    %c0_i32_1 = arith.constant 0 : i32
    return %c0_i32, %c0_i32_0 : i32, i32
  }
  func.func @transform_4(%arg0: i32) -> (i32, i32) {
    %c0_i32 = arith.constant 0 : i32
    %c0_i32_0 = arith.constant 0 : i32
    %c0_i32_1 = arith.constant 0 : i32
    return %c0_i32, %c0_i32_0 : i32, i32
  }
  func.func @transform_5(%arg0: i32) -> (i32, i32, i32) {
    %c0_i32 = arith.constant 0 : i32
    %c0_i32_0 = arith.constant 0 : i32
    %c0_i32_1 = arith.constant 0 : i32
    return %arg0, %c0_i32, %c0_i32_0 : i32, i32, i32
  }
}

</mosaic_0001>

<bundles_post_ra>
// kernel: custom_conv_net_forward.1
= control target key start
LH: loop header
LB: loop body
LE: loop exit
PB: predicated region body
PF: predicated region fallthrough
CT: control target
= control target key end

     0   :  { %s5613_s18 = smov 0   ;;  %s9318_s0 = inlined_call_operand.vmem [shape: f32[2,16,16,4], index: 0, kind: input, shape index: {}]   ;;  %s9319_s1 = inlined_call_operand.vmem [shape: f32[36,8], index: 1, kind: input, shape index: {}]   ;;  %s9320_s2 = inlined_call_operand.vmem [shape: f32[1,8], index: 2, kind: input, shape index: {}]   ;;  %s9321_s3 = inlined_call_operand.vmem [shape: f32[72,8], index: 3, kind: input, shape index: {}]   ;;  %s9322_s4 = inlined_call_operand.vmem [shape: f32[1,8], index: 4, kind: input, shape index: {}]   ;;  %s9323_s5 = inlined_call_operand.vmem [shape: f32[2,8,64], index: 5, kind: output, shape index: {}]  }
   0x1 LB: > { %s5333_s19 = sadd.s32 4294967295, %s5567_s18   ;;  %p5337_p0 = scmp.ge.s32.totalorder %s5567_s18, 1  ;;  %s5567_s18 = sphi %s5613_s18, %s15_s18  }
   0x2   : > { %p187_p1 = scmp.lt.s32.totalorder %s5567_s18, 3 }
   0x4   : > { %p188_p2 = pnand %p5337_p0, %p187_p1 }
   0x6   : > { %191 = sbr.rel (%p188_p2) target bundleno = 2106 (0x83a), region = 40 }
   0xb   : > { %vm223_vm0 = vcmask 31744   ;;  %v9324_v0 = vmov 0.0   ;;  %s5570_s20 = smov 4   ;;  %p214_p3 = scmp.lt.s32.totalorder %s5333_s19, 1  ;;  %vm226_vm1 = vcmask 25600   ;;  %vm1689_vm2 = vcmask 64512  }
   0xc   : > { %224 = vst.msk [vmem:[#allocation2] sm:$0xff] %vm223_vm0, %v9324_v0  ;;  %s5571_s25 = smov 8   ;;  %s5572_s26 = smov 12   ;;  %vm2026_vm3 = vcmask 1043456   ;;  %vm1722_vm4 = vcmask 97280   ;;  %vm1788_vm5 = vcmask 162816  }
   0xd   : > { %225 = vst.msk [vmem:[#allocation2 + $0x8] sm:$0xff] %vm223_vm0, %v9324_v0  ;;  %s9892_s19 = smov (!%p214_p3, %s5333_s19), 1  ;;  %s5573_s27 = smov 16   ;;  %vm1755_vm6 = vcmask 130048   ;;  %vm1821_vm7 = vcmask 195584   ;;  %vm1887_vm8 = vcmask 261120  }
   0xe   : > { %228 = vst.msk [vmem:[#allocation2 + $0x18] sm:$0xff] %vm223_vm0, %v9324_v0  ;;  %s5472_s21 = sshll.u32 %s9892_s19, 8  ;;  %s5574_s28 = smov 20   ;;  %vm1854_vm9 = vcmask 228352   ;;  %vm1929_vm10 = vcmask 293888   ;;  %vm2177_vm11 = vcmask 58368  }
   0xf   : > { %229 = vst.msk [vmem:[#allocation2 + $0x20] sm:$0xff] %vm223_vm0, %v9324_v0  ;;  %s5694_s24 = scalar_lea.vmem %s9318_s0, %s5472_s21  ;;  %s5575_s29 = smov 24   ;;  %vm3704_vm12 = vcmask 326656   ;;  %vm3737_vm13 = vcmask 392192   ;;  %vm3770_vm14 = vcmask 457728   ;;  %vm3803_vm15 = vcmask 523264  }
  0x10   : > { %231 = vst.msk [vmem:[#allocation2 + $0x30] sm:$0xff] %vm223_vm0, %v9324_v0  ;;  %v281_v2 = vld [vmem:[%s5694_s24 + $0x10] sm:$0xff]  ;;  %v279_v3 = vld [vmem:[%s5694_s24] sm:$0xff]  ;;  %v282_v7 = vld [vmem:[%s5694_s24 + $0x18] sm:$0xff]  ;;  %s5576_s30 = smov 28   ;;  %s5577_s6 = smov 32  }
  0x11   : > { %232 = vst.msk [vmem:[#allocation2 + $0x38] sm:$0xff] %vm223_vm0, %v9324_v0  ;;  %v280_v8 = vld [vmem:[%s5694_s24 + $0x8] sm:$0xff]  ;;  %v283_v9 = vld [vmem:[%s5694_s24 + $0x20] sm:$0xff]  ;;  %v285_v10 = vld [vmem:[%s5694_s24 + $0x30] sm:$0xff]  ;;  %s5578_s21 = smov 40   ;;  %s5579_s22 = smov 56  }
  0x12   : > { %234 = vst.msk [vmem:[#allocation2 + $0x48] sm:$0xff] %vm223_vm0, %v9324_v0  ;;  %v284_v11 = vld [vmem:[%s5694_s24 + $0x28] sm:$0xff]  ;;  %v286_v12 = vld [vmem:[%s5694_s24 + $0x38] sm:$0xff]  ;;  %v287_v14 = vld [vmem:[%s5694_s24 + $0x40] sm:$0xff]  ;;  %s5580_s23 = smov 64  }
  0x13   : > { %235 = vst.msk [vmem:[#allocation2 + $0x50] sm:$0xff] %vm223_vm0, %v9324_v0  ;;  %v288_v13 = vld [vmem:[%s5694_s24 + $0x48] sm:$0xff]  ;;  %v289_v15 = vld [vmem:[%s5694_s24 + $0x50] sm:$0xff]  ;;  %v291_v16 = vld [vmem:[%s5694_s24 + $0x60] sm:$0xff] }
  0x14   : > { %v376_v1 = vld [vmem:[#allocation2 + $0x1] sm:$0xff]  ;;  %237 = vst.msk [vmem:[#allocation2 + $0x60] sm:$0xff] %vm223_vm0, %v9324_v0  ;;  %v290_v18 = vld [vmem:[%s5694_s24 + $0x58] sm:$0xff]  ;;  %v295_v24 = vld [vmem:[%s5694_s24 + $0x80] sm:$0xff] }
  0x15   : > { %665 = vrot.lane.b32.xlu0 %v376_v1, %s5570_s20  ;;  %238 = vst.msk [vmem:[#allocation2 + $0x68] sm:$0xff] %vm223_vm0, %v9324_v0  ;;  %v292_v20 = vld [vmem:[%s5694_s24 + $0x68] sm:$0xff]  ;;  %v294_v22 = vld [vmem:[%s5694_s24 + $0x78] sm:$0xff]  ;;  %v293_v23 = vld [vmem:[%s5694_s24 + $0x70] sm:$0xff] }
  0x16   : > { %240 = vst.msk [vmem:[#allocation2 + $0x78] sm:$0xff] %vm223_vm0, %v9324_v0  ;;  %v297_v25 = vld [vmem:[%s5694_s24 + $0x90] sm:$0xff]  ;;  %v296_v27 = vld [vmem:[%s5694_s24 + $0x88] sm:$0xff]  ;;  %v298_v29 = vld [vmem:[%s5694_s24 + $0x98] sm:$0xff] }
  0x17   : > { %241 = vst.msk [vmem:[#allocation2 + $0x80] sm:$0xff] %vm223_vm0, %v9324_v0  ;;  %v300_v31 = vld [vmem:[%s5694_s24 + $0xa8] sm:$0xff]  ;;  %v299_v32 = vld [vmem:[%s5694_s24 + $0xa0] sm:$0xff]  ;;  %v301_v33 = vld [vmem:[%s5694_s24 + $0xb0] sm:$0xff] }
  0x18   : > { %243 = vst.msk [vmem:[#allocation2 + $0x90] sm:$0xff] %vm223_vm0, %v9324_v0  ;;  %v303_v37 = vld [vmem:[%s5694_s24 + $0xc0] sm:$0xff]  ;;  %v302_v38 = vld [vmem:[%s5694_s24 + $0xb8] sm:$0xff]  ;;  %v304_v39 = vld [vmem:[%s5694_s24 + $0xc8] sm:$0xff] }
  0x19   : > { %244 = vst.msk [vmem:[#allocation2 + $0x98] sm:$0xff] %vm223_vm0, %v9324_v0  ;;  %v306_v43 = vld [vmem:[%s5694_s24 + $0xd8] sm:$0xff]  ;;  %v305_v44 = vld [vmem:[%s5694_s24 + $0xd0] sm:$0xff]  ;;  %v307_v45 = vld [vmem:[%s5694_s24 + $0xe0] sm:$0xff] }
  0x1a   : > { %246 = vst.msk [vmem:[#allocation2 + $0xa8] sm:$0xff] %vm223_vm0, %v9324_v0  ;;  %v308_v49 = vld [vmem:[%s5694_s24 + $0xe8] sm:$0xff] }
  0x1b   : > { %247 = vst.msk [vmem:[#allocation2 + $0xb0] sm:$0xff] %vm223_vm0, %v9324_v0  ;;  %v408_v62 = vld [vmem:[#allocation2 + $0x2] sm:$0xff] }
  0x1c   : > { %249 = vst.msk [vmem:[#allocation2 + $0xc0] sm:$0xff] %vm223_vm0, %v9324_v0 }
  0x1d   : > { %250 = vst.msk [vmem:[#allocation2 + $0xc8] sm:$0xff] %vm223_vm0, %v9324_v0 }
  0x1e   : > { %252 = vst.msk [vmem:[#allocation2 + $0xd8] sm:$0xff] %vm223_vm0, %v9324_v0 }
  0x1f   : > { %253 = vst.msk [vmem:[#allocation2 + $0xe0] sm:$0xff] %vm223_vm0, %v9324_v0 }
  0x20   : > { %255 = vst.msk [vmem:[#allocation2 + $0xf0] sm:$0xff] %vm223_vm0, %v9324_v0 }
  0x21   : > { %256 = vst.msk [vmem:[#allocation2 + $0xf8] sm:$0xff] %vm223_vm0, %v9324_v0 }
  0x22   : > { %258 = vst.msk [vmem:[#allocation2 + $0x108] sm:$0xff] %vm223_vm0, %v9324_v0 }
  0x23   : > { %259 = vst.msk [vmem:[#allocation2 + $0x110] sm:$0xff] %vm223_vm0, %v9324_v0 }
  0x24   : > { %261 = vst.msk [vmem:[#allocation2 + $0x120] sm:$0xff] %vm223_vm0, %v9324_v0 }
  0x25   : > { %262 = vst.msk [vmem:[#allocation2 + $0x128] sm:$0xff] %vm223_vm0, %v9324_v0 }
  0x26   : > { %264 = vst.msk [vmem:[#allocation2 + $0x138] sm:$0xff] %vm223_vm0, %v9324_v0 }
  0x27   : > { %265 = vst.msk [vmem:[#allocation2 + $0x140] sm:$0xff] %vm223_vm0, %v9324_v0 }
  0x28   : > { %267 = vst.msk [vmem:[#allocation2 + $0x150] sm:$0xff] %vm223_vm0, %v9324_v0 }
  0x29   : > { %268 = vst.msk [vmem:[#allocation2 + $0x158] sm:$0xff] %vm223_vm0, %v9324_v0 }
  0x2a   : > { %270 = vst.msk [vmem:[#allocation2 + $0x168] sm:$0xff] %vm223_vm0, %v9324_v0 }
  0x2b   : > { %271 = vst.msk [vmem:[#allocation2 + $0x170] sm:$0xff] %vm223_vm0, %v9324_v0 }
  0x2c   : > { %273 = vst.msk [vmem:[#allocation2 + $0x180] sm:$0xff] %vm223_vm0, %v9324_v0 }
  0x2d   : > { %274 = vst.msk [vmem:[#allocation2 + $0x188] sm:$0xff] %vm223_vm0, %v9324_v0 }
  0x2e   : > { %276 = vst.msk [vmem:[#allocation2 + $0x198] sm:$0xff] %vm223_vm0, %v9324_v0 }
  0x2f   : > { %277 = vst.msk [vmem:[#allocation2 + $0x1a0] sm:$0xff] %vm223_vm0, %v9324_v0 }
  0x30   : > { %314 = vst.msk [vmem:[#allocation2 + $0x31] sm:$0xff] %vm223_vm0, %v281_v2 }
  0x31   : > { %312 = vst.msk [vmem:[#allocation2 + $0x19] sm:$0xff] %vm223_vm0, %v279_v3 }
  0x32   : > { %227 = vst.msk [vmem:[#allocation2 + $0x10] sm:$0x3] %vm226_vm1, %v9324_v0 }
  0x33   : > { %230 = vst.msk [vmem:[#allocation2 + $0x28] sm:$0x3] %vm226_vm1, %v9324_v0 }
  0x34   : > { %233 = vst.msk [vmem:[#allocation2 + $0x40] sm:$0x3] %vm226_vm1, %v9324_v0 }
  0x35   : > { %236 = vst.msk [vmem:[#allocation2 + $0x58] sm:$0x3] %vm226_vm1, %v9324_v0 }
  0x36   : > { %239 = vst.msk [vmem:[#allocation2 + $0x70] sm:$0x3] %vm226_vm1, %v9324_v0 }
  0x37   : > { %v5720_v4 = vld [vmem:[#allocation2 + $0x31] sm:$0xff]  ;;  %242 = vst.msk [vmem:[#allocation2 + $0x88] sm:$0x3] %vm226_vm1, %v9324_v0 }
  0x38   : > { %673 = vrot.lane.b32.xlu2 %v5720_v4, %s5570_s20  ;;  %v5726_v5 = vld [vmem:[#allocation2 + $0x19] sm:$0xff]  ;;  %245 = vst.msk [vmem:[#allocation2 + $0xa0] sm:$0x3] %vm226_vm1, %v9324_v0 }
  0x39   : > { %669 = vrot.lane.b32.xlu1 %v5726_v5, %s5570_s20  ;;  %v377_v6 = vld [vmem:[#allocation2 + $0x9] sm:$0xff]  ;;  %248 = vst.msk [vmem:[#allocation2 + $0xb8] sm:$0x3] %vm226_vm1, %v9324_v0 }
  0x3a   : > { %667 = vrot.lane.b32.xlu0 %v377_v6, %s5570_s20  ;;  %251 = vst.msk [vmem:[#allocation2 + $0xd0] sm:$0x3] %vm226_vm1, %v9324_v0  ;;  %v409_v1 = vld [vmem:[#allocation2 + $0xa] sm:$0xff] }
  0x3b   : > { %254 = vst.msk [vmem:[#allocation2 + $0xe8] sm:$0x3] %vm226_vm1, %v9324_v0 }
  0x3c   : > { %257 = vst.msk [vmem:[#allocation2 + $0x100] sm:$0x3] %vm226_vm1, %v9324_v0 }
  0x3d   : > { %260 = vst.msk [vmem:[#allocation2 + $0x118] sm:$0x3] %vm226_vm1, %v9324_v0 }
  0x3e   : > { %263 = vst.msk [vmem:[#allocation2 + $0x130] sm:$0x3] %vm226_vm1, %v9324_v0 }
  0x3f   : > { %266 = vst.msk [vmem:[#allocation2 + $0x148] sm:$0x3] %vm226_vm1, %v9324_v0 }
  0x40   : > { %269 = vst.msk [vmem:[#allocation2 + $0x160] sm:$0x3] %vm226_vm1, %v9324_v0 }
  0x41   : > { %272 = vst.msk [vmem:[#allocation2 + $0x178] sm:$0x3] %vm226_vm1, %v9324_v0 }
  0x42   : > { %275 = vst.msk [vmem:[#allocation2 + $0x190] sm:$0x3] %vm226_vm1, %v9324_v0 }
  0x43   : > { %278 = vst.msk [vmem:[#allocation2 + $0x1a8] sm:$0x3] %vm226_vm1, %v9324_v0  ;;  %vm4768_vm1 = vcmask 1041409  }
  0x44   : > { %315 = vst.msk [vmem:[#allocation2 + $0x39] sm:$0xff] %vm223_vm0, %v282_v7 }
  0x45   : > { %313 = vst.msk [vmem:[#allocation2 + $0x21] sm:$0xff] %vm223_vm0, %v280_v8 }
  0x46   : > { %316 = vst.msk [vmem:[#allocation2 + $0x49] sm:$0xff] %vm223_vm0, %v283_v9 }
  0x47   : > { %318 = vst.msk [vmem:[#allocation2 + $0x61] sm:$0xff] %vm223_vm0, %v285_v10 }
  0x48   : > { %317 = vst.msk [vmem:[#allocation2 + $0x51] sm:$0xff] %vm223_vm0, %v284_v11 }
  0x49   : > { %319 = vst.msk [vmem:[#allocation2 + $0x69] sm:$0xff] %vm223_vm0, %v286_v12 }
  0x4a   : > { %321 = vst.msk [vmem:[#allocation2 + $0x81] sm:$0xff] %vm223_vm0, %v288_v13 }
  0x4b   : > { %v5772_v17 = vld [vmem:[#allocation2 + $0x39] sm:$0xff]  ;;  %320 = vst.msk [vmem:[#allocation2 + $0x79] sm:$0xff] %vm223_vm0, %v287_v14 }
  0x4c   : > { %675 = vrot.lane.b32.xlu2 %v5772_v17, %s5570_s20  ;;  %v5778_v19 = vld [vmem:[#allocation2 + $0x21] sm:$0xff]  ;;  %322 = vst.msk [vmem:[#allocation2 + $0x91] sm:$0xff] %vm223_vm0, %v289_v15  ;;  %v5929_v6 = vld [vmem:[#allocation2 + $0x32] sm:$0xff] }
  0x4d   : > { %671 = vrot.lane.b32.xlu1 %v5778_v19, %s5570_s20  ;;  %v5784_v21 = vld [vmem:[#allocation2 + $0x49] sm:$0xff]  ;;  %324 = vst.msk [vmem:[#allocation2 + $0xa9] sm:$0xff] %vm223_vm0, %v291_v16  ;;  %v5927_v3 = vld [vmem:[#allocation2 + $0x1a] sm:$0xff] }
  0x4e   : > { %677 = vrot.lane.b32.xlu0 %v5784_v21, %s5570_s20  ;;  %323 = vst.msk [vmem:[#allocation2 + $0x99] sm:$0xff] %vm223_vm0, %v290_v18  ;;  %v5796_v26 = vld [vmem:[#allocation2 + $0x61] sm:$0xff] }
  0x4f   : > { %325 = vst.msk [vmem:[#allocation2 + $0xb1] sm:$0xff] %vm223_vm0, %v292_v20  ;;  %v5800_v28 = vld [vmem:[#allocation2 + $0x51] sm:$0xff]  ;;  %v5925_v2 = vld [vmem:[#allocation2 + $0x22] sm:$0xff]  ;;  %v5941_v9 = vld [vmem:[#allocation2 + $0x3a] sm:$0xff] }
  0x50   : > { %327 = vst.msk [vmem:[#allocation2 + $0xc9] sm:$0xff] %vm223_vm0, %v294_v22  ;;  %v5804_v30 = vld [vmem:[#allocation2 + $0x69] sm:$0xff]  ;;  %v5943_v10 = vld [vmem:[#allocation2 + $0x52] sm:$0xff] }
  0x51   : > { %326 = vst.msk [vmem:[#allocation2 + $0xc1] sm:$0xff] %vm223_vm0, %v293_v23  ;;  %v5821_v34 = vld [vmem:[#allocation2 + $0x81] sm:$0xff]  ;;  %v5939_v8 = vld [vmem:[#allocation2 + $0x4a] sm:$0xff] }
  0x52   : > { %328 = vst.msk [vmem:[#allocation2 + $0xd9] sm:$0xff] %vm223_vm0, %v295_v24  ;;  %v5823_v35 = vld [vmem:[#allocation2 + $0x79] sm:$0xff]  ;;  %v5953_v12 = vld [vmem:[#allocation2 + $0x6a] sm:$0xff]  ;;  %v5955_v13 = vld [vmem:[#allocation2 + $0x62] sm:$0xff] }
  0x53   : > { %330 = vst.msk [vmem:[#allocation2 + $0xf1] sm:$0xff] %vm223_vm0, %v297_v25  ;;  %v5825_v36 = vld [vmem:[#allocation2 + $0x91] sm:$0xff]  ;;  %v5957_v14 = vld [vmem:[#allocation2 + $0x7a] sm:$0xff]  ;;  %v5971_v20 = vld [vmem:[#allocation2 + $0x82] sm:$0xff] }
  0x54   : > { %681 = vrot.lane.b32.xlu2 %v5796_v26, %s5570_s20  ;;  %329 = vst.msk [vmem:[#allocation2 + $0xe1] sm:$0xff] %vm223_vm0, %v296_v27  ;;  %v5839_v40 = vld [vmem:[#allocation2 + $0xa9] sm:$0xff] }
  0x55   : > { %679 = vrot.lane.b32.xlu1 %v5800_v28, %s5570_s20  ;;  %331 = vst.msk [vmem:[#allocation2 + $0xf9] sm:$0xff] %vm223_vm0, %v298_v29  ;;  %v5841_v41 = vld [vmem:[#allocation2 + $0x99] sm:$0xff] }
  0x56   : > { %683 = vrot.lane.b32.xlu0 %v5804_v30, %s5570_s20  ;;  %333 = vst.msk [vmem:[#allocation2 + $0x111] sm:$0xff] %vm223_vm0, %v300_v31  ;;  %v5843_v42 = vld [vmem:[#allocation2 + $0xb1] sm:$0xff]  ;;  %v5973_v22 = vld [vmem:[#allocation2 + $0x9a] sm:$0xff] }
  0x57   : > { %332 = vst.msk [vmem:[#allocation2 + $0x109] sm:$0xff] %vm223_vm0, %v299_v32  ;;  %v5857_v46 = vld [vmem:[#allocation2 + $0xc9] sm:$0xff]  ;;  %v5969_v18 = vld [vmem:[#allocation2 + $0x92] sm:$0xff] }
  0x58   : > { %334 = vst.msk [vmem:[#allocation2 + $0x121] sm:$0xff] %vm223_vm0, %v301_v33  ;;  %v5859_v47 = vld [vmem:[#allocation2 + $0xc1] sm:$0xff]  ;;  %v5987_v27 = vld [vmem:[#allocation2 + $0xb2] sm:$0xff]  ;;  %v5989_v29 = vld [vmem:[#allocation2 + $0xaa] sm:$0xff] }
  0x59   : > { %336 = vst.msk [vmem:[#allocation2 + $0x139] sm:$0xff] %vm223_vm0, %v303_v37  ;;  %v5861_v48 = vld [vmem:[#allocation2 + $0xd9] sm:$0xff]  ;;  %v5991_v31 = vld [vmem:[#allocation2 + $0xc2] sm:$0xff] }
  0x5a   : > { %335 = vst.msk [vmem:[#allocation2 + $0x129] sm:$0xff] %vm223_vm0, %v302_v38  ;;  %v5871_v50 = vld [vmem:[#allocation2 + $0xf1] sm:$0xff] }
  0x5b   : > { %337 = vst.msk [vmem:[#allocation2 + $0x141] sm:$0xff] %vm223_vm0, %v304_v39  ;;  %v5873_v51 = vld [vmem:[#allocation2 + $0xe1] sm:$0xff]  ;;  %v6007_v39 = vld [vmem:[#allocation2 + $0xca] sm:$0xff] }
  0x5c   : > { %687 = vrot.lane.b32.xlu2 %v5821_v34, %s5570_s20  ;;  %339 = vst.msk [vmem:[#allocation2 + $0x159] sm:$0xff] %vm223_vm0, %v306_v43  ;;  %v5875_v52 = vld [vmem:[#allocation2 + $0xf9] sm:$0xff]  ;;  %v6009_v43 = vld [vmem:[#allocation2 + $0xe2] sm:$0xff] }
  0x5d   : > { %685 = vrot.lane.b32.xlu1 %v5823_v35, %s5570_s20  ;;  %338 = vst.msk [vmem:[#allocation2 + $0x151] sm:$0xff] %vm223_vm0, %v305_v44  ;;  %v5883_v53 = vld [vmem:[#allocation2 + $0x111] sm:$0xff]  ;;  %v6005_v38 = vld [vmem:[#allocation2 + $0xda] sm:$0xff] }
  0x5e   : > { %689 = vrot.lane.b32.xlu0 %v5825_v36, %s5570_s20  ;;  %340 = vst.msk [vmem:[#allocation2 + $0x169] sm:$0xff] %vm223_vm0, %v307_v45  ;;  %v5885_v54 = vld [vmem:[#allocation2 + $0x109] sm:$0xff] }
  0x5f   : > { %341 = vst.msk [vmem:[#allocation2 + $0x171] sm:$0xff] %vm223_vm0, %v308_v49  ;;  %v5887_v55 = vld [vmem:[#allocation2 + $0x121] sm:$0xff]  ;;  %v6027_v0 = vld [vmem:[#allocation2 + $0x10a] sm:$0xff] }
  0x60   : > { %v5895_v56 = vld [vmem:[#allocation2 + $0x139] sm:$0xff] }
  0x61   : > { %v5897_v57 = vld [vmem:[#allocation2 + $0x129] sm:$0xff] }
  0x62   : > { %v5899_v58 = vld [vmem:[#allocation2 + $0x141] sm:$0xff] }
  0x63   : > { %v5907_v59 = vld [vmem:[#allocation2 + $0x159] sm:$0xff] }
  0x64   : > { %693 = vrot.lane.b32.xlu2 %v5839_v40, %s5570_s20  ;;  %v5909_v60 = vld [vmem:[#allocation2 + $0x151] sm:$0xff] }
  0x65   : > { %691 = vrot.lane.b32.xlu1 %v5841_v41, %s5570_s20  ;;  %v5911_v61 = vld [vmem:[#allocation2 + $0x169] sm:$0xff] }
  0x66   : > { %695 = vrot.lane.b32.xlu0 %v5843_v42, %s5570_s20  ;;  %v5919_v63 = vld [vmem:[#allocation2 + $0x171] sm:$0xff] }
  0x6c   : > { %699 = vrot.lane.b32.xlu2 %v5857_v46, %s5570_s20 }
  0x6d   : > { %697 = vrot.lane.b32.xlu1 %v5859_v47, %s5570_s20 }
  0x6e   : > { %701 = vrot.lane.b32.xlu0 %v5861_v48, %s5570_s20 }
  0x74   : > { %705 = vrot.lane.b32.xlu2 %v5871_v50, %s5570_s20 }
  0x75   : > { %703 = vrot.lane.b32.xlu1 %v5873_v51, %s5570_s20 }
  0x76   : > { %707 = vrot.lane.b32.xlu0 %v5875_v52, %s5570_s20 }
  0x7c   : > { %711 = vrot.lane.b32.xlu2 %v5883_v53, %s5570_s20 }
  0x7d   : > { %709 = vrot.lane.b32.xlu1 %v5885_v54, %s5570_s20 }
  0x7e   : > { %713 = vrot.lane.b32.xlu0 %v5887_v55, %s5570_s20 }
  0x84   : > { %717 = vrot.lane.b32.xlu2 %v5895_v56, %s5570_s20 }
  0x85   : > { %715 = vrot.lane.b32.xlu1 %v5897_v57, %s5570_s20 }
  0x86   : > { %719 = vrot.lane.b32.xlu0 %v5899_v58, %s5570_s20 }
  0x87   : > { %v5961_v15 = vpop.permute.xlu0 %665 }
  0x88   : > { %9353 = vst [vmem:[#allocation6_spill] sm:$0xff] %v5961_v15 }
  0x8c   : > { %723 = vrot.lane.b32.xlu2 %v5907_v59, %s5570_s20 }
  0x8d   : > { %721 = vrot.lane.b32.xlu1 %v5909_v60, %s5570_s20 }
  0x8e   : > { %725 = vrot.lane.b32.xlu0 %v5911_v61, %s5570_s20 }
  0x92   : > { %v5933_v7 = vpop.permute.xlu2 %673 }
  0x93   : > { %9351 = vst [vmem:[#allocation4_spill] sm:$0xff] %v5933_v7  ;;  %v6083_v7 = vld [vmem:[#allocation2 + $0x13a] sm:$0xff] }
  0x94   : > { %793 = vrot.lane.b32.xlu2 %v408_v62, %s5571_s25  ;;  %v6023_v62 = vld [vmem:[#allocation2 + $0xfa] sm:$0xff] }
  0x95   : > { %727 = vrot.lane.b32.xlu1 %v5919_v63, %s5570_s20 }
  0x96   : > { %795 = vrot.lane.b32.xlu0 %v409_v1, %s5571_s25  ;;  %v6025_v1 = vld [vmem:[#allocation2 + $0xf2] sm:$0xff] }
  0x9c   : > { %799 = vrot.lane.b32.xlu2 %v5925_v2, %s5571_s25 }
  0x9d   : > { %797 = vrot.lane.b32.xlu1 %v5927_v3, %s5571_s25 }
  0x9e   : > { %801 = vrot.lane.b32.xlu0 %v5929_v6, %s5571_s25 }
  0xa4   : > { %805 = vrot.lane.b32.xlu2 %v5939_v8, %s5571_s25 }
  0xa5   : > { %803 = vrot.lane.b32.xlu1 %v5941_v9, %s5571_s25 }
  0xa6   : > { %807 = vrot.lane.b32.xlu0 %v5943_v10, %s5571_s25  ;;  %v5951_v11 = vpop.permute.xlu2 %675 }
  0xa7   : > { %9352 = vst [vmem:[#allocation5_spill] sm:$0xff] %v5951_v11  ;;  %v6079_v11 = vld [vmem:[#allocation2 + $0x142] sm:$0xff] }
  0xa8   : > { %9372 = vst [vmem:[#allocation24_spill] sm:$0xff] %v6079_v11 }
  0xab   : > { %v5979_v23 = vpop.permute.xlu1 %669 }
  0xac   : > { %811 = vrot.lane.b32.xlu2 %v5953_v12, %s5571_s25  ;;  %9355 = vst [vmem:[#allocation8_spill] sm:$0xff] %v5979_v23  ;;  %v5985_v25 = vpop.permute.xlu0 %667  ;;  %v6113_v23 = vld [vmem:[#allocation2 + $0x16a] sm:$0xff] }
  0xad   : > { %809 = vrot.lane.b32.xlu1 %v5955_v13, %s5571_s25  ;;  %9357 = vst [vmem:[#allocation10_spill] sm:$0xff] %v5985_v25  ;;  %v6117_v25 = vld [vmem:[#allocation2 + $0x15a] sm:$0xff] }
  0xae   : > { %813 = vrot.lane.b32.xlu0 %v5957_v14, %s5571_s25  ;;  %v5967_v16 = vpop.permute.xlu2 %681  ;;  %9377 = vst [vmem:[#allocation29_spill] sm:$0xff] %v6113_v23 }
  0xaf   : > { %9354 = vst [vmem:[#allocation7_spill] sm:$0xff] %v5967_v16 }
  0xb0   : > { %9378 = vst [vmem:[#allocation30_spill] sm:$0xff] %v6117_v25 }
  0xb4   : > { %817 = vrot.lane.b32.xlu2 %v5969_v18, %s5571_s25 }
  0xb5   : > { %815 = vrot.lane.b32.xlu1 %v5971_v20, %s5571_s25 }
  0xb6   : > { %819 = vrot.lane.b32.xlu0 %v5973_v22, %s5571_s25  ;;  %v5983_v24 = vpop.permute.xlu2 %687 }
  0xb7   : > { %9356 = vst [vmem:[#allocation9_spill] sm:$0xff] %v5983_v24 }
  0xbc   : > { %823 = vrot.lane.b32.xlu2 %v5987_v27, %s5571_s25 }
  0xbd   : > { %821 = vrot.lane.b32.xlu1 %v5989_v29, %s5571_s25 }
  0xbe   : > { %825 = vrot.lane.b32.xlu0 %v5991_v31, %s5571_s25  ;;  %v5999_v32 = vpop.permute.xlu2 %693 }
  0xbf   : > { %9358 = vst [vmem:[#allocation11_spill] sm:$0xff] %v5999_v32  ;;  %v6001_v33 = vpop.permute.xlu1 %671 }
  0xc0   : > { %9359 = vst [vmem:[#allocation12_spill] sm:$0xff] %v6001_v33  ;;  %v6003_v37 = vpop.permute.xlu0 %677 }
  0xc1   : > { %9360 = vst [vmem:[#allocation13_spill] sm:$0xff] %v6003_v37 }
  0xc4   : > { %829 = vrot.lane.b32.xlu2 %v6005_v38, %s5571_s25 }
  0xc5   : > { %827 = vrot.lane.b32.xlu1 %v6007_v39, %s5571_s25 }
  0xc6   : > { %831 = vrot.lane.b32.xlu0 %v6009_v43, %s5571_s25  ;;  %v6017_v44 = vpop.permute.xlu2 %699 }
  0xc7   : > { %9361 = vst [vmem:[#allocation14_spill] sm:$0xff] %v6017_v44  ;;  %v6019_v45 = vpop.permute.xlu1 %679  ;;  %v6049_v44 = vld [vmem:[#allocation2 + $0x112] sm:$0xff] }
  0xc8   : > { %9362 = vst [vmem:[#allocation15_spill] sm:$0xff] %v6019_v45  ;;  %v6021_v49 = vpop.permute.xlu0 %683  ;;  %v6045_v45 = vld [vmem:[#allocation2 + $0x122] sm:$0xff] }
  0xc9   : > { %9363 = vst [vmem:[#allocation16_spill] sm:$0xff] %v6021_v49  ;;  %v9366_v49 = vmov 0.0  }
  0xca   : > { %2175 = vst.msk [vmem:[#allocation3] sm:$0xff] %vm1689_vm2, %v9366_v49 }
  0xcb   : > { %2176 = vst.msk [vmem:[#allocation3 + $0x8] sm:$0xff] %vm1689_vm2, %v9366_v49 }
  0xcc   : > { %835 = vrot.lane.b32.xlu2 %v6023_v62, %s5571_s25  ;;  %2179 = vst.msk [vmem:[#allocation3 + $0x18] sm:$0xff] %vm1689_vm2, %v9366_v49 }
  0xcd   : > { %833 = vrot.lane.b32.xlu1 %v6025_v1, %s5571_s25  ;;  %2180 = vst.msk [vmem:[#allocation3 + $0x20] sm:$0xff] %vm1689_vm2, %v9366_v49 }
  0xce   : > { %837 = vrot.lane.b32.xlu0 %v6027_v0, %s5571_s25  ;;  %v6035_v32 = vpop.permute.xlu2 %705  ;;  %2182 = vst.msk [vmem:[#allocation3 + $0x30] sm:$0xff] %vm1689_vm2, %v9366_v49 }
  0xcf   : > { %9364 = vst [vmem:[#allocation17_spill] sm:$0xff] %v6035_v32  ;;  %v6037_v24 = vpop.permute.xlu1 %685  ;;  %v6053_v32 = vld [vmem:[#allocation2 + $0x12a] sm:$0xff] }
  0xd0   : > { %9365 = vst [vmem:[#allocation18_spill] sm:$0xff] %v6037_v24  ;;  %v6041_v16 = vpop.permute.xlu0 %689 }
  0xd1   : > { %9367 = vst [vmem:[#allocation19_spill] sm:$0xff] %v6041_v16 }
  0xd2   : > { %9368 = vst [vmem:[#allocation20_spill] sm:$0xff] %v6053_v32 }
  0xd3   : > { %2183 = vst.msk [vmem:[#allocation3 + $0x38] sm:$0xff] %vm1689_vm2, %v9366_v49 }
  0xd4   : > { %841 = vrot.lane.b32.xlu2 %v6045_v45, %s5571_s25  ;;  %2185 = vst.msk [vmem:[#allocation3 + $0x48] sm:$0xff] %vm1689_vm2, %v9366_v49 }
  0xd5   : > { %839 = vrot.lane.b32.xlu1 %v6049_v44, %s5571_s25  ;;  %2186 = vst.msk [vmem:[#allocation3 + $0x50] sm:$0xff] %vm1689_vm2, %v9366_v49 }
  0xd6   : > { %843 = vrot.lane.b32.xlu0 %v6053_v32, %s5571_s25  ;;  %v6067_v16 = vpop.permute.xlu2 %711  ;;  %2188 = vst.msk [vmem:[#allocation3 + $0x60] sm:$0xff] %vm1689_vm2, %v9366_v49  ;;  %v355_v32 = vld [vmem:[#allocation2 + $0x80] sm:$0xff] }
  0xd7   : > { %9369 = vst [vmem:[#allocation21_spill] sm:$0xff] %v6067_v16  ;;  %v6071_v24 = vpop.permute.xlu1 %691  ;;  %v6087_v16 = vld [vmem:[#allocation2 + $0x152] sm:$0xff] }
  0xd8   : > { %9370 = vst [vmem:[#allocation22_spill] sm:$0xff] %v6071_v24  ;;  %v6075_v37 = vpop.permute.xlu0 %695 }
  0xd9   : > { %9371 = vst [vmem:[#allocation23_spill] sm:$0xff] %v6075_v37 }
  0xda   : > { %2189 = vst.msk [vmem:[#allocation3 + $0x68] sm:$0xff] %vm1689_vm2, %v9366_v49 }
  0xdb   : > { %2191 = vst.msk [vmem:[#allocation3 + $0x78] sm:$0xff] %vm1689_vm2, %v9366_v49 }
  0xdc   : > { %2192 = vst.msk [vmem:[#allocation3 + $0x80] sm:$0xff] %vm1689_vm2, %v9366_v49  ;;  %847 = vrot.lane.b32.xlu2 %v6079_v11, %s5571_s25  ;;  %v352_v11 = vld [vmem:[#allocation2 + $0x60] sm:$0xff] }
  0xdd   : > { %9373 = vst [vmem:[#allocation25_spill] sm:$0xff] %v6087_v16  ;;  %845 = vrot.lane.b32.xlu1 %v6083_v7, %s5571_s25 }
  0xde   : > { %2194 = vst.msk [vmem:[#allocation3 + $0x90] sm:$0xff] %vm1689_vm2, %v9366_v49  ;;  %849 = vrot.lane.b32.xlu0 %v6087_v16, %s5571_s25  ;;  %v6101_v37 = vpop.permute.xlu2 %717 }
  0xdf   : > { %2195 = vst.msk [vmem:[#allocation3 + $0x98] sm:$0xff] %vm1689_vm2, %v9366_v49  ;;  %v6105_v24 = vpop.permute.xlu1 %697 }
  0xe0   : > { %2197 = vst.msk [vmem:[#allocation3 + $0xa8] sm:$0xff] %vm1689_vm2, %v9366_v49  ;;  %v6109_v33 = vpop.permute.xlu0 %701 }
  0xe1   : > { %9374 = vst [vmem:[#allocation26_spill] sm:$0xff] %v6101_v37  ;;  %v6121_v37 = vld [vmem:[#allocation2 + $0x172] sm:$0xff] }
  0xe2   : > { %2198 = vst.msk [vmem:[#allocation3 + $0xb0] sm:$0xff] %vm1689_vm2, %v9366_v49 }
  0xe3   : > { %9375 = vst [vmem:[#allocation27_spill] sm:$0xff] %v6105_v24 }
  0xe4   : > { %2200 = vst.msk [vmem:[#allocation3 + $0xc0] sm:$0xff] %vm1689_vm2, %v9366_v49  ;;  %853 = vrot.lane.b32.xlu2 %v6113_v23, %s5571_s25 }
  0xe5   : > { %9376 = vst [vmem:[#allocation28_spill] sm:$0xff] %v6109_v33  ;;  %851 = vrot.lane.b32.xlu1 %v6117_v25, %s5571_s25  ;;  %v353_v25 = vld [vmem:[#allocation2 + $0x68] sm:$0xff] }
  0xe6   : > { %2201 = vst.msk [vmem:[#allocation3 + $0xc8] sm:$0xff] %vm1689_vm2, %v9366_v49  ;;  %855 = vrot.lane.b32.xlu0 %v6121_v37, %s5571_s25  ;;  %v6135_v24 = vpop.permute.xlu2 %723 }
  0xe7   : > { %2203 = vst.msk [vmem:[#allocation3 + $0xd8] sm:$0xff] %vm1689_vm2, %v9366_v49  ;;  %v6139_v33 = vpop.permute.xlu1 %703 }
  0xe8   : > { %2204 = vst.msk [vmem:[#allocation3 + $0xe0] sm:$0xff] %vm1689_vm2, %v9366_v49  ;;  %v6143_v15 = vpop.permute.xlu0 %707 }
  0xe9   : > { %9379 = vst [vmem:[#allocation31_spill] sm:$0xff] %v6121_v37  ;;  %v346_v37 = vld [vmem:[#allocation2 + $0x18] sm:$0xff] }
  0xea   : > { %2206 = vst.msk [vmem:[#allocation3 + $0xf0] sm:$0xff] %vm1689_vm2, %v9366_v49 }
  0xeb   : > { %2207 = vst.msk [vmem:[#allocation3 + $0xf8] sm:$0xff] %vm1689_vm2, %v9366_v49 }
  0xec   : > { %2209 = vst.msk [vmem:[#allocation3 + $0x108] sm:$0xff] %vm1689_vm2, %v9366_v49 }
  0xed   : > { %9380 = vst [vmem:[#allocation32_spill] sm:$0xff] %v6135_v24  ;;  %v347_v24 = vld [vmem:[#allocation2 + $0x20] sm:$0xff]  ;;  %921 = vrot.lane.b32.xlu1 %v346_v37, %s5572_s26  ;;  %v349_v37 = vld [vmem:[#allocation2 + $0x38] sm:$0xff] }
  0xee   : > { %2210 = vst.msk [vmem:[#allocation3 + $0x110] sm:$0xff] %vm1689_vm2, %v9366_v49  ;;  %923 = vrot.lane.b32.xlu2 %v347_v24, %s5572_s26 }
  0xef   : > { %9381 = vst [vmem:[#allocation33_spill] sm:$0xff] %v6139_v33  ;;  %v6160_v33 = vpop.permute.xlu2 %793  ;;  %v6166_v24 = vpop.permute.xlu1 %709 }
  0xf0   : > { %2212 = vst.msk [vmem:[#allocation3 + $0x120] sm:$0xff] %vm1689_vm2, %v9366_v49  ;;  %v6170_v23 = vpop.permute.xlu0 %713 }
  0xf1   : > { %9382 = vst [vmem:[#allocation34_spill] sm:$0xff] %v6143_v15  ;;  %v348_v15 = vld [vmem:[#allocation2 + $0x30] sm:$0xff] }
  0xf2   : > { %2213 = vst.msk [vmem:[#allocation3 + $0x128] sm:$0xff] %vm1689_vm2, %v9366_v49  ;;  %925 = vrot.lane.b32.xlu0 %v348_v15, %s5572_s26  ;;  %v350_v15 = vld [vmem:[#allocation2 + $0x48] sm:$0xff] }
  0xf3   : > { %2215 = vst.msk [vmem:[#allocation3 + $0x138] sm:$0xff] %vm1689_vm2, %v9366_v49 }
  0xf4   : > { %2216 = vst.msk [vmem:[#allocation3 + $0x140] sm:$0xff] %vm1689_vm2, %v9366_v49 }
  0xf5   : > { %2218 = vst.msk [vmem:[#allocation3 + $0x150] sm:$0xff] %vm1689_vm2, %v9366_v49  ;;  %927 = vrot.lane.b32.xlu1 %v349_v37, %s5572_s26 }
  0xf6   : > { %2219 = vst.msk [vmem:[#allocation3 + $0x158] sm:$0xff] %vm1689_vm2, %v9366_v49  ;;  %929 = vrot.lane.b32.xlu2 %v350_v15, %s5572_s26 }
  0xf7   : > { %2221 = vst.msk [vmem:[#allocation3 + $0x168] sm:$0xff] %vm1689_vm2, %v9366_v49  ;;  %v6181_v16 = vpop.permute.xlu1 %715 }
  0xf8   : > { %9383 = vst [vmem:[#allocation35_spill] sm:$0xff] %v6160_v33  ;;  %v351_v33 = vld [vmem:[#allocation2 + $0x50] sm:$0xff] }
  0xf9   : > { %2222 = vst.msk [vmem:[#allocation3 + $0x170] sm:$0xff] %vm1689_vm2, %v9366_v49 }
  0xfa   : > { %2224 = vst.msk [vmem:[#allocation3 + $0x180] sm:$0xff] %vm1689_vm2, %v9366_v49  ;;  %931 = vrot.lane.b32.xlu0 %v351_v33, %s5572_s26 }
  0xfb   : > { %9384 = vst [vmem:[#allocation36_spill] sm:$0xff] %v6166_v24  ;;  %v6179_v24 = vpop.permute.xlu2 %799 }
  0xfc   : > { %2225 = vst.msk [vmem:[#allocation3 + $0x188] sm:$0xff] %vm1689_vm2, %v9366_v49 }
  0xfd   : > { %9385 = vst [vmem:[#allocation37_spill] sm:$0xff] %v6170_v23  ;;  %v6183_v23 = vpop.permute.xlu0 %719  ;;  %933 = vrot.lane.b32.xlu1 %v352_v11, %s5572_s26 }
  0xfe   : > { %2227 = vst.msk [vmem:[#allocation3 + $0x198] sm:$0xff] %vm1689_vm2, %v9366_v49  ;;  %935 = vrot.lane.b32.xlu2 %v353_v25, %s5572_s26 }
  0xff   : > { %2228 = vst.msk [vmem:[#allocation3 + $0x1a0] sm:$0xff] %vm1689_vm2, %v9366_v49  ;;  %v354_v49 = vld [vmem:[#allocation2 + $0x78] sm:$0xff]  ;;  %v6190_v37 = vpop.permute.xlu1 %721 }
 0x100   : > { %9386 = vst [vmem:[#allocation38_spill] sm:$0xff] %v6179_v24  ;;  %v356_v24 = vld [vmem:[#allocation2 + $0x90] sm:$0xff] }
 0x101   : > { %9387 = vst [vmem:[#allocation39_spill] sm:$0xff] %v6181_v16  ;;  %v6218_v16 = vld [vmem:[#allocation2 + $0xd8] sm:$0xff] }
 0x102   : > { %9388 = vst [vmem:[#allocation40_spill] sm:$0xff] %v6183_v23  ;;  %937 = vrot.lane.b32.xlu0 %v354_v49, %s5572_s26  ;;  %v357_v23 = vld [vmem:[#allocation2 + $0x98] sm:$0xff] }
 0x103   : > { %v6188_v15 = vpop.permute.xlu2 %805  ;;  %9390 = vst [vmem:[#allocation42_spill] sm:$0xff] %v6190_v37  ;;  %v6203_v37 = vld [vmem:[#allocation2 + $0xb0] sm:$0xff] }
 0x104   : > { %9389 = vst [vmem:[#allocation41_spill] sm:$0xff] %v6188_v15  ;;  %v309_v15 = vld [vmem:[%s5694_s24 + $0xf0] sm:$0xff] }
 0x105   : > { %v6192_v33 = vpop.permute.xlu0 %725  ;;  %939 = vrot.lane.b32.xlu1 %v355_v32, %s5572_s26  ;;  %9395 = vst [vmem:[#allocation47_spill] sm:$0xff] %v6203_v37 }
 0x106   : > { %9391 = vst [vmem:[#allocation43_spill] sm:$0xff] %v6192_v33  ;;  %941 = vrot.lane.b32.xlu2 %v356_v24, %s5572_s26  ;;  %v358_v33 = vld [vmem:[#allocation2 + $0xa8] sm:$0xff]  ;;  %v6207_v24 = vld [vmem:[#allocation2 + $0xc0] sm:$0xff] }
 0x107   : > { %v6199_v11 = vpop.permute.xlu1 %727  ;;  %9399 = vst [vmem:[#allocation51_spill] sm:$0xff] %v6218_v16 }
 0x108   : > { %9393 = vst [vmem:[#allocation45_spill] sm:$0xff] %v6199_v11 }
 0x109   : > { %342 = vst.msk [vmem:[#allocation2 + $0x181] sm:$0xff] %vm223_vm0, %v309_v15 }
 0x10a   : > { %943 = vrot.lane.b32.xlu0 %v357_v23, %s5572_s26 }
 0x10b   : > { %v6197_v25 = vpop.permute.xlu2 %811 }
 0x10c   : > { %9392 = vst [vmem:[#allocation44_spill] sm:$0xff] %v6197_v25  ;;  %v361_v25 = vld [vmem:[#allocation2 + $0xc8] sm:$0xff] }
 0x10d   : > { %v6201_v49 = vpop.permute.xlu0 %795  ;;  %945 = vrot.lane.b32.xlu1 %v358_v33, %s5572_s26 }
 0x10e   : > { %9394 = vst [vmem:[#allocation46_spill] sm:$0xff] %v6201_v49  ;;  %947 = vrot.lane.b32.xlu2 %v6203_v37, %s5572_s26  ;;  %v310_v49 = vld [vmem:[%s5694_s24 + $0xf8] sm:$0xff]  ;;  %v6224_v37 = vld [vmem:[#allocation2 + $0xe0] sm:$0xff]  ;;  %s5581_s24 = smov 48  }
 0x10f   : > { %v6214_v32 = vpop.permute.xlu1 %797  ;;  %343 = vst.msk [vmem:[#allocation2 + $0x189] sm:$0xff] %vm223_vm0, %v310_v49 }
 0x110   : > { %9397 = vst [vmem:[#allocation49_spill] sm:$0xff] %v6214_v32  ;;  %v6237_v32 = vld [vmem:[#allocation2 + $0xf8] sm:$0xff] }
 0x111   : > { %9403 = vst [vmem:[#allocation55_spill] sm:$0xff] %v6237_v32 }
 0x112   : > { %949 = vrot.lane.b32.xlu0 %v6207_v24, %s5572_s26 }
 0x113   : > { %v6212_v23 = vpop.permute.xlu2 %817 }
 0x114   : > { %9396 = vst [vmem:[#allocation48_spill] sm:$0xff] %v6212_v23 }
 0x115   : > { %v6216_v11 = vpop.permute.xlu0 %801  ;;  %951 = vrot.lane.b32.xlu1 %v361_v25, %s5572_s26  ;;  %v6241_v25 = vld [vmem:[#allocation2 + $0x108] sm:$0xff] }
 0x116   : > { %9398 = vst [vmem:[#allocation50_spill] sm:$0xff] %v6216_v11  ;;  %953 = vrot.lane.b32.xlu2 %v6218_v16, %s5572_s26  ;;  %v364_v16 = vld [vmem:[#allocation2 + $0xf0] sm:$0xff] }
 0x117   : > { %v6233_v23 = vpop.permute.xlu1 %803  ;;  %9404 = vst [vmem:[#allocation56_spill] sm:$0xff] %v6241_v25 }
 0x118   : > { %9401 = vst [vmem:[#allocation53_spill] sm:$0xff] %v6233_v23  ;;  %v367_v23 = vld [vmem:[#allocation2 + $0x110] sm:$0xff] }
 0x11a   : > { %955 = vrot.lane.b32.xlu0 %v6224_v37, %s5572_s26 }
 0x11b   : > { %v6230_v33 = vpop.permute.xlu2 %823 }
 0x11c   : > { %9400 = vst [vmem:[#allocation52_spill] sm:$0xff] %v6230_v33 }
 0x11d   : > { %v6235_v11 = vpop.permute.xlu0 %807  ;;  %957 = vrot.lane.b32.xlu1 %v364_v16, %s5572_s26 }
 0x11e   : > { %9402 = vst [vmem:[#allocation54_spill] sm:$0xff] %v6235_v11  ;;  %959 = vrot.lane.b32.xlu2 %v6237_v32, %s5572_s26  ;;  %v6252_v11 = vld [vmem:[#allocation2 + $0x120] sm:$0xff]  ;;  %v6256_v32 = vld [vmem:[#allocation2 + $0x128] sm:$0xff] }
 0x11f   : > { %v6248_v49 = vpop.permute.xlu1 %809  ;;  %9408 = vst [vmem:[#allocation60_spill] sm:$0xff] %v6252_v11 }
 0x120   : > { %9406 = vst [vmem:[#allocation58_spill] sm:$0xff] %v6248_v49 }
 0x121   : > { %9409 = vst [vmem:[#allocation61_spill] sm:$0xff] %v6256_v32 }
 0x122   : > { %961 = vrot.lane.b32.xlu0 %v6241_v25, %s5572_s26  ;;  %v370_v25 = vld [vmem:[#allocation2 + $0x138] sm:$0xff] }
 0x123   : > { %v6246_v15 = vpop.permute.xlu2 %829 }
 0x124   : > { %9405 = vst [vmem:[#allocation57_spill] sm:$0xff] %v6246_v15 }
 0x125   : > { %v6250_v33 = vpop.permute.xlu0 %813  ;;  %963 = vrot.lane.b32.xlu1 %v367_v23, %s5572_s26 }
 0x126   : > { %9407 = vst [vmem:[#allocation59_spill] sm:$0xff] %v6250_v33  ;;  %965 = vrot.lane.b32.xlu2 %v6252_v11, %s5572_s26  ;;  %v6267_v33 = vld [vmem:[#allocation2 + $0x140] sm:$0xff]  ;;  %v6271_v11 = vld [vmem:[#allocation2 + $0x150] sm:$0xff] }
 0x127   : > { %v6263_v15 = vpop.permute.xlu1 %815  ;;  %9413 = vst [vmem:[#allocation65_spill] sm:$0xff] %v6267_v33 }
 0x128   : > { %9411 = vst [vmem:[#allocation63_spill] sm:$0xff] %v6263_v15 }
 0x129   : > { %9414 = vst [vmem:[#allocation66_spill] sm:$0xff] %v6271_v11 }
 0x12a   : > { %967 = vrot.lane.b32.xlu0 %v6256_v32, %s5572_s26  ;;  %v373_v32 = vld [vmem:[#allocation2 + $0x158] sm:$0xff] }
 0x12b   : > { %v6261_v16 = vpop.permute.xlu2 %835 }
 0x12c   : > { %9410 = vst [vmem:[#allocation62_spill] sm:$0xff] %v6261_v16 }
 0x12d   : > { %v6265_v49 = vpop.permute.xlu0 %819  ;;  %969 = vrot.lane.b32.xlu1 %v370_v25, %s5572_s26 }
 0x12e   : > { %9412 = vst [vmem:[#allocation64_spill] sm:$0xff] %v6265_v49  ;;  %971 = vrot.lane.b32.xlu2 %v6267_v33, %s5572_s26  ;;  %v6282_v49 = vld [vmem:[#allocation2 + $0x168] sm:$0xff]  ;;  %v6286_v33 = vld [vmem:[#allocation2 + $0x170] sm:$0xff] }
 0x12f   : > { %v6278_v16 = vpop.permute.xlu1 %821 }
 0x130   : > { %9416 = vst [vmem:[#allocation68_spill] sm:$0xff] %v6278_v16 }
 0x132   : > { %973 = vrot.lane.b32.xlu0 %v6271_v11, %s5572_s26  ;;  %v6299_v11 = vld [vmem:[#allocation2 + $0x180] sm:$0xff] }
 0x133   : > { %v6276_v23 = vpop.permute.xlu2 %841 }
 0x134   : > { %9415 = vst [vmem:[#allocation67_spill] sm:$0xff] %v6276_v23 }
 0x135   : > { %v6280_v15 = vpop.permute.xlu0 %825  ;;  %975 = vrot.lane.b32.xlu1 %v373_v32, %s5572_s26 }
 0x136   : > { %9417 = vst [vmem:[#allocation69_spill] sm:$0xff] %v6280_v15  ;;  %977 = vrot.lane.b32.xlu2 %v6282_v49, %s5572_s26  ;;  %v6297_v15 = vld [vmem:[#allocation2 + $0x188] sm:$0xff] }
 0x137   : > { %v6293_v23 = vpop.permute.xlu1 %827  ;;  %9421 = vst [vmem:[#allocation73_spill] sm:$0xff] %v6297_v15 }
 0x138   : > { %9419 = vst [vmem:[#allocation71_spill] sm:$0xff] %v6293_v23 }
 0x13a   : > { %979 = vrot.lane.b32.xlu0 %v6286_v33, %s5572_s26 }
 0x13b   : > { %v6291_v25 = vpop.permute.xlu2 %847 }
 0x13c   : > { %9418 = vst [vmem:[#allocation70_spill] sm:$0xff] %v6291_v25 }
 0x13d   : > { %v6295_v16 = vpop.permute.xlu0 %831  ;;  %981 = vrot.lane.b32.xlu1 %v6299_v11, %s5572_s26 }
 0x13e   : > { %9420 = vst [vmem:[#allocation72_spill] sm:$0xff] %v6295_v16  ;;  %983 = vrot.lane.b32.xlu2 %v6297_v15, %s5572_s26 }
 0x13f   : > { %v6309_v25 = vpop.permute.xlu1 %833 }
 0x140   : > { %9423 = vst [vmem:[#allocation75_spill] sm:$0xff] %v6309_v25  ;;  %v596_v25 = vld [vmem:[#allocation2 + $0x171] sm:$0xff] }
 0x142   : > { %1049 = vrot.lane.b32.xlu0 %v5726_v5, %s5573_s27 }
 0x143   : > { %v6305_v32 = vpop.permute.xlu2 %853 }
 0x144   : > { %9422 = vst [vmem:[#allocation74_spill] sm:$0xff] %v6305_v32 }
 0x145   : > { %v6311_v23 = vpop.permute.xlu0 %837  ;;  %1051 = vrot.lane.b32.xlu1 %v5778_v19, %s5573_s27 }
 0x146   : > { %9424 = vst [vmem:[#allocation76_spill] sm:$0xff] %v6311_v23  ;;  %1053 = vrot.lane.b32.xlu2 %v5720_v4, %s5573_s27  ;;  %v572_v23 = vld [vmem:[#allocation2 + $0x51] sm:$0xff] }
 0x147   : > { %v6321_v32 = vpop.permute.xlu1 %839 }
 0x148   : > { %9425 = vst [vmem:[#allocation77_spill] sm:$0xff] %v6321_v32 }
 0x14a   : > { %1055 = vrot.lane.b32.xlu0 %v5772_v17, %s5573_s27 }
 0x14b   : > { %v6319_v16 = vpop.permute.xlu2 %923 }
 0x14d   : > { %v6323_v15 = vpop.permute.xlu0 %843  ;;  %1057 = vrot.lane.b32.xlu1 %v5784_v21, %s5573_s27 }
 0x14e   : > { %9426 = vst [vmem:[#allocation78_spill] sm:$0xff] %v6323_v15  ;;  %1059 = vrot.lane.b32.xlu2 %v5800_v28, %s5573_s27  ;;  %v540_v15 = vld [vmem:[#allocation2 + $0x50] sm:$0xff] }
 0x14f   : > { %v6333_v5 = vpop.permute.xlu1 %845 }
 0x150   : > { %9427 = vst [vmem:[#allocation79_spill] sm:$0xff] %v6333_v5  ;;  %v537_v5 = vld [vmem:[#allocation2 + $0x30] sm:$0xff] }
 0x152   : > { %1061 = vrot.lane.b32.xlu0 %v5796_v26, %s5573_s27 }
 0x153   : > { %v6331_v4 = vpop.permute.xlu2 %929 }
 0x155   : > { %v6335_v17 = vpop.permute.xlu0 %849  ;;  %1063 = vrot.lane.b32.xlu1 %v5804_v30, %s5573_s27 }
 0x156   : > { %9428 = vst [vmem:[#allocation80_spill] sm:$0xff] %v6335_v17  ;;  %1065 = vrot.lane.b32.xlu2 %v5823_v35, %s5573_s27  ;;  %v9464_v17 = vld [vmem:[#allocation25_spill] sm:$0xff] }
 0x157   : > { %v6345_v21 = vpop.permute.xlu1 %851 }
 0x158   : > { %9429 = vst [vmem:[#allocation81_spill] sm:$0xff] %v6345_v21 }
 0x15a   : > { %1067 = vrot.lane.b32.xlu0 %v5821_v34, %s5573_s27 }
 0x15b   : > { %v6343_v19 = vpop.permute.xlu2 %935 }
 0x15d   : > { %v6347_v26 = vpop.permute.xlu0 %855  ;;  %1069 = vrot.lane.b32.xlu1 %v5825_v36, %s5573_s27 }
 0x15e   : > { %9430 = vst [vmem:[#allocation82_spill] sm:$0xff] %v6347_v26  ;;  %1071 = vrot.lane.b32.xlu2 %v5841_v41, %s5573_s27  ;;  %v6435_v26 = vld [vmem:[#allocation2 + $0x189] sm:$0xff] }
 0x15f   : > { %v6357_v30 = vpop.permute.xlu1 %921 }
 0x162   : > { %1073 = vrot.lane.b32.xlu0 %v5839_v40, %s5573_s27 }
 0x163   : > { %v6355_v28 = vpop.permute.xlu2 %941 }
 0x164   : > { %9431 = vst [vmem:[#allocation83_spill] sm:$0xff] %v6355_v28  ;;  %v595_v28 = vld [vmem:[#allocation2 + $0x169] sm:$0xff] }
 0x165   : > { %v6359_v34 = vpop.permute.xlu0 %925  ;;  %1075 = vrot.lane.b32.xlu1 %v5843_v42, %s5573_s27 }
 0x166   : > { %1077 = vrot.lane.b32.xlu2 %v5859_v47, %s5573_s27 }
 0x167   : > { %v6369_v36 = vpop.permute.xlu1 %927 }
 0x16a   : > { %1079 = vrot.lane.b32.xlu0 %v5857_v46, %s5573_s27 }
 0x16b   : > { %v6367_v35 = vpop.permute.xlu2 %947 }
 0x16c   : > { %9432 = vst [vmem:[#allocation84_spill] sm:$0xff] %v6367_v35  ;;  %v556_v35 = vld [vmem:[#allocation2 + $0x110] sm:$0xff] }
 0x16d   : > { %v6371_v40 = vpop.permute.xlu0 %931  ;;  %1081 = vrot.lane.b32.xlu1 %v5861_v48, %s5573_s27 }
 0x16e   : > { %1083 = vrot.lane.b32.xlu2 %v5873_v51, %s5573_s27 }
 0x16f   : > { %v6381_v42 = vpop.permute.xlu1 %933 }
 0x172   : > { %1085 = vrot.lane.b32.xlu0 %v5871_v50, %s5573_s27 }
 0x173   : > { %v6379_v41 = vpop.permute.xlu2 %953 }
 0x174   : > { %9433 = vst [vmem:[#allocation85_spill] sm:$0xff] %v6379_v41  ;;  %v6557_v41 = vld [vmem:[#allocation2 + $0x182] sm:$0xff] }
 0x175   : > { %v6383_v46 = vpop.permute.xlu0 %937  ;;  %1087 = vrot.lane.b32.xlu1 %v5875_v52, %s5573_s27 }
 0x176   : > { %1089 = vrot.lane.b32.xlu2 %v5885_v54, %s5573_s27 }
 0x177   : > { %v6393_v48 = vpop.permute.xlu1 %939 }
 0x178   : > { %9435 = vst [vmem:[#allocation87_spill] sm:$0xff] %v6393_v48  ;;  %v623_v48 = vld [vmem:[#allocation2 + $0x13a] sm:$0xff] }
 0x17a   : > { %1091 = vrot.lane.b32.xlu0 %v5883_v53, %s5573_s27 }
 0x17b   : > { %v6391_v47 = vpop.permute.xlu2 %959 }
 0x17c   : > { %9434 = vst [vmem:[#allocation86_spill] sm:$0xff] %v6391_v47  ;;  %v1921_v47 = vld [vmem:[%s9319_s1 + $0x8] sm:$0xff] }
 0x17d   : > { %v6395_v50 = vpop.permute.xlu0 %943  ;;  %1093 = vrot.lane.b32.xlu1 %v5887_v55, %s5573_s27 }
 0x17e   : > { %9436 = vst [vmem:[#allocation88_spill] sm:$0xff] %v6395_v50  ;;  %1095 = vrot.lane.b32.xlu2 %v5897_v57, %s5573_s27  ;;  %v6421_v57 = vld [vmem:[#allocation2 + $0x181] sm:$0xff]  ;;  %v582_v50 = vld [vmem:[#allocation2 + $0xc9] sm:$0xff] }
 0x17f   : > { %v6405_v52 = vpop.permute.xlu1 %945 }
 0x180   : > { %9438 = vst [vmem:[#allocation90_spill] sm:$0xff] %v6405_v52  ;;  %v9493_v52 = vld [vmem:[#allocation66_spill] sm:$0xff] }
 0x182   : > { %1097 = vrot.lane.b32.xlu0 %v5895_v56, %s5573_s27 }
 0x183   : > { %v6403_v51 = vpop.permute.xlu2 %965 }
 0x184   : > { %9437 = vst [vmem:[#allocation89_spill] sm:$0xff] %v6403_v51  ;;  %v567_v51 = vld [vmem:[#allocation2 + $0x198] sm:$0xff] }
 0x185   : > { %v6407_v53 = vpop.permute.xlu0 %949  ;;  %1099 = vrot.lane.b32.xlu1 %v5899_v58, %s5573_s27 }
 0x186   : > { %9439 = vst [vmem:[#allocation91_spill] sm:$0xff] %v6407_v53  ;;  %1101 = vrot.lane.b32.xlu2 %v5909_v60, %s5573_s27  ;;  %v544_v53 = vld [vmem:[#allocation2 + $0x80] sm:$0xff] }
 0x187   : > { %v6417_v55 = vpop.permute.xlu1 %951 }
 0x188   : > { %9441 = vst [vmem:[#allocation93_spill] sm:$0xff] %v6417_v55 }
 0x18a   : > { %1103 = vrot.lane.b32.xlu0 %v5907_v59, %s5573_s27 }
 0x18b   : > { %v6415_v54 = vpop.permute.xlu2 %971 }
 0x18c   : > { %9440 = vst [vmem:[#allocation92_spill] sm:$0xff] %v6415_v54 }
 0x18d   : > { %v6419_v56 = vpop.permute.xlu0 %955  ;;  %1105 = vrot.lane.b32.xlu1 %v5911_v61, %s5573_s27 }
 0x18e   : > { %1107 = vrot.lane.b32.xlu2 %v5919_v63, %s5573_s27 }
 0x18f   : > { %v6431_v59 = vpop.permute.xlu1 %957 }
 0x192   : > { %1109 = vrot.lane.b32.xlu0 %v6421_v57, %s5573_s27 }
 0x193   : > { %v6429_v58 = vpop.permute.xlu2 %977 }
 0x194   : > { %9442 = vst [vmem:[#allocation94_spill] sm:$0xff] %v6429_v58 }
 0x195   : > { %v6433_v60 = vpop.permute.xlu0 %961  ;;  %1111 = vrot.lane.b32.xlu1 %v6435_v26, %s5573_s27 }
 0x196   : > { %9443 = vst [vmem:[#allocation95_spill] sm:$0xff] %v6433_v60  ;;  %1177 = vrot.lane.b32.xlu2 %v5927_v3, %s5574_s28  ;;  %v594_v60 = vld [vmem:[#allocation2 + $0x159] sm:$0xff] }
 0x197   : > { %v6445_v63 = vpop.permute.xlu1 %963 }
 0x198   : > { %9445 = vst [vmem:[#allocation97_spill] sm:$0xff] %v6445_v63  ;;  %v585_v63 = vld [vmem:[#allocation2 + $0xf1] sm:$0xff] }
 0x19a   : > { %1179 = vrot.lane.b32.xlu0 %v5925_v2, %s5574_s28 }
 0x19b   : > { %v6443_v61 = vpop.permute.xlu2 %983 }
 0x19c   : > { %9444 = vst [vmem:[#allocation96_spill] sm:$0xff] %v6443_v61  ;;  %v9458_v61 = vld [vmem:[#allocation20_spill] sm:$0xff] }
 0x19d   : > { %v6447_v21 = vpop.permute.xlu0 %967  ;;  %1181 = vrot.lane.b32.xlu1 %v5929_v6, %s5574_s28 }
 0x19e   : > { %9446 = vst [vmem:[#allocation98_spill] sm:$0xff] %v6447_v21  ;;  %1183 = vrot.lane.b32.xlu2 %v5941_v9, %s5574_s28  ;;  %v9485_v21 = vld [vmem:[#allocation56_spill] sm:$0xff] }
 0x19f   : > { %v6457_v58 = vpop.permute.xlu1 %969 }
 0x1a0   : > { %9447 = vst [vmem:[#allocation99_spill] sm:$0xff] %v6457_v58  ;;  %v543_v58 = vld [vmem:[#allocation2 + $0x78] sm:$0xff] }
 0x1a2   : > { %1185 = vrot.lane.b32.xlu0 %v5939_v8, %s5574_s28 }
 0x1a3   : > { %v6455_v3 = vpop.permute.xlu2 %1053 }
 0x1a5   : > { %v6459_v2 = vpop.permute.xlu0 %973  ;;  %1187 = vrot.lane.b32.xlu1 %v5943_v10, %s5574_s28 }
 0x1a6   : > { %9448 = vst [vmem:[#allocation100_spill] sm:$0xff] %v6459_v2  ;;  %1189 = vrot.lane.b32.xlu2 %v5955_v13, %s5574_s28  ;;  %v6559_v2 = vld [vmem:[#allocation2 + $0x18a] sm:$0xff] }
 0x1a7   : > { %v6469_v6 = vpop.permute.xlu1 %975 }
 0x1a8   : > { %9449 = vst [vmem:[#allocation101_spill] sm:$0xff] %v6469_v6 }
 0x1aa   : > { %1191 = vrot.lane.b32.xlu0 %v5953_v12, %s5574_s28 }
 0x1ab   : > { %v6467_v9 = vpop.permute.xlu2 %1059 }
 0x1ad   : > { %v6471_v8 = vpop.permute.xlu0 %979  ;;  %1193 = vrot.lane.b32.xlu1 %v5957_v14, %s5574_s28 }
 0x1ae   : > { %9450 = vst [vmem:[#allocation102_spill] sm:$0xff] %v6471_v8  ;;  %1195 = vrot.lane.b32.xlu2 %v5971_v20, %s5574_s28  ;;  %v9463_v8 = vld [vmem:[#allocation30_spill] sm:$0xff] }
 0x1af   : > { %v6481_v10 = vpop.permute.xlu1 %981 }
 0x1b0   : > { %9451 = vst [vmem:[#allocation103_spill] sm:$0xff] %v6481_v10 }
 0x1b2   : > { %1197 = vrot.lane.b32.xlu0 %v5969_v18, %s5574_s28 }
 0x1b3   : > { %v6479_v13 = vpop.permute.xlu2 %1065 }
 0x1b5   : > { %v6483_v12 = vpop.permute.xlu0 %1049  ;;  %1199 = vrot.lane.b32.xlu1 %v5973_v22, %s5574_s28 }
 0x1b6   : > { %1201 = vrot.lane.b32.xlu2 %v5989_v29, %s5574_s28 }
 0x1b7   : > { %v6493_v14 = vpop.permute.xlu1 %1051 }
 0x1ba   : > { %1203 = vrot.lane.b32.xlu0 %v5987_v27, %s5574_s28 }
 0x1bb   : > { %v6491_v20 = vpop.permute.xlu2 %1071 }
 0x1bc   : > { %9452 = vst [vmem:[#allocation104_spill] sm:$0xff] %v6491_v20  ;;  %v576_v20 = vld [vmem:[#allocation2 + $0x81] sm:$0xff] }
 0x1bd   : > { %v6495_v18 = vpop.permute.xlu0 %1055  ;;  %1205 = vrot.lane.b32.xlu1 %v5991_v31, %s5574_s28 }
 0x1be   : > { %1207 = vrot.lane.b32.xlu2 %v6007_v39, %s5574_s28 }
 0x1bf   : > { %v6505_v22 = vpop.permute.xlu1 %1057 }
 0x1c2   : > { %1209 = vrot.lane.b32.xlu0 %v6005_v38, %s5574_s28 }
 0x1c3   : > { %v6503_v29 = vpop.permute.xlu2 %1077 }
 0x1c4   : > { %9453 = vst [vmem:[#allocation105_spill] sm:$0xff] %v6503_v29  ;;  %v542_v29 = vld [vmem:[#allocation2 + $0x68] sm:$0xff] }
 0x1c5   : > { %v6507_v27 = vpop.permute.xlu0 %1061  ;;  %1211 = vrot.lane.b32.xlu1 %v6009_v43, %s5574_s28 }
 0x1c6   : > { %1213 = vrot.lane.b32.xlu2 %v6025_v1, %s5574_s28 }
 0x1c7   : > { %v6517_v31 = vpop.permute.xlu1 %1063 }
 0x1ca   : > { %1215 = vrot.lane.b32.xlu0 %v6023_v62, %s5574_s28 }
 0x1cb   : > { %v6515_v39 = vpop.permute.xlu2 %1083 }
 0x1cd   : > { %v6519_v38 = vpop.permute.xlu0 %1067  ;;  %1217 = vrot.lane.b32.xlu1 %v6027_v0, %s5574_s28 }
 0x1ce   : > { %9454 = vst [vmem:[#allocation106_spill] sm:$0xff] %v6519_v38  ;;  %1219 = vrot.lane.b32.xlu2 %v6049_v44, %s5574_s28  ;;  %v9459_v44 = vld [vmem:[#allocation24_spill] sm:$0xff]  ;;  %v620_v38 = vld [vmem:[#allocation2 + $0x112] sm:$0xff] }
 0x1cf   : > { %v6529_v43 = vpop.permute.xlu1 %1069 }
 0x1d0   : > { %9456 = vst [vmem:[#allocation108_spill] sm:$0xff] %v6529_v43  ;;  %v591_v43 = vld [vmem:[#allocation2 + $0x139] sm:$0xff] }
 0x1d2   : > { %1221 = vrot.lane.b32.xlu0 %v6045_v45, %s5574_s28 }
 0x1d3   : > { %v6527_v1 = vpop.permute.xlu2 %1089 }
 0x1d4   : > { %9455 = vst [vmem:[#allocation107_spill] sm:$0xff] %v6527_v1  ;;  %v593_v1 = vld [vmem:[#allocation2 + $0x151] sm:$0xff] }
 0x1d5   : > { %v6531_v62 = vpop.permute.xlu0 %1073  ;;  %1223 = vrot.lane.b32.xlu1 %v9458_v61, %s5574_s28 }
 0x1d6   : > { %9457 = vst [vmem:[#allocation109_spill] sm:$0xff] %v6531_v62  ;;  %1225 = vrot.lane.b32.xlu2 %v6083_v7, %s5574_s28  ;;  %v9465_v7 = vld [vmem:[#allocation29_spill] sm:$0xff] }
 0x1d7   : > { %v6541_v0 = vpop.permute.xlu1 %1075 }
 0x1d8   : > { %9461 = vst [vmem:[#allocation24_spill] sm:$0xff] %v6541_v0  ;;  %v545_v0 = vld [vmem:[#allocation2 + $0x90] sm:$0xff] }
 0x1da   : > { %1227 = vrot.lane.b32.xlu0 %v9459_v44, %s5574_s28 }
 0x1db   : > { %v6539_v10 = vpop.permute.xlu2 %1095 }
 0x1dc   : > { %9460 = vst [vmem:[#allocation20_spill] sm:$0xff] %v6539_v10  ;;  %v546_v10 = vld [vmem:[#allocation2 + $0x98] sm:$0xff] }
 0x1dd   : > { %v6543_v45 = vpop.permute.xlu0 %1079  ;;  %1229 = vrot.lane.b32.xlu1 %v9464_v17, %s5574_s28 }
 0x1de   : > { %9462 = vst [vmem:[#allocation110_spill] sm:$0xff] %v6543_v45  ;;  %1231 = vrot.lane.b32.xlu2 %v9463_v8, %s5574_s28  ;;  %v9468_v8 = vld [vmem:[#allocation31_spill] sm:$0xff]  ;;  %v539_v45 = vld [vmem:[#allocation2 + $0x48] sm:$0xff] }
 0x1df   : > { %v6553_v61 = vpop.permute.xlu1 %1081 }
 0x1e0   : > { %9467 = vst [vmem:[#allocation25_spill] sm:$0xff] %v6553_v61 }
 0x1e2   : > { %1233 = vrot.lane.b32.xlu0 %v9465_v7, %s5574_s28 }
 0x1e3   : > { %v6551_v6 = vpop.permute.xlu2 %1101 }
 0x1e4   : > { %9466 = vst [vmem:[#allocation30_spill] sm:$0xff] %v6551_v6  ;;  %v538_v6 = vld [vmem:[#allocation2 + $0x38] sm:$0xff] }
 0x1e5   : > { %v6555_v44 = vpop.permute.xlu0 %1085  ;;  %1235 = vrot.lane.b32.xlu1 %v9468_v8, %s5574_s28 }
 0x1e6   : > { %1237 = vrot.lane.b32.xlu2 %v6557_v41, %s5574_s28 }
 0x1e7   : > { %v6569_v7 = vpop.permute.xlu1 %1087 }
 0x1e8   : > { %9470 = vst [vmem:[#allocation31_spill] sm:$0xff] %v6569_v7  ;;  %v622_v7 = vld [vmem:[#allocation2 + $0x12a] sm:$0xff] }
 0x1ea   : > { %1239 = vrot.lane.b32.xlu0 %v6559_v2, %s5574_s28 }
 0x1eb   : > { %v6567_v17 = vpop.permute.xlu2 %1107 }
 0x1ec   : > { %9469 = vst [vmem:[#allocation29_spill] sm:$0xff] %v6567_v17  ;;  %v541_v17 = vld [vmem:[#allocation2 + $0x60] sm:$0xff] }
 0x1ed   : > { %v6571_v61 = vpop.permute.xlu0 %1091  ;;  %1305 = vrot.lane.b32.xlu1 %v537_v5, %s5575_s29 }
 0x1ee   : > { %9471 = vst [vmem:[#allocation111_spill] sm:$0xff] %v6571_v61  ;;  %1307 = vrot.lane.b32.xlu2 %v538_v6, %s5575_s29  ;;  %v579_v61 = vld [vmem:[#allocation2 + $0xa9] sm:$0xff] }
 0x1ef   : > { %v6578_v55 = vpop.permute.xlu1 %1093 }
 0x1f0   : > { %9472 = vst [vmem:[#allocation112_spill] sm:$0xff] %v6578_v55  ;;  %v562_v55 = vld [vmem:[#allocation2 + $0x158] sm:$0xff] }
 0x1f2   : > { %1309 = vrot.lane.b32.xlu0 %v539_v45, %s5575_s29 }
 0x1f3   : > { %v6576_v8 = vpop.permute.xlu2 %1177 }
 0x1f5   : > { %v6580_v54 = vpop.permute.xlu0 %1097  ;;  %1311 = vrot.lane.b32.xlu1 %v540_v15, %s5575_s29 }
 0x1f6   : > { %9473 = vst [vmem:[#allocation113_spill] sm:$0xff] %v6580_v54  ;;  %1313 = vrot.lane.b32.xlu2 %v541_v17, %s5575_s29  ;;  %v547_v54 = vld [vmem:[#allocation2 + $0xa8] sm:$0xff] }
 0x1f7   : > { %v6587_v5 = vpop.permute.xlu1 %1099 }
 0x1f8   : > { %9474 = vst [vmem:[#allocation114_spill] sm:$0xff] %v6587_v5  ;;  %v550_v5 = vld [vmem:[#allocation2 + $0xc8] sm:$0xff] }
 0x1fa   : > { %1315 = vrot.lane.b32.xlu0 %v542_v29, %s5575_s29 }
 0x1fb   : > { %v6585_v6 = vpop.permute.xlu2 %1183 }
 0x1fd   : > { %v6589_v45 = vpop.permute.xlu0 %1103  ;;  %1317 = vrot.lane.b32.xlu1 %v543_v58, %s5575_s29 }
 0x1fe   : > { %9475 = vst [vmem:[#allocation115_spill] sm:$0xff] %v6589_v45  ;;  %1319 = vrot.lane.b32.xlu2 %v544_v53, %s5575_s29  ;;  %v9478_v45 = vld [vmem:[#allocation47_spill] sm:$0xff] }
 0x1ff   : > { %v6596_v15 = vpop.permute.xlu1 %1105 }
 0x200   : > { %9476 = vst [vmem:[#allocation116_spill] sm:$0xff] %v6596_v15  ;;  %v553_v15 = vld [vmem:[#allocation2 + $0xf0] sm:$0xff] }
 0x202   : > { %1321 = vrot.lane.b32.xlu0 %v545_v0, %s5575_s29 }
 0x203   : > { %v6594_v17 = vpop.permute.xlu2 %1189 }
 0x205   : > { %v6598_v29 = vpop.permute.xlu0 %1109  ;;  %1323 = vrot.lane.b32.xlu1 %v546_v10, %s5575_s29 }
 0x206   : > { %9477 = vst [vmem:[#allocation117_spill] sm:$0xff] %v6598_v29  ;;  %1325 = vrot.lane.b32.xlu2 %v547_v54, %s5575_s29  ;;  %v9481_v29 = vld [vmem:[#allocation51_spill] sm:$0xff] }
 0x207   : > { %v6606_v58 = vpop.permute.xlu1 %1111 }
 0x208   : > { %9480 = vst [vmem:[#allocation118_spill] sm:$0xff] %v6606_v58 }
 0x20a   : > { %1327 = vrot.lane.b32.xlu0 %v9478_v45, %s5575_s29 }
 0x20b   : > { %v6604_v53 = vpop.permute.xlu2 %1195 }
 0x20c   : > { %9479 = vst [vmem:[#allocation47_spill] sm:$0xff] %v6604_v53  ;;  %v615_v53 = vld [vmem:[#allocation2 + $0xda] sm:$0xff] }
 0x20d   : > { %v6608_v0 = vpop.permute.xlu0 %1179  ;;  %1329 = vrot.lane.b32.xlu1 %v6207_v24, %s5575_s29 }
 0x20e   : > { %1331 = vrot.lane.b32.xlu2 %v550_v5, %s5575_s29  ;;  %v9483_v5 = vld [vmem:[#allocation55_spill] sm:$0xff] }
 0x20f   : > { %v6617_v10 = vpop.permute.xlu1 %1181 }
 0x212   : > { %1333 = vrot.lane.b32.xlu0 %v9481_v29, %s5575_s29 }
 0x213   : > { %v6615_v54 = vpop.permute.xlu2 %1201 }
 0x214   : > { %9482 = vst [vmem:[#allocation51_spill] sm:$0xff] %v6615_v54  ;;  %v9488_v54 = vld [vmem:[#allocation61_spill] sm:$0xff] }
 0x215   : > { %v6619_v45 = vpop.permute.xlu0 %1185  ;;  %1335 = vrot.lane.b32.xlu1 %v6224_v37, %s5575_s29 }
 0x216   : > { %1337 = vrot.lane.b32.xlu2 %v553_v15, %s5575_s29  ;;  %v9486_v15 = vld [vmem:[#allocation60_spill] sm:$0xff] }
 0x217   : > { %v6628_v24 = vpop.permute.xlu1 %1187 }
 0x21a   : > { %1339 = vrot.lane.b32.xlu0 %v9483_v5, %s5575_s29 }
 0x21b   : > { %v6626_v58 = vpop.permute.xlu2 %1207 }
 0x21c   : > { %9484 = vst [vmem:[#allocation55_spill] sm:$0xff] %v6626_v58  ;;  %v559_v58 = vld [vmem:[#allocation2 + $0x138] sm:$0xff] }
 0x21d   : > { %v6630_v29 = vpop.permute.xlu0 %1191  ;;  %1341 = vrot.lane.b32.xlu1 %v9485_v21, %s5575_s29 }
 0x21e   : > { %1343 = vrot.lane.b32.xlu2 %v556_v35, %s5575_s29  ;;  %v9489_v35 = vld [vmem:[#allocation65_spill] sm:$0xff] }
 0x21f   : > { %v6639_v37 = vpop.permute.xlu1 %1193 }
 0x222   : > { %1345 = vrot.lane.b32.xlu0 %v9486_v15, %s5575_s29 }
 0x223   : > { %v6637_v32 = vpop.permute.xlu2 %1213 }
 0x225   : > { %v6641_v5 = vpop.permute.xlu0 %1197  ;;  %1347 = vrot.lane.b32.xlu1 %v9488_v54, %s5575_s29 }
 0x226   : > { %9487 = vst [vmem:[#allocation56_spill] sm:$0xff] %v6641_v5  ;;  %1349 = vrot.lane.b32.xlu2 %v559_v58, %s5575_s29  ;;  %v588_v5 = vld [vmem:[#allocation2 + $0x111] sm:$0xff] }
 0x227   : > { %v6650_v21 = vpop.permute.xlu1 %1199 }
 0x228   : > { %9491 = vst [vmem:[#allocation61_spill] sm:$0xff] %v6650_v21  ;;  %v573_v21 = vld [vmem:[#allocation2 + $0x61] sm:$0xff] }
 0x22a   : > { %1351 = vrot.lane.b32.xlu0 %v9489_v35, %s5575_s29 }
 0x22b   : > { %v6648_v62 = vpop.permute.xlu2 %1219 }
 0x22c   : > { %9490 = vst [vmem:[#allocation60_spill] sm:$0xff] %v6648_v62  ;;  %v575_v62 = vld [vmem:[#allocation2 + $0x79] sm:$0xff] }
 0x22d   : > { %v6652_v15 = vpop.permute.xlu0 %1203  ;;  %1353 = vrot.lane.b32.xlu1 %v9493_v52, %s5575_s29 }
 0x22e   : > { %9492 = vst [vmem:[#allocation65_spill] sm:$0xff] %v6652_v15  ;;  %1355 = vrot.lane.b32.xlu2 %v562_v55, %s5575_s29  ;;  %v9497_v55 = vld [vmem:[#allocation73_spill] sm:$0xff] }
 0x22f   : > { %v6661_v54 = vpop.permute.xlu1 %1205 }
 0x230   : > { %9495 = vst [vmem:[#allocation119_spill] sm:$0xff] %v6661_v54  ;;  %v569_v54 = vld [vmem:[#allocation2 + $0x31] sm:$0xff] }
 0x232   : > { %1357 = vrot.lane.b32.xlu0 %v6282_v49, %s5575_s29 }
 0x233   : > { %v6659_v58 = vpop.permute.xlu2 %1225 }
 0x234   : > { %9494 = vst [vmem:[#allocation66_spill] sm:$0xff] %v6659_v58  ;;  %v568_v58 = vld [vmem:[#allocation2 + $0x1a0] sm:$0xff] }
 0x235   : > { %v6663_v35 = vpop.permute.xlu0 %1209  ;;  %1359 = vrot.lane.b32.xlu1 %v6286_v33, %s5575_s29 }
 0x236   : > { %9496 = vst [vmem:[#allocation120_spill] sm:$0xff] %v6663_v35  ;;  %1361 = vrot.lane.b32.xlu2 %v6299_v11, %s5575_s29  ;;  %v570_v35 = vld [vmem:[#allocation2 + $0x39] sm:$0xff] }
 0x237   : > { %v6673_v52 = vpop.permute.xlu1 %1211 }
 0x23a   : > { %1363 = vrot.lane.b32.xlu0 %v9497_v55, %s5575_s29 }
 0x23b   : > { %v6671_v15 = vpop.permute.xlu2 %1231 }
 0x23c   : > { %9498 = vst [vmem:[#allocation73_spill] sm:$0xff] %v6671_v15  ;;  %v571_v15 = vld [vmem:[#allocation2 + $0x49] sm:$0xff] }
 0x23d   : > { %v6675_v49 = vpop.permute.xlu0 %1215  ;;  %1365 = vrot.lane.b32.xlu1 %v567_v51, %s5575_s29 }
 0x23e   : > { %9499 = vst [vmem:[#allocation121_spill] sm:$0xff] %v6675_v49  ;;  %1367 = vrot.lane.b32.xlu2 %v568_v58, %s5575_s29  ;;  %v618_v49 = vld [vmem:[#allocation2 + $0xfa] sm:$0xff] }
 0x23f   : > { %v6682_v33 = vpop.permute.xlu1 %1217 }
 0x240   : > { %9501 = vst [vmem:[#allocation123_spill] sm:$0xff] %v6682_v33  ;;  %v590_v33 = vld [vmem:[#allocation2 + $0x129] sm:$0xff] }
 0x242   : > { %1433 = vrot.lane.b32.xlu0 %v569_v54, %s5576_s30 }
 0x243   : > { %v6680_v11 = vpop.permute.xlu2 %1237 }
 0x244   : > { %9500 = vst [vmem:[#allocation122_spill] sm:$0xff] %v6680_v11  ;;  %v574_v11 = vld [vmem:[#allocation2 + $0x69] sm:$0xff] }
 0x245   : > { %v6684_v55 = vpop.permute.xlu0 %1221  ;;  %1435 = vrot.lane.b32.xlu1 %v570_v35, %s5576_s30 }
 0x246   : > { %9502 = vst [vmem:[#allocation124_spill] sm:$0xff] %v6684_v55  ;;  %1437 = vrot.lane.b32.xlu2 %v571_v15, %s5576_s30  ;;  %v577_v55 = vld [vmem:[#allocation2 + $0x91] sm:$0xff] }
 0x247   : > { %v6691_v51 = vpop.permute.xlu1 %1223 }
 0x248   : > { %9503 = vst [vmem:[#allocation125_spill] sm:$0xff] %v6691_v51  ;;  %v578_v51 = vld [vmem:[#allocation2 + $0x99] sm:$0xff] }
 0x24a   : > { %1439 = vrot.lane.b32.xlu0 %v572_v23, %s5576_s30 }
 0x24b   : > { %v6689_v58 = vpop.permute.xlu2 %1307 }
 0x24d   : > { %v6693_v54 = vpop.permute.xlu0 %1227  ;;  %1441 = vrot.lane.b32.xlu1 %v573_v21, %s5576_s30 }
 0x24e   : > { %9504 = vst [vmem:[#allocation126_spill] sm:$0xff] %v6693_v54  ;;  %1443 = vrot.lane.b32.xlu2 %v574_v11, %s5576_s30  ;;  %v580_v54 = vld [vmem:[#allocation2 + $0xb1] sm:$0xff] }
 0x24f   : > { %v6700_v35 = vpop.permute.xlu1 %1229 }
 0x250   : > { %9505 = vst [vmem:[#allocation127_spill] sm:$0xff] %v6700_v35  ;;  %v581_v35 = vld [vmem:[#allocation2 + $0xc1] sm:$0xff] }
 0x252   : > { %1445 = vrot.lane.b32.xlu0 %v575_v62, %s5576_s30 }
 0x253   : > { %v6698_v15 = vpop.permute.xlu2 %1313 }
 0x255   : > { %v6702_v23 = vpop.permute.xlu0 %1233  ;;  %1447 = vrot.lane.b32.xlu1 %v576_v20, %s5576_s30 }
 0x256   : > { %9506 = vst [vmem:[#allocation128_spill] sm:$0xff] %v6702_v23  ;;  %1449 = vrot.lane.b32.xlu2 %v577_v55, %s5576_s30  ;;  %v583_v23 = vld [vmem:[#allocation2 + $0xd9] sm:$0xff] }
 0x257   : > { %v6709_v21 = vpop.permute.xlu1 %1235 }
 0x258   : > { %9507 = vst [vmem:[#allocation129_spill] sm:$0xff] %v6709_v21  ;;  %v584_v21 = vld [vmem:[#allocation2 + $0xe1] sm:$0xff] }
 0x25a   : > { %1451 = vrot.lane.b32.xlu0 %v578_v51, %s5576_s30 }
 0x25b   : > { %v6707_v11 = vpop.permute.xlu2 %1319 }
 0x25d   : > { %v6711_v62 = vpop.permute.xlu0 %1239  ;;  %1453 = vrot.lane.b32.xlu1 %v579_v61, %s5576_s30 }
 0x25e   : > { %9508 = vst [vmem:[#allocation130_spill] sm:$0xff] %v6711_v62  ;;  %1455 = vrot.lane.b32.xlu2 %v580_v54, %s5576_s30  ;;  %v586_v62 = vld [vmem:[#allocation2 + $0xf9] sm:$0xff] }
 0x25f   : > { %v6718_v20 = vpop.permute.xlu1 %1305 }
 0x262   : > { %1457 = vrot.lane.b32.xlu0 %v581_v35, %s5576_s30 }
 0x263   : > { %v6716_v55 = vpop.permute.xlu2 %1325 }
 0x264   : > { %9509 = vst [vmem:[#allocation131_spill] sm:$0xff] %v6716_v55  ;;  %v587_v55 = vld [vmem:[#allocation2 + $0x109] sm:$0xff] }
 0x265   : > { %v6720_v51 = vpop.permute.xlu0 %1309  ;;  %1459 = vrot.lane.b32.xlu1 %v582_v50, %s5576_s30 }
 0x266   : > { %1461 = vrot.lane.b32.xlu2 %v583_v23, %s5576_s30 }
 0x267   : > { %v6727_v61 = vpop.permute.xlu1 %1311 }
 0x26a   : > { %1463 = vrot.lane.b32.xlu0 %v584_v21, %s5576_s30 }
 0x26b   : > { %v6725_v54 = vpop.permute.xlu2 %1331 }
 0x26c   : > { %9510 = vst [vmem:[#allocation132_spill] sm:$0xff] %v6725_v54  ;;  %v589_v54 = vld [vmem:[#allocation2 + $0x121] sm:$0xff] }
 0x26d   : > { %v6729_v35 = vpop.permute.xlu0 %1315  ;;  %1465 = vrot.lane.b32.xlu1 %v585_v63, %s5576_s30 }
 0x26e   : > { %1467 = vrot.lane.b32.xlu2 %v586_v62, %s5576_s30 }
 0x26f   : > { %v6736_v50 = vpop.permute.xlu1 %1317 }
 0x272   : > { %1469 = vrot.lane.b32.xlu0 %v587_v55, %s5576_s30 }
 0x273   : > { %v6734_v23 = vpop.permute.xlu2 %1337 }
 0x274   : > { %9511 = vst [vmem:[#allocation133_spill] sm:$0xff] %v6734_v23  ;;  %v592_v23 = vld [vmem:[#allocation2 + $0x141] sm:$0xff] }
 0x275   : > { %v6738_v21 = vpop.permute.xlu0 %1321  ;;  %1471 = vrot.lane.b32.xlu1 %v588_v5, %s5576_s30 }
 0x276   : > { %9512 = vst [vmem:[#allocation134_spill] sm:$0xff] %v6738_v21  ;;  %1473 = vrot.lane.b32.xlu2 %v589_v54, %s5576_s30  ;;  %v624_v21 = vld [vmem:[#allocation2 + $0x142] sm:$0xff] }
 0x277   : > { %v6745_v63 = vpop.permute.xlu1 %1323 }
 0x278   : > { %9514 = vst [vmem:[#allocation136_spill] sm:$0xff] %v6745_v63  ;;  %v609_v63 = vld [vmem:[#allocation2 + $0x92] sm:$0xff] }
 0x27a   : > { %1475 = vrot.lane.b32.xlu0 %v590_v33, %s5576_s30 }
 0x27b   : > { %v6743_v62 = vpop.permute.xlu2 %1343 }
 0x27c   : > { %9513 = vst [vmem:[#allocation135_spill] sm:$0xff] %v6743_v62  ;;  %v612_v62 = vld [vmem:[#allocation2 + $0xb2] sm:$0xff] }
 0x27d   : > { %v6747_v55 = vpop.permute.xlu0 %1327  ;;  %1477 = vrot.lane.b32.xlu1 %v591_v43, %s5576_s30 }
 0x27e   : > { %9515 = vst [vmem:[#allocation137_spill] sm:$0xff] %v6747_v55  ;;  %1479 = vrot.lane.b32.xlu2 %v592_v23, %s5576_s30  ;;  %v605_v55 = vld [vmem:[#allocation2 + $0x62] sm:$0xff] }
 0x27f   : > { %v6754_v5 = vpop.permute.xlu1 %1329 }
 0x280   : > { %9517 = vst [vmem:[#allocation139_spill] sm:$0xff] %v6754_v5  ;;  %v603_v5 = vld [vmem:[#allocation2 + $0x4a] sm:$0xff] }
 0x282   : > { %1481 = vrot.lane.b32.xlu0 %v593_v1, %s5576_s30 }
 0x283   : > { %v6752_v54 = vpop.permute.xlu2 %1349 }
 0x284   : > { %9516 = vst [vmem:[#allocation138_spill] sm:$0xff] %v6752_v54  ;;  %v599_v54 = vld [vmem:[#allocation2 + $0x199] sm:$0xff] }
 0x285   : > { %v6756_v33 = vpop.permute.xlu0 %1333  ;;  %1483 = vrot.lane.b32.xlu1 %v594_v60, %s5576_s30 }
 0x286   : > { %9518 = vst [vmem:[#allocation140_spill] sm:$0xff] %v6756_v33  ;;  %1485 = vrot.lane.b32.xlu2 %v595_v28, %s5576_s30  ;;  %v600_v33 = vld [vmem:[#allocation2 + $0x1a1] sm:$0xff] }
 0x287   : > { %v6763_v43 = vpop.permute.xlu1 %1335 }
 0x288   : > { %9520 = vst [vmem:[#allocation142_spill] sm:$0xff] %v6763_v43  ;;  %v602_v43 = vld [vmem:[#allocation2 + $0x3a] sm:$0xff] }
 0x28a   : > { %1487 = vrot.lane.b32.xlu0 %v596_v25, %s5576_s30 }
 0x28b   : > { %v6761_v23 = vpop.permute.xlu2 %1355 }
 0x28c   : > { %9519 = vst [vmem:[#allocation141_spill] sm:$0xff] %v6761_v23  ;;  %v601_v23 = vld [vmem:[#allocation2 + $0x32] sm:$0xff] }
 0x28d   : > { %v6765_v1 = vpop.permute.xlu0 %1339  ;;  %1489 = vrot.lane.b32.xlu1 %v6421_v57, %s5576_s30 }
 0x28e   : > { %1491 = vrot.lane.b32.xlu2 %v6435_v26, %s5576_s30 }
 0x28f   : > { %v6774_v60 = vpop.permute.xlu1 %1341 }
 0x292   : > { %1493 = vrot.lane.b32.xlu0 %v599_v54, %s5576_s30 }
 0x293   : > { %v6772_v28 = vpop.permute.xlu2 %1361 }
 0x294   : > { %9521 = vst [vmem:[#allocation143_spill] sm:$0xff] %v6772_v28  ;;  %v604_v28 = vld [vmem:[#allocation2 + $0x52] sm:$0xff] }
 0x295   : > { %v6776_v25 = vpop.permute.xlu0 %1345  ;;  %1495 = vrot.lane.b32.xlu1 %v600_v33, %s5576_s30 }
 0x296   : > { %9522 = vst [vmem:[#allocation144_spill] sm:$0xff] %v6776_v25  ;;  %1561 = vrot.lane.b32.xlu2 %v601_v23, %s5577_s6  ;;  %v606_v25 = vld [vmem:[#allocation2 + $0x6a] sm:$0xff] }
 0x297   : > { %v6783_v57 = vpop.permute.xlu1 %1347 }
 0x298   : > { %9524 = vst [vmem:[#allocation146_spill] sm:$0xff] %v6783_v57  ;;  %v608_v57 = vld [vmem:[#allocation2 + $0x82] sm:$0xff] }
 0x29a   : > { %1563 = vrot.lane.b32.xlu0 %v602_v43, %s5577_s6 }
 0x29b   : > { %v6781_v26 = vpop.permute.xlu2 %1367 }
 0x29c   : > { %9523 = vst [vmem:[#allocation145_spill] sm:$0xff] %v6781_v26  ;;  %v607_v26 = vld [vmem:[#allocation2 + $0x7a] sm:$0xff] }
 0x29d   : > { %v6785_v54 = vpop.permute.xlu0 %1351  ;;  %1565 = vrot.lane.b32.xlu1 %v603_v5, %s5577_s6 }
 0x29e   : > { %9525 = vst [vmem:[#allocation147_spill] sm:$0xff] %v6785_v54  ;;  %1567 = vrot.lane.b32.xlu2 %v604_v28, %s5577_s6  ;;  %v610_v54 = vld [vmem:[#allocation2 + $0x9a] sm:$0xff] }
 0x29f   : > { %v6792_v33 = vpop.permute.xlu1 %1353 }
 0x2a0   : > { %9526 = vst [vmem:[#allocation148_spill] sm:$0xff] %v6792_v33  ;;  %v611_v33 = vld [vmem:[#allocation2 + $0xaa] sm:$0xff] }
 0x2a2   : > { %1569 = vrot.lane.b32.xlu0 %v605_v55, %s5577_s6 }
 0x2a3   : > { %v6790_v23 = vpop.permute.xlu2 %1437 }
 0x2a5   : > { %v6794_v43 = vpop.permute.xlu0 %1357  ;;  %1571 = vrot.lane.b32.xlu1 %v606_v25, %s5577_s6 }
 0x2a6   : > { %9527 = vst [vmem:[#allocation149_spill] sm:$0xff] %v6794_v43  ;;  %1573 = vrot.lane.b32.xlu2 %v607_v26, %s5577_s6  ;;  %v613_v43 = vld [vmem:[#allocation2 + $0xc2] sm:$0xff] }
 0x2a7   : > { %v6801_v5 = vpop.permute.xlu1 %1359 }
 0x2a8   : > { %9528 = vst [vmem:[#allocation150_spill] sm:$0xff] %v6801_v5  ;;  %v614_v5 = vld [vmem:[#allocation2 + $0xca] sm:$0xff] }
 0x2aa   : > { %1575 = vrot.lane.b32.xlu0 %v608_v57, %s5577_s6 }
 0x2ab   : > { %v6799_v28 = vpop.permute.xlu2 %1443 }
 0x2ad   : > { %v6803_v55 = vpop.permute.xlu0 %1363  ;;  %1577 = vrot.lane.b32.xlu1 %v609_v63, %s5577_s6 }
 0x2ae   : > { %9529 = vst [vmem:[#allocation151_spill] sm:$0xff] %v6803_v55  ;;  %1579 = vrot.lane.b32.xlu2 %v610_v54, %s5577_s6  ;;  %v616_v55 = vld [vmem:[#allocation2 + $0xe2] sm:$0xff] }
 0x2af   : > { %v6810_v25 = vpop.permute.xlu1 %1365 }
 0x2b0   : > { %9531 = vst [vmem:[#allocation153_spill] sm:$0xff] %v6810_v25  ;;  %v617_v25 = vld [vmem:[#allocation2 + $0xf2] sm:$0xff] }
 0x2b2   : > { %1581 = vrot.lane.b32.xlu0 %v611_v33, %s5577_s6 }
 0x2b3   : > { %v6808_v26 = vpop.permute.xlu2 %1449 }
 0x2b4   : > { %9530 = vst [vmem:[#allocation152_spill] sm:$0xff] %v6808_v26 }
 0x2b5   : > { %v6812_v57 = vpop.permute.xlu0 %1433  ;;  %1583 = vrot.lane.b32.xlu1 %v612_v62, %s5577_s6 }
 0x2b6   : > { %1585 = vrot.lane.b32.xlu2 %v613_v43, %s5577_s6 }
 0x2b7   : > { %v6819_v63 = vpop.permute.xlu1 %1435 }
 0x2ba   : > { %1587 = vrot.lane.b32.xlu0 %v614_v5, %s5577_s6 }
 0x2bb   : > { %v6817_v54 = vpop.permute.xlu2 %1455 }
 0x2bc   : > { %9532 = vst [vmem:[#allocation154_spill] sm:$0xff] %v6817_v54  ;;  %v619_v54 = vld [vmem:[#allocation2 + $0x10a] sm:$0xff] }
 0x2bd   : > { %v6821_v33 = vpop.permute.xlu0 %1439  ;;  %1589 = vrot.lane.b32.xlu1 %v615_v53, %s5577_s6 }
 0x2be   : > { %1591 = vrot.lane.b32.xlu2 %v616_v55, %s5577_s6 }
 0x2bf   : > { %v6828_v62 = vpop.permute.xlu1 %1441 }
 0x2c2   : > { %1593 = vrot.lane.b32.xlu0 %v617_v25, %s5577_s6  ;;  %v1924_v25 = vld [vmem:[%s9319_s1 + $0x20] sm:$0xf] }
 0x2c3   : > { %v6826_v43 = vpop.permute.xlu2 %1461  ;;  %5341 = vmatpush.msk.msra.mxu0 %vm2026_vm3, %v1924_v25  ;;  %5473 = vmatpush.msk.msra.mxu3 %vm2026_vm3, %v1924_v25  ;;  %vm4770_vm3 = vcmask 1043459  }
 0x2c4   : > { %9533 = vst [vmem:[#allocation155_spill] sm:$0xff] %v6826_v43 }
 0x2c5   : > { %v6830_v5 = vpop.permute.xlu0 %1445  ;;  %1595 = vrot.lane.b32.xlu1 %v618_v49, %s5577_s6  ;;  %v1923_v49 = vld [vmem:[%s9319_s1 + $0x18] sm:$0xff] }
 0x2c6   : > { %1597 = vrot.lane.b32.xlu2 %v619_v54, %s5577_s6  ;;  %v621_v54 = vld [vmem:[#allocation2 + $0x122] sm:$0xff]  ;;  %2042 = vmatpush.msra.mxu0 %v1923_v49 }
 0x2c7   : > { %v6837_v53 = vpop.permute.xlu1 %1447  ;;  %5474 = vmatpush.msra.mxu3 %v1923_v49  ;;  %v1920_v49 = vld [vmem:[%s9319_s1] sm:$0xff] }
 0x2ca   : > { %1599 = vrot.lane.b32.xlu0 %v620_v38, %s5577_s6  ;;  %v1922_v38 = vld [vmem:[%s9319_s1 + $0x10] sm:$0xff] }
 0x2cb   : > { %v6835_v55 = vpop.permute.xlu2 %1467  ;;  %2043 = vmatpush.msra.mxu0 %v1922_v38  ;;  %5475 = vmatpush.msra.mxu3 %v1922_v38 }
 0x2cd   : > { %v6842_v43 = vpop.permute.xlu0 %1451  ;;  %1601 = vrot.lane.b32.xlu1 %v621_v54, %s5577_s6  ;;  %2044 = vmatpush.msra.mxu0 %v1921_v47  ;;  %v626_v54 = vld [vmem:[#allocation2 + $0x15a] sm:$0xff] }
 0x2ce   : > { %9534 = vst [vmem:[#allocation156_spill] sm:$0xff] %v6842_v43  ;;  %1603 = vrot.lane.b32.xlu2 %v622_v7, %s5577_s6  ;;  %5476 = vmatpush.msra.mxu3 %v1921_v47  ;;  %v625_v7 = vld [vmem:[#allocation2 + $0x152] sm:$0xff] }
 0x2cf   : > { %v6858_v43 = vpop.permute.xlu1 %1453  ;;  %2045 = vmatpush.msra.mxu0 %v1920_v49  ;;  %v628_v47 = vld [vmem:[#allocation2 + $0x172] sm:$0xff] }
 0x2d0   : > { %9536 = vst [vmem:[#allocation158_spill] sm:$0xff] %v6858_v43  ;;  %5477 = vmatpush.msra.mxu3 %v1920_v49 }
 0x2d2   : > { %1605 = vrot.lane.b32.xlu0 %v623_v48, %s5577_s6 }
 0x2d3   : > { %v6856_v25 = vpop.permute.xlu2 %1473 }
 0x2d4   : > { %9535 = vst [vmem:[#allocation157_spill] sm:$0xff] %v6856_v25  ;;  %v627_v25 = vld [vmem:[#allocation2 + $0x16a] sm:$0xff] }
 0x2d5   : > { %v6863_v26 = vpop.permute.xlu0 %1457  ;;  %1607 = vrot.lane.b32.xlu1 %v624_v21, %s5577_s6 }
 0x2d6   : > { %9537 = vst [vmem:[#allocation159_spill] sm:$0xff] %v6863_v26  ;;  %1609 = vrot.lane.b32.xlu2 %v625_v7, %s5577_s6 }
 0x2d7   : > { %v6870_v38 = vpop.permute.xlu1 %1459 }
 0x2d8   : > { %9539 = vst [vmem:[#allocation161_spill] sm:$0xff] %v6870_v38  ;;  %v9545_v38 = vld [vmem:[#allocation35_spill] sm:$0xff] }
 0x2da   : > { %1611 = vrot.lane.b32.xlu0 %v626_v54, %s5577_s6  ;;  %v631_v54 = vld [vmem:[#allocation2 + $0x19a] sm:$0xff] }
 0x2db   : > { %v6868_v48 = vpop.permute.xlu2 %1479 }
 0x2dc   : > { %9538 = vst [vmem:[#allocation160_spill] sm:$0xff] %v6868_v48  ;;  %v632_v48 = vld [vmem:[#allocation2 + $0x1a2] sm:$0xff] }
 0x2dd   : > { %v6872_v43 = vpop.permute.xlu0 %1463  ;;  %1613 = vrot.lane.b32.xlu1 %v627_v25, %s5577_s6 }
 0x2de   : > { %9540 = vst [vmem:[#allocation162_spill] sm:$0xff] %v6872_v43  ;;  %1615 = vrot.lane.b32.xlu2 %v628_v47, %s5577_s6  ;;  %v344_v43 = vld [vmem:[#allocation2] sm:$0xff] }
 0x2df   : > { %v6880_v21 = vpop.permute.xlu1 %1465 }
 0x2e0   : > { %9542 = vst [vmem:[#allocation164_spill] sm:$0xff] %v6880_v21 }
 0x2e2   : > { %1617 = vrot.lane.b32.xlu0 %v6557_v41, %s5577_s6  ;;  %v9544_v41 = vld [vmem:[#allocation6_spill] sm:$0xff] }
 0x2e3   : > { %v6878_v49 = vpop.permute.xlu2 %1485 }
 0x2e4   : > { %9541 = vst [vmem:[#allocation163_spill] sm:$0xff] %v6878_v49  ;;  %v1657_v49 = vsel %vm223_vm0, %v344_v43, %v9544_v41 }
 0x2e5   : > { %v6882_v7 = vpop.permute.xlu0 %1469  ;;  %1619 = vrot.lane.b32.xlu1 %v6559_v2, %s5577_s6  ;;  %v1690_v26 = vsel %vm1689_vm2, %v1657_v49, %v9545_v38 }
 0x2e6   : > { %1621 = vrot.lane.b32.xlu2 %v631_v54, %s5577_s6  ;;  %v1723_v54 = vsel %vm1722_vm4, %v1690_v26, %v6357_v30 }
 0x2e7   : > { %v6890_v47 = vpop.permute.xlu1 %1471  ;;  %v1756_v2 = vsel %vm1755_vm6, %v1723_v54, %v6483_v12  ;;  %v345_v54 = vld [vmem:[#allocation2 + $0x8] sm:$0xff] }
 0x2ea   : > { %1623 = vrot.lane.b32.xlu0 %v632_v48, %s5577_s6  ;;  %v1789_v48 = vsel %vm1788_vm5, %v1756_v2, %v6576_v8 }
 0x2eb   : > { %v6888_v25 = vpop.permute.xlu2 %1491  ;;  %v1822_v43 = vsel %vm1821_vm7, %v1789_v48, %v6718_v20  ;;  %v9549_v48 = vld [vmem:[#allocation10_spill] sm:$0xff] }
 0x2ec   : > { %9543 = vst [vmem:[#allocation165_spill] sm:$0xff] %v6888_v25  ;;  %v1855_v38 = vsel %vm1854_vm9, %v1822_v43, %v6812_v57  ;;  %v1658_v57 = vsel %vm223_vm0, %v345_v54, %v9549_v48  ;;  %v9550_v43 = vld [vmem:[#allocation46_spill] sm:$0xff] }
 0x2ed   : > { %v6894_v21 = vpop.permute.xlu0 %1475  ;;  %v1691_v25 = vsel %vm1689_vm2, %v1658_v57, %v9550_v43  ;;  %v5511_v43 = vld [vmem:[#allocation2 + $0x18] sm:$0xff] }
 0x2ef   : > { %v6908_v41 = vpop.permute.xlu1 %1477 }
 0x2f3   : > { %v1562_v49 = vpop.permute.xlu2 %1561 }
 0x2f4   : > { %v1888_v30 = vsel %vm1887_vm8, %v1855_v38, %v1562_v49  ;;  %v1724_v38 = vsel %vm1722_vm4, %v1691_v25, %v6319_v16 }
 0x2f5   : > { %v6911_v26 = vpop.permute.xlu0 %1481  ;;  %5342 = vmatmul.msk.f32.vlgmr.msra.gmra.mxu0 %vm1929_vm10, %v1888_v30  ;;  %v1757_v49 = vsel %vm1755_vm6, %v1724_v38, %v6493_v14  ;;  %v9552_v14 = vld [vmem:[#allocation49_spill] sm:$0xff] }
 0x2f6   : > { %v1790_v30 = vsel %vm1788_vm5, %v1757_v49, %v6608_v0 }
 0x2f7   : > { %v6914_v12 = vpop.permute.xlu1 %1483 }
 0x2fb   : > { %v1568_v25 = vpop.permute.xlu2 %1567 }
 0x2fd   : > { %v6916_v8 = vpop.permute.xlu0 %1487 }
 0x2fe   : > { %9546 = vst [vmem:[#allocation6_spill] sm:$0xff] %v6916_v8 }
 0x2ff   : > { %v6918_v20 = vpop.permute.xlu1 %1489 }
 0x300   : > { %9547 = vst [vmem:[#allocation35_spill] sm:$0xff] %v6918_v20  ;;  %v1823_v20 = vsel %vm1821_vm7, %v1790_v30, %v6689_v58 }
 0x301   : > { %v1856_v54 = vsel %vm1854_vm9, %v1823_v20, %v6819_v63 }
 0x305   : > { %v6920_v2 = vpop.permute.xlu0 %1493 }
 0x306   : > { %9548 = vst [vmem:[#allocation166_spill] sm:$0xff] %v6920_v2  ;;  %v9551_v2 = vld [vmem:[#allocation8_spill] sm:$0xff] }
 0x307   : > { %v6934_v8 = vpop.permute.xlu1 %1495  ;;  %v1659_v16 = vsel %vm223_vm0, %v5511_v43, %v9551_v2 }
 0x308   : > { %v1692_v0 = vsel %vm1689_vm2, %v1659_v16, %v9552_v14  ;;  %v1574_v16 = vpop.permute.xlu2 %1573 }
 0x309   : > { %v1725_v58 = vsel %vm1722_vm4, %v1692_v0, %v6359_v34  ;;  %v9554_v34 = vld [vmem:[#allocation38_spill] sm:$0xff] }
 0x30a   : > { %v1758_v38 = vsel %vm1755_vm6, %v1725_v58, %v6455_v3 }
 0x30b   : > { %v1791_v63 = vsel %vm1788_vm5, %v1758_v38, %v6617_v10 }
 0x30c   : > { %v1824_v20 = vsel %vm1821_vm7, %v1791_v63, %v6720_v51  ;;  %v5513_v63 = vld [vmem:[#allocation2 + $0x30] sm:$0xff] }
 0x30d   : > { %v1564_v48 = vpop.permute.xlu0 %1563  ;;  %v1857_v2 = vsel %vm1854_vm9, %v1824_v20, %v6790_v23  ;;  %v9555_v20 = vld [vmem:[#allocation4_spill] sm:$0xff] }
 0x30e   : > { %v1889_v57 = vsel %vm1887_vm8, %v1856_v54, %v1564_v48  ;;  %v5512_v54 = vld [vmem:[#allocation2 + $0x20] sm:$0xff] }
 0x30f   : > { %5343 = vmatmul.msk.f32.gmra.mxu0 %vm1929_vm10, %v1889_v57  ;;  %v1566_v49 = vpop.permute.xlu1 %1565  ;;  %v9553_v48 = vld [vmem:[#allocation12_spill] sm:$0xff] }
 0x310   : > { %v1890_v30 = vsel %vm1887_vm8, %v1857_v2, %v1566_v49  ;;  %v1660_v57 = vsel %vm223_vm0, %v5512_v54, %v9553_v48 }
 0x311   : > { %v1693_v3 = vsel %vm1689_vm2, %v1660_v57, %v9554_v34  ;;  %v9557_v34 = vld [vmem:[#allocation5_spill] sm:$0xff] }
 0x312   : > { %v1726_v10 = vsel %vm1722_vm4, %v1693_v3, %v6369_v36  ;;  %v1661_v36 = vsel %vm223_vm0, %v5513_v63, %v9555_v20  ;;  %v9558_v3 = vld [vmem:[#allocation53_spill] sm:$0xff] }
 0x313   : > { %v1759_v51 = vsel %vm1755_vm6, %v1726_v10, %v6495_v18  ;;  %v9556_v18 = vld [vmem:[#allocation50_spill] sm:$0xff]  ;;  %v9559_v63 = vld [vmem:[#allocation13_spill] sm:$0xff] }
 0x314   : > { %v1792_v23 = vsel %vm1788_vm5, %v1759_v51, %v6585_v6  ;;  %v1694_v49 = vsel %vm1689_vm2, %v1661_v36, %v9556_v18 }
 0x315   : > { %v1570_v43 = vpop.permute.xlu0 %1569  ;;  %v1825_v14 = vsel %vm1821_vm7, %v1792_v23, %v6727_v61  ;;  %v1727_v6 = vsel %vm1722_vm4, %v1694_v49, %v6331_v4  ;;  %v5514_v4 = vld [vmem:[#allocation2 + $0x38] sm:$0xff] }
 0x316   : > { %v1858_v58 = vsel %vm1854_vm9, %v1825_v14, %v6821_v33  ;;  %v1760_v61 = vsel %vm1755_vm6, %v1727_v6, %v6505_v22  ;;  %v1662_v22 = vsel %vm223_vm0, %v5514_v4, %v9557_v34  ;;  %v5516_v6 = vld [vmem:[#allocation2 + $0xc8] sm:$0xff]  ;;  %v9564_v4 = vld [vmem:[#allocation54_spill] sm:$0xff] }
 0x317   : > { %5344 = vmatmul.msk.f32.gmra.mxu0 %vm1929_vm10, %v1890_v30  ;;  %v1572_v0 = vpop.permute.xlu1 %1571  ;;  %v1891_v38 = vsel %vm1887_vm8, %v1858_v58, %v1568_v25  ;;  %v1793_v33 = vsel %vm1788_vm5, %v1760_v61, %v6619_v45  ;;  %v6984_v30 = vpop.permute.xlu2 %1579  ;;  %v1695_v45 = vsel %vm1689_vm2, %v1662_v22, %v9558_v3  ;;  %v9561_v61 = vld [vmem:[#allocation14_spill] sm:$0xff] }
 0x318   : > { %v1826_v25 = vsel %vm1821_vm7, %v1793_v33, %v6698_v15  ;;  %v1728_v15 = vsel %vm1722_vm4, %v1695_v45, %v6371_v40  ;;  %v1674_v33 = vsel %vm223_vm0, %v5516_v6, %v9561_v61  ;;  %v9569_v6 = vld [vmem:[#allocation134_spill] sm:$0xff] }
 0x319   : > { %v1859_v48 = vsel %vm1854_vm9, %v1826_v25, %v6828_v62  ;;  %v1761_v10 = vsel %vm1755_vm6, %v1728_v15, %v6467_v9 }
 0x31a   : > { %v1892_v57 = vsel %vm1887_vm8, %v1859_v48, %v1570_v43  ;;  %v1794_v62 = vsel %vm1788_vm5, %v1761_v10, %v6628_v24  ;;  %v9560_v24 = vld [vmem:[#allocation41_spill] sm:$0xff]  ;;  %v9562_v48 = vld [vmem:[#allocation15_spill] sm:$0xff] }
 0x31b   : > { %v1827_v43 = vsel %vm1821_vm7, %v1794_v62, %v6729_v35 }
 0x31c   : > { %v1860_v14 = vsel %vm1854_vm9, %v1827_v43, %v6799_v28 }
 0x31d   : > { %v1576_v2 = vpop.permute.xlu0 %1575  ;;  %v1893_v40 = vsel %vm1887_vm8, %v1860_v14, %v1572_v0  ;;  %v5518_v14 = vld [vmem:[#allocation2 + $0xd8] sm:$0xff] }
 0x31f   : > { %5345 = vmatmul.msk.f32.gmra.mxu0 %vm1929_vm10, %v1891_v38  ;;  %v6986_v54 = vpop.permute.xlu1 %1577  ;;  %v7010_v58 = vpop.permute.xlu2 %1585  ;;  %v5515_v38 = vld [vmem:[#allocation2 + $0x48] sm:$0xff] }
 0x320   : > { %v1663_v9 = vsel %vm223_vm0, %v5515_v38, %v9559_v63  ;;  %v9566_v38 = vld [vmem:[#allocation7_spill] sm:$0xff]  ;;  %v9567_v63 = vld [vmem:[#allocation57_spill] sm:$0xff] }
 0x321   : > { %v1696_v35 = vsel %vm1689_vm2, %v1663_v9, %v9560_v24 }
 0x322   : > { %v1729_v20 = vsel %vm1722_vm4, %v1696_v35, %v6381_v42 }
 0x323   : > { %v1762_v36 = vsel %vm1755_vm6, %v1729_v20, %v6507_v27  ;;  %v5517_v27 = vld [vmem:[#allocation2 + $0x50] sm:$0xff] }
 0x324   : > { %v1795_v28 = vsel %vm1788_vm5, %v1762_v36, %v6594_v17  ;;  %v1664_v17 = vsel %vm223_vm0, %v5517_v27, %v9562_v48  ;;  %v9572_v48 = vld [vmem:[#allocation16_spill] sm:$0xff] }
 0x325   : > { %v7004_v51 = vpop.permute.xlu0 %1581  ;;  %v1828_v0 = vsel %vm1821_vm7, %v1795_v28, %v6736_v50 }
 0x326   : > { %v1861_v49 = vsel %vm1854_vm9, %v1828_v0, %v6830_v5  ;;  %v1697_v5 = vsel %vm1689_vm2, %v1664_v17, %v9564_v4 }
 0x327   : > { %5346 = vmatmul.msk.f32.gmra.mxu0 %vm1929_vm10, %v1892_v57  ;;  %v7006_v23 = vpop.permute.xlu1 %1583  ;;  %v1894_v42 = vsel %vm1887_vm8, %v1861_v49, %v1574_v16  ;;  %v9563_v57 = vld [vmem:[#allocation71_spill] sm:$0xff]  ;;  %v7044_v22 = vpop.permute.xlu2 %1591  ;;  %v1730_v16 = vsel %vm1722_vm4, %v1697_v5, %v6343_v19  ;;  %v9575_v5 = vld [vmem:[#allocation86_spill] sm:$0xff] }
 0x328   : > { %v1707_v50 = vsel %vm1689_vm2, %v1674_v33, %v9563_v57  ;;  %v1763_v45 = vsel %vm1755_vm6, %v1730_v16, %v6517_v31  ;;  %v9573_v57 = vld [vmem:[#allocation72_spill] sm:$0xff]  ;;  %v9576_v16 = vld [vmem:[#allocation87_spill] sm:$0xff] }
 0x329   : > { %v1740_v34 = vsel %vm1722_vm4, %v1707_v50, %v6419_v56  ;;  %v1796_v10 = vsel %vm1788_vm5, %v1763_v45, %v6630_v29  ;;  %v9574_v50 = vld [vmem:[#allocation44_spill] sm:$0xff]  ;;  %v9577_v45 = vld [vmem:[#allocation31_spill] sm:$0xff] }
 0x32a   : > { %v1773_v3 = vsel %vm1755_vm6, %v1740_v34, %v6515_v39  ;;  %v1829_v62 = vsel %vm1821_vm7, %v1796_v10, %v6707_v11 }
 0x32b   : > { %v1806_v15 = vsel %vm1788_vm5, %v1773_v3, %v6673_v52  ;;  %v1862_v39 = vsel %vm1854_vm9, %v1829_v62, %v6837_v53  ;;  %v9565_v52 = vld [vmem:[#allocation28_spill] sm:$0xff]  ;;  %v9568_v53 = vld [vmem:[#allocation58_spill] sm:$0xff] }
 0x32c   : > { %v1839_v56 = vsel %vm1821_vm7, %v1806_v15, %v6765_v1  ;;  %v1895_v29 = vsel %vm1887_vm8, %v1862_v39, %v1576_v2  ;;  %v5519_v1 = vld [vmem:[#allocation2 + $0x60] sm:$0xff]  ;;  %v9578_v15 = vld [vmem:[#allocation106_spill] sm:$0xff] }
 0x32d   : > { %v7032_v25 = vpop.permute.xlu0 %1587  ;;  %v1872_v19 = vsel %vm1854_vm9, %v1839_v56, %v6835_v55  ;;  %v1665_v11 = vsel %vm223_vm0, %v5519_v1, %v9566_v38  ;;  %v9579_v56 = vld [vmem:[#allocation121_spill] sm:$0xff]  ;;  %v9583_v1 = vld [vmem:[#allocation156_spill] sm:$0xff] }
 0x32e   : > { %v1698_v9 = vsel %vm1689_vm2, %v1665_v11, %v9568_v53 }
 0x32f   : > { %5347 = vmatmul.msk.f32.gmra.mxu0 %vm1929_vm10, %v1893_v40  ;;  %v7026_v18 = vpop.permute.xlu1 %1589  ;;  %v1675_v40 = vsel %vm223_vm0, %v5518_v14, %v9565_v52  ;;  %v1731_v2 = vsel %vm1722_vm4, %v1698_v9, %v6383_v46  ;;  %v1598_v0 = vpop.permute.xlu2 %1597  ;;  %v9582_v52 = vld [vmem:[#allocation136_spill] sm:$0xff] }
 0x330   : > { %v1708_v55 = vsel %vm1689_vm2, %v1675_v40, %v9567_v63  ;;  %v1764_v36 = vsel %vm1755_vm6, %v1731_v2, %v6479_v13  ;;  %v5522_v63 = vld [vmem:[#allocation2 + $0xf0] sm:$0xff] }
 0x331   : > { %v1741_v24 = vsel %vm1722_vm4, %v1708_v55, %v6431_v59  ;;  %v1797_v49 = vsel %vm1788_vm5, %v1764_v36, %v6639_v37  ;;  %v9584_v55 = vld [vmem:[#allocation17_spill] sm:$0xff]  ;;  %v9585_v2 = vld [vmem:[#allocation18_spill] sm:$0xff]  ;;  %v9586_v36 = vld [vmem:[#allocation75_spill] sm:$0xff] }
 0x332   : > { %v1774_v20 = vsel %vm1755_vm6, %v1741_v24, %v6555_v44  ;;  %v1830_v61 = vsel %vm1821_vm7, %v1797_v49, %v9569_v6  ;;  %v9570_v44 = vld [vmem:[#allocation152_spill] sm:$0xff]  ;;  %v1677_v53 = vsel %vm223_vm0, %v5522_v63, %v9584_v55  ;;  %v5523_v24 = vld [vmem:[#allocation2 + $0x78] sm:$0xff] }
 0x333   : > { %v1807_v28 = vsel %vm1788_vm5, %v1774_v20, %v6637_v32  ;;  %v1863_v33 = vsel %vm1854_vm9, %v1830_v61, %v9570_v44  ;;  %v9571_v32 = vld [vmem:[#allocation33_spill] sm:$0xff]  ;;  %v1667_v20 = vsel %vm223_vm0, %v5523_v24, %v9585_v2  ;;  %v9588_v49 = vld [vmem:[#allocation95_spill] sm:$0xff]  ;;  %v9591_v44 = vld [vmem:[#allocation108_spill] sm:$0xff] }
 0x334   : > { %v1840_v59 = vsel %vm1821_vm7, %v1807_v28, %v6774_v60  ;;  %v1896_v37 = vsel %vm1887_vm8, %v1863_v33, %v6986_v54  ;;  %v5521_v60 = vld [vmem:[#allocation2 + $0x68] sm:$0xff]  ;;  %v9587_v28 = vld [vmem:[#allocation59_spill] sm:$0xff]  ;;  %v9608_v24 = vld [vmem:[#allocation146_spill] sm:$0xff] }
 0x335   : > { %v7078_v35 = vpop.permute.xlu0 %1593  ;;  %v1873_v46 = vsel %vm1854_vm9, %v1840_v59, %v6882_v7  ;;  %v1666_v17 = vsel %vm223_vm0, %v5521_v60, %v9572_v48  ;;  %v9589_v6 = vld [vmem:[#allocation83_spill] sm:$0xff]  ;;  %v9594_v60 = vld [vmem:[#allocation144_spill] sm:$0xff] }
 0x336   : > { %v1906_v13 = vsel %vm1887_vm8, %v1873_v46, %v1598_v0  ;;  %v1699_v4 = vsel %vm1689_vm2, %v1666_v17, %v9574_v50  ;;  %v1700_v0 = vsel %vm1689_vm2, %v1667_v20, %v9587_v28  ;;  %v9590_v46 = vld [vmem:[#allocation107_spill] sm:$0xff]  ;;  %v9609_v20 = vld [vmem:[#allocation137_spill] sm:$0xff]  ;;  %v9610_v28 = vld [vmem:[#allocation154_spill] sm:$0xff] }
 0x337   : > { %5348 = vmatmul.msk.f32.gmra.mxu0 %vm1929_vm10, %v1894_v42  ;;  %v1596_v43 = vpop.permute.xlu1 %1595  ;;  %v5520_v42 = vld [vmem:[#allocation2 + $0xe0] sm:$0xff]  ;;  %v1732_v3 = vsel %vm1722_vm4, %v1699_v4, %v9576_v16  ;;  %v1733_v61 = vsel %vm1722_vm4, %v1700_v0, %v9589_v6  ;;  %v9595_v17 = vld [vmem:[#allocation131_spill] sm:$0xff]  ;;  %v9597_v4 = vld [vmem:[#allocation158_spill] sm:$0xff]  ;;  %v1604_v55 = vpop.permute.xlu2 %1603 }
 0x338   : > { %v1905_v31 = vsel %vm1887_vm8, %v1872_v19, %v1596_v43  ;;  %v1676_v27 = vsel %vm223_vm0, %v5520_v42, %v9571_v32  ;;  %v1765_v10 = vsel %vm1755_vm6, %v1732_v3, %v9578_v15  ;;  %v9580_v43 = vld [vmem:[#allocation47_spill] sm:$0xff]  ;;  %v1766_v33 = vsel %vm1755_vm6, %v1733_v61, %v9591_v44  ;;  %v9598_v3 = vld [vmem:[#allocation34_spill] sm:$0xff]  ;;  %v5525_v15 = vld [vmem:[#allocation2 + $0x80] sm:$0xff] }
 0x339   : > { %5359 = vmatmul.msk.f32.vlgmr.msra.gmra.mxu3 %vm1929_vm10, %v1905_v31  ;;  %v1709_v7 = vsel %vm1689_vm2, %v1676_v27, %v9573_v57  ;;  %v1798_v39 = vsel %vm1788_vm5, %v1765_v10, %v9580_v43  ;;  %v9581_v31 = vld [vmem:[#allocation135_spill] sm:$0xff]  ;;  %v9593_v27 = vld [vmem:[#allocation56_spill] sm:$0xff]  ;;  %v9599_v10 = vld [vmem:[#allocation9_spill] sm:$0xff] }
 0x33a   : > { %v1742_v34 = vsel %vm1722_vm4, %v1709_v7, %v9575_v5  ;;  %v1831_v40 = vsel %vm1821_vm7, %v1798_v39, %v9582_v52  ;;  %v9596_v7 = vld [vmem:[#allocation157_spill] sm:$0xff]  ;;  %v5524_v16 = vld [vmem:[#allocation2 + $0xf8] sm:$0xff]  ;;  %v9603_v52 = vld [vmem:[#allocation88_spill] sm:$0xff] }
 0x33b   : > { %v1775_v54 = vsel %vm1755_vm6, %v1742_v34, %v9577_v45  ;;  %v1864_v38 = vsel %vm1854_vm9, %v1831_v40, %v9583_v1  ;;  %v1678_v45 = vsel %vm223_vm0, %v5524_v16, %v9598_v3  ;;  %v9601_v43 = vld [vmem:[#allocation63_spill] sm:$0xff]  ;;  %v9605_v1 = vld [vmem:[#allocation104_spill] sm:$0xff]  ;;  %v9621_v3 = vld [vmem:[#allocation138_spill] sm:$0xff] }
 0x33c   : > { %v1808_v62 = vsel %vm1788_vm5, %v1775_v54, %v9579_v56  ;;  %v1897_v9 = vsel %vm1887_vm8, %v1864_v38, %v6984_v30  ;;  %v1668_v56 = vsel %vm223_vm0, %v5525_v15, %v9599_v10  ;;  %v9611_v6 = vld [vmem:[#allocation36_spill] sm:$0xff]  ;;  %v9612_v44 = vld [vmem:[#allocation19_spill] sm:$0xff] }
 0x33d   : > { %v1600_v19 = vpop.permute.xlu0 %1599  ;;  %v1841_v14 = vsel %vm1821_vm7, %v1808_v62, %v9581_v31  ;;  %v9600_v62 = vld [vmem:[#allocation62_spill] sm:$0xff]  ;;  %v1701_v39 = vsel %vm1689_vm2, %v1668_v56, %v9601_v43  ;;  %v9602_v31 = vld [vmem:[#allocation97_spill] sm:$0xff]  ;;  %v9623_v56 = vld [vmem:[#allocation159_spill] sm:$0xff] }
 0x33e   : > { %v1734_v40 = vsel %vm1722_vm4, %v1701_v39, %v9603_v52  ;;  %v5528_v43 = vld [vmem:[#allocation2 + $0x110] sm:$0xff]  ;;  %v9624_v39 = vld [vmem:[#allocation21_spill] sm:$0xff]  ;;  %v5529_v52 = vld [vmem:[#allocation2 + $0x98] sm:$0xff] }
 0x33f   : > { %5349 = vmatmul.msk.f32.gmra.mxu0 %vm1929_vm10, %v1895_v29  ;;  %v1874_v29 = vsel %vm1854_vm9, %v1841_v14, %v6890_v47  ;;  %v1710_v47 = vsel %vm1689_vm2, %v1677_v53, %v9586_v36  ;;  %v1602_v32 = vpop.permute.xlu1 %1601  ;;  %v1767_v38 = vsel %vm1755_vm6, %v1734_v40, %v9605_v1  ;;  %v9607_v53 = vld [vmem:[#allocation61_spill] sm:$0xff]  ;;  %v9625_v40 = vld [vmem:[#allocation22_spill] sm:$0xff]  ;;  %v9627_v1 = vld [vmem:[#allocation64_spill] sm:$0xff] }
 0x340   : > { %v1907_v11 = vsel %vm1887_vm8, %v1874_v29, %v1600_v19  ;;  %v1743_v59 = vsel %vm1722_vm4, %v1710_v47, %v9588_v49  ;;  %v1711_v19 = vsel %vm1689_vm2, %v1678_v45, %v9600_v62  ;;  %v9604_v29 = vld [vmem:[#allocation111_spill] sm:$0xff] }
 0x341   : > { %5360 = vmatmul.msk.f32.gmra.mxu3 %vm1929_vm10, %v1906_v13  ;;  %v1776_v30 = vsel %vm1755_vm6, %v1743_v59, %v9590_v46  ;;  %v9592_v13 = vld [vmem:[#allocation123_spill] sm:$0xff]  ;;  %v1744_v14 = vsel %vm1722_vm4, %v1711_v19, %v9602_v31  ;;  %v5526_v59 = vld [vmem:[#allocation2 + $0x108] sm:$0xff]  ;;  %v1680_v31 = vsel %vm223_vm0, %v5528_v43, %v9624_v39 }
 0x342   : > { %v1809_v42 = vsel %vm1788_vm5, %v1776_v30, %v9592_v13  ;;  %v1679_v61 = vsel %vm223_vm0, %v5526_v59, %v9611_v6  ;;  %v5527_v30 = vld [vmem:[#allocation2 + $0x90] sm:$0xff]  ;;  %v9613_v13 = vld [vmem:[#allocation76_spill] sm:$0xff]  ;;  %v9648_v39 = vld [vmem:[#allocation119_spill] sm:$0xff] }
 0x343   : > { %v1842_v48 = vsel %vm1821_vm7, %v1809_v42, %v9594_v60  ;;  %v9614_v42 = vld [vmem:[#allocation48_spill] sm:$0xff]  ;;  %v9616_v60 = vld [vmem:[#allocation90_spill] sm:$0xff] }
 0x344   : > { %v1875_v50 = vsel %vm1854_vm9, %v1842_v48, %v9596_v7  ;;  %v9635_v6 = vld [vmem:[#allocation132_spill] sm:$0xff] }
 0x345   : > { %v1908_v34 = vsel %vm1887_vm8, %v1875_v50, %v1602_v32  ;;  %v9619_v50 = vld [vmem:[#allocation124_spill] sm:$0xff] }
 0x347   : > { %5350 = vmatmul.msk.f32.gmra.mxu0 %vm1929_vm10, %v1896_v37  ;;  %v1799_v37 = vsel %vm1788_vm5, %v1766_v33, %v9593_v27  ;;  %v1669_v33 = vsel %vm223_vm0, %v5527_v30, %v9612_v44  ;;  %v9615_v27 = vld [vmem:[#allocation89_spill] sm:$0xff] }
 0x348   : > { %v1832_v57 = vsel %vm1821_vm7, %v1799_v37, %v9595_v17  ;;  %v1702_v32 = vsel %vm1689_vm2, %v1669_v33, %v9614_v42  ;;  %v9617_v17 = vld [vmem:[#allocation112_spill] sm:$0xff]  ;;  %v9637_v44 = vld [vmem:[#allocation161_spill] sm:$0xff] }
 0x349   : > { %5361 = vmatmul.msk.f32.gmra.mxu3 %vm1929_vm10, %v1907_v11  ;;  %v1865_v5 = vsel %vm1854_vm9, %v1832_v57, %v9597_v4  ;;  %v9606_v11 = vld [vmem:[#allocation60_spill] sm:$0xff]  ;;  %v1735_v48 = vsel %vm1722_vm4, %v1702_v32, %v9616_v60  ;;  %v9618_v57 = vld [vmem:[#allocation109_spill] sm:$0xff]  ;;  %v9639_v60 = vld [vmem:[#allocation11_spill] sm:$0xff] }
 0x34a   : > { %v1898_v54 = vsel %vm1887_vm8, %v1865_v5, %v7004_v51  ;;  %v1777_v51 = vsel %vm1755_vm6, %v1744_v14, %v9604_v29  ;;  %v1768_v7 = vsel %vm1755_vm6, %v1735_v48, %v9618_v57  ;;  %v1606_v5 = vpop.permute.xlu0 %1605  ;;  %v1670_v29 = vsel %vm223_vm0, %v5529_v52, %v9625_v40  ;;  %v9638_v42 = vld [vmem:[#allocation37_spill] sm:$0xff]  ;;  %v7277_v57 = vld [vmem:[%s9320_s2] ss:$0 sm:$0xff] }
 0x34b   : > { %v1810_v63 = vsel %vm1788_vm5, %v1777_v51, %v9606_v11  ;;  %v9626_v51 = vld [vmem:[#allocation77_spill] sm:$0xff]  ;;  %v9628_v11 = vld [vmem:[#allocation98_spill] sm:$0xff] }
 0x34c   : > { %v1843_v2 = vsel %vm1821_vm7, %v1810_v63, %v9608_v24  ;;  %v9631_v24 = vld [vmem:[#allocation24_spill] sm:$0xff] }
 0x34d   : > { %v1876_v47 = vsel %vm1854_vm9, %v1843_v2, %v6894_v21  ;;  %v1712_v21 = vsel %vm1689_vm2, %v1679_v61, %v9613_v13 }
 0x34e   : > { %v1909_v49 = vsel %vm1887_vm8, %v1876_v47, %v1604_v55  ;;  %v1745_v37 = vsel %vm1722_vm4, %v1712_v21, %v9615_v27  ;;  %v9629_v55 = vld [vmem:[#allocation84_spill] sm:$0xff]  ;;  %v1608_v47 = vpop.permute.xlu1 %1607 }
 0x34f   : > { %5351 = vmatmul.msk.f32.gmra.mxu0 %vm1929_vm10, %v1897_v9  ;;  %v1800_v9 = vsel %vm1788_vm5, %v1767_v38, %v9607_v53  ;;  %v1703_v38 = vsel %vm1689_vm2, %v1670_v29, %v9627_v1  ;;  %v5530_v21 = vld [vmem:[#allocation2 + $0x120] sm:$0xff]  ;;  %v9651_v1 = vld [vmem:[#allocation155_spill] sm:$0xff] }
 0x350   : > { %v1833_v36 = vsel %vm1821_vm7, %v1800_v9, %v9609_v20  ;;  %v1736_v53 = vsel %vm1722_vm4, %v1703_v38, %v9629_v55  ;;  %v9630_v9 = vld [vmem:[#allocation20_spill] sm:$0xff]  ;;  %v9632_v20 = vld [vmem:[#allocation125_spill] sm:$0xff]  ;;  %v1681_v32 = vsel %vm223_vm0, %v5530_v21, %v9638_v42  ;;  %v9661_v42 = vld [vmem:[#allocation55_spill] sm:$0xff] }
 0x351   : > { %5362 = vmatmul.msk.f32.gmra.mxu3 %vm1929_vm10, %v1908_v34  ;;  %v1866_v0 = vsel %vm1854_vm9, %v1833_v36, %v9610_v28  ;;  %v9620_v34 = vld [vmem:[#allocation51_spill] sm:$0xff]  ;;  %v1769_v2 = vsel %vm1755_vm6, %v1736_v53, %v9631_v24  ;;  %v9633_v28 = vld [vmem:[#allocation65_spill] sm:$0xff]  ;;  %v9650_v29 = vld [vmem:[#allocation140_spill] sm:$0xff] }
 0x352   : > { %v1899_v46 = vsel %vm1887_vm8, %v1866_v0, %v7006_v23  ;;  %v1778_v23 = vsel %vm1755_vm6, %v1745_v37, %v9617_v17  ;;  %v1801_v16 = vsel %vm1788_vm5, %v1768_v7, %v9620_v34  ;;  %v1802_v0 = vsel %vm1788_vm5, %v1769_v2, %v9633_v28  ;;  %v5531_v37 = vld [vmem:[#allocation2 + $0xa8] sm:$0xff]  ;;  %v9640_v17 = vld [vmem:[#allocation67_spill] sm:$0xff]  ;;  %v9641_v7 = vld [vmem:[#allocation68_spill] sm:$0xff]  ;;  %v1612_v21 = vpop.permute.xlu0 %1611 }
 0x353   : > { %v1811_v4 = vsel %vm1788_vm5, %v1778_v23, %v9619_v50  ;;  %v1835_v61 = vsel %vm1821_vm7, %v1802_v0, %v9635_v6  ;;  %v1671_v48 = vsel %vm223_vm0, %v5531_v37, %v9639_v60  ;;  %v1714_v23 = vsel %vm1689_vm2, %v1681_v32, %v9640_v17  ;;  %v9644_v34 = vld [vmem:[#allocation91_spill] sm:$0xff]  ;;  %v5532_v55 = vld [vmem:[#allocation2 + $0x128] sm:$0xff]  ;;  %v9656_v0 = vld [vmem:[#allocation92_spill] sm:$0xff] }
 0x354   : > { %v1844_v45 = vsel %vm1821_vm7, %v1811_v4, %v9621_v3  ;;  %v1868_v33 = vsel %vm1854_vm9, %v1835_v61, %v9637_v44  ;;  %v1704_v50 = vsel %vm1689_vm2, %v1671_v48, %v9641_v7  ;;  %v9642_v4 = vld [vmem:[#allocation99_spill] sm:$0xff]  ;;  %v9645_v3 = vld [vmem:[#allocation113_spill] sm:$0xff]  ;;  %v9658_v6 = vld [vmem:[#allocation114_spill] sm:$0xff] }
 0x355   : > { %v1877_v10 = vsel %vm1854_vm9, %v1844_v45, %v6908_v41  ;;  %v1713_v41 = vsel %vm1689_vm2, %v1680_v31, %v9626_v51  ;;  %v1901_v27 = vsel %vm1887_vm8, %v1868_v33, %v7032_v25  ;;  %v1747_v25 = vsel %vm1722_vm4, %v1714_v23, %v9642_v4  ;;  %v9652_v53 = vld [vmem:[#allocation39_spill] sm:$0xff]  ;;  %v9660_v33 = vld [vmem:[#allocation126_spill] sm:$0xff] }
 0x356   : > { %v1910_v19 = vsel %vm1887_vm8, %v1877_v10, %v1606_v5  ;;  %v1746_v63 = vsel %vm1722_vm4, %v1713_v41, %v9628_v11  ;;  %v9643_v5 = vmov 0.0   ;;  %v1780_v45 = vsel %vm1755_vm6, %v1747_v25, %v9645_v3  ;;  %v9653_v24 = vld [vmem:[#allocation23_spill] sm:$0xff]  ;;  %v9663_v60 = vld [vmem:[#allocation142_spill] sm:$0xff]  ;;  %v5535_v3 = vld [vmem:[#allocation2 + $0xc0] sm:$0xff] }
 0x357   : > { %5352 = vmatmul.msk.f32.gmra.mxu0 %vm1929_vm10, %v1898_v54  ;;  %v9622_v54 = vld [vmem:[#allocation139_spill] sm:$0xff]  ;;  %2181 = vst.msk [vmem:[#allocation3 + $0x28] sm:$0x3] %vm2177_vm11, %v9643_v5  ;;  %v9664_v23 = vld [vmem:[#allocation162_spill] sm:$0xff] }
 0x358   : > { %v1834_v15 = vsel %vm1821_vm7, %v1801_v16, %v9622_v54  ;;  %v1737_v16 = vsel %vm1722_vm4, %v1704_v50, %v9644_v34  ;;  %2178 = vst.msk [vmem:[#allocation3 + $0x10] sm:$0x3] %vm2177_vm11, %v9643_v5  ;;  %v2295_v54 = vld [vmem:[#allocation3 + $0x1] sm:$0xff] }
 0x359   : > { %5363 = vmatmul.msk.f32.gmra.mxu3 %vm1929_vm10, %v1909_v49  ;;  %v1867_v62 = vsel %vm1854_vm9, %v1834_v15, %v9623_v56  ;;  %v9634_v49 = vld [vmem:[#allocation147_spill] sm:$0xff]  ;;  %v9646_v15 = vld [vmem:[#allocation105_spill] sm:$0xff]  ;;  %v9647_v56 = vld [vmem:[#allocation66_spill] sm:$0xff]  ;;  %2184 = vst.msk [vmem:[#allocation3 + $0x40] sm:$0x3] %vm2177_vm11, %v9643_v5  ;;  %2584 = vrot.lane.b32.xlu1 %v2295_v54, %s5571_s25 }
 0x35a   : > { %v1900_v14 = vsel %vm1887_vm8, %v1867_v62, %v7010_v58  ;;  %v1779_v58 = vsel %vm1755_vm6, %v1746_v63, %v9630_v9  ;;  %v1770_v10 = vsel %vm1755_vm6, %v1737_v16, %v9646_v15  ;;  %v1813_v62 = vsel %vm1788_vm5, %v1780_v45, %v9647_v56  ;;  %2187 = vst.msk [vmem:[#allocation3 + $0x58] sm:$0x3] %vm2177_vm11, %v9643_v5  ;;  %v5534_v4 = vld [vmem:[#allocation2 + $0x138] sm:$0xff]  ;;  %v9665_v25 = vld [vmem:[#allocation26_spill] sm:$0xff]  ;;  %v9668_v56 = vld [vmem:[#allocation69_spill] sm:$0xff] }
 0x35b   : > { %v1812_v36 = vsel %vm1788_vm5, %v1779_v58, %v9632_v20  ;;  %v1803_v31 = vsel %vm1788_vm5, %v1770_v10, %v9648_v39  ;;  %2190 = vst.msk [vmem:[#allocation3 + $0x70] sm:$0x3] %vm2177_vm11, %v9643_v5  ;;  %v1682_v9 = vsel %vm223_vm0, %v5532_v55, %v9652_v53  ;;  %v5533_v58 = vld [vmem:[#allocation2 + $0xb0] sm:$0xff]  ;;  %v1683_v34 = vsel %vm223_vm0, %v5534_v4, %v9665_v25  ;;  %v9666_v45 = vld [vmem:[#allocation27_spill] sm:$0xff]  ;;  %v9676_v55 = vld [vmem:[#allocation133_spill] sm:$0xff] }
 0x35c   : > { %v1845_v59 = vsel %vm1821_vm7, %v1812_v36, %v9634_v49  ;;  %v1836_v51 = vsel %vm1821_vm7, %v1803_v31, %v9650_v29  ;;  %2193 = vst.msk [vmem:[#allocation3 + $0x88] sm:$0x3] %vm2177_vm11, %v9643_v5  ;;  %v1672_v2 = vsel %vm223_vm0, %v5533_v58, %v9653_v24  ;;  %v9654_v20 = vld [vmem:[#allocation78_spill] sm:$0xff]  ;;  %v9657_v49 = vld [vmem:[#allocation93_spill] sm:$0xff]  ;;  %v1673_v54 = vsel %vm223_vm0, %v5535_v3, %v9666_v45  ;;  %v9667_v15 = vld [vmem:[#allocation79_spill] sm:$0xff]  ;;  %v1618_v3 = vpop.permute.xlu0 %1617 }
 0x35d   : > { %v1869_v38 = vsel %vm1854_vm9, %v1836_v51, %v9651_v1  ;;  %2196 = vst.msk [vmem:[#allocation3 + $0xa0] sm:$0x3] %vm2177_vm11, %v9643_v5  ;;  %v1715_v36 = vsel %vm1689_vm2, %v1682_v9, %v9654_v20  ;;  %v1716_v10 = vsel %vm1689_vm2, %v1683_v34, %v9667_v15  ;;  %v9671_v31 = vld [vmem:[#allocation30_spill] sm:$0xff]  ;;  %v9673_v29 = vld [vmem:[#allocation127_spill] sm:$0xff]  ;;  %v9674_v1 = vld [vmem:[#allocation120_spill] sm:$0xff] }
 0x35e   : > { %2199 = vst.msk [vmem:[#allocation3 + $0xb8] sm:$0x3] %vm2177_vm11, %v9643_v5  ;;  %v9677_v9 = vld [vmem:[#allocation163_spill] sm:$0xff]  ;;  %v9678_v58 = vld [vmem:[#allocation164_spill] sm:$0xff] }
 0x35f   : > { %5353 = vmatmul.msk.f32.gmra.mxu0 %vm1929_vm10, %v1899_v46  ;;  %v9636_v46 = vld [vmem:[#allocation160_spill] sm:$0xff]  ;;  %2202 = vst.msk [vmem:[#allocation3 + $0xd0] sm:$0x3] %vm2177_vm11, %v9643_v5  ;;  %v9691_v45 = vld [vmem:[#allocation143_spill] sm:$0xff] }
 0x360   : > { %v1878_v30 = vsel %vm1854_vm9, %v1845_v59, %v9636_v46  ;;  %v2296_v46 = vld [vmem:[#allocation3 + $0x9] sm:$0xff]  ;;  %2205 = vst.msk [vmem:[#allocation3 + $0xe8] sm:$0x3] %vm2177_vm11, %v9643_v5 }
 0x361   : > { %5364 = vmatmul.msk.f32.gmra.mxu3 %vm1929_vm10, %v1910_v19  ;;  %v1911_v13 = vsel %vm1887_vm8, %v1878_v30, %v1608_v47  ;;  %v1610_v19 = vpop.permute.xlu2 %1609  ;;  %v9655_v47 = vld [vmem:[#allocation52_spill] sm:$0xff]  ;;  %v9659_v30 = vld [vmem:[#allocation110_spill] sm:$0xff]  ;;  %2586 = vrot.lane.b32.xlu2 %v2296_v46, %s5571_s25  ;;  %2208 = vst.msk [vmem:[#allocation3 + $0x100] sm:$0x3] %vm2177_vm11, %v9643_v5  ;;  %v9692_v15 = vld [vmem:[#allocation35_spill] sm:$0xff] }
 0x362   : > { %v1705_v28 = vsel %vm1689_vm2, %v1672_v2, %v9655_v47  ;;  %2211 = vst.msk [vmem:[#allocation3 + $0x118] sm:$0x3] %vm2177_vm11, %v9643_v5  ;;  %v5536_v20 = vld [vmem:[#allocation2 + $0x140] sm:$0xff] }
 0x363   : > { %v1738_v59 = vsel %vm1722_vm4, %v1705_v28, %v9657_v49  ;;  %2214 = vst.msk [vmem:[#allocation3 + $0x130] sm:$0x3] %vm2177_vm11, %v9643_v5  ;;  %v9680_v28 = vld [vmem:[#allocation70_spill] sm:$0xff]  ;;  %v9689_v4 = vld [vmem:[#allocation116_spill] sm:$0xff] }
 0x364   : > { %v1771_v44 = vsel %vm1755_vm6, %v1738_v59, %v9659_v30  ;;  %2217 = vst.msk [vmem:[#allocation3 + $0x148] sm:$0x3] %vm2177_vm11, %v9643_v5  ;;  %v9682_v59 = vld [vmem:[#allocation115_spill] sm:$0xff]  ;;  %v9690_v34 = vld [vmem:[#allocation128_spill] sm:$0xff] }
 0x365   : > { %v1804_v32 = vsel %vm1788_vm5, %v1771_v44, %v9661_v42  ;;  %2220 = vst.msk [vmem:[#allocation3 + $0x160] sm:$0x3] %vm2177_vm11, %v9643_v5  ;;  %v9684_v44 = vld [vmem:[#allocation150_spill] sm:$0xff] }
 0x366   : > { %v1837_v48 = vsel %vm1821_vm7, %v1804_v32, %v9663_v60  ;;  %2223 = vst.msk [vmem:[#allocation3 + $0x178] sm:$0x3] %vm2177_vm11, %v9643_v5 }
 0x367   : > { %5354 = vmatmul.msk.f32.gmra.mxu0 %vm1929_vm10, %v1900_v14  ;;  %v9649_v14 = vld [vmem:[#allocation148_spill] sm:$0xff]  ;;  %v1870_v7 = vsel %vm1854_vm9, %v1837_v48, %v9664_v23  ;;  %2226 = vst.msk [vmem:[#allocation3 + $0x190] sm:$0x3] %vm2177_vm11, %v9643_v5 }
 0x368   : > { %v1846_v52 = vsel %vm1821_vm7, %v1813_v62, %v9649_v14  ;;  %v9669_v62 = vld [vmem:[#allocation100_spill] sm:$0xff]  ;;  %2229 = vst.msk [vmem:[#allocation3 + $0x1a8] sm:$0x3] %vm2177_vm11, %v9643_v5 }
 0x369   : > { %5365 = vmatmul.msk.f32.gmra.mxu3 %vm1929_vm10, %v1911_v13  ;;  %v1879_v41 = vsel %vm1854_vm9, %v1846_v52, %v6911_v26  ;;  %v1902_v26 = vsel %vm1887_vm8, %v1869_v38, %v7026_v18  ;;  %v1748_v18 = vsel %vm1722_vm4, %v1715_v36, %v9656_v0  ;;  %v9672_v52 = vld [vmem:[#allocation25_spill] sm:$0xff]  ;;  %v9679_v36 = vld [vmem:[#allocation40_spill] sm:$0xff]  ;;  %v1616_v30 = vpop.permute.xlu2 %1615 }
 0x36a   : > { %v1912_v63 = vsel %vm1887_vm8, %v1879_v41, %v1610_v19  ;;  %v1781_v61 = vsel %vm1755_vm6, %v1748_v18, %v9658_v6  ;;  %v1749_v19 = vsel %vm1722_vm4, %v1716_v10, %v9669_v62  ;;  %v1614_v41 = vpop.permute.xlu1 %1613  ;;  %v1684_v5 = vsel %vm223_vm0, %v5536_v20, %v9679_v36  ;;  %v9681_v18 = vld [vmem:[#allocation101_spill] sm:$0xff]  ;;  %v9687_v48 = vld [vmem:[#allocation80_spill] sm:$0xff]  ;;  %v9700_v36 = vld [vmem:[#allocation43_spill] sm:$0xff] }
 0x36b   : > { %v1814_v13 = vsel %vm1788_vm5, %v1781_v61, %v9660_v33  ;;  %v1782_v14 = vsel %vm1755_vm6, %v1749_v19, %v9671_v31  ;;  %v1717_v0 = vsel %vm1689_vm2, %v1684_v5, %v9680_v28  ;;  %v9683_v61 = vld [vmem:[#allocation73_spill] sm:$0xff]  ;;  %v5538_v19 = vld [vmem:[#allocation2 + $0x158] sm:$0xff] }
 0x36c   : > { %v1815_v51 = vsel %vm1788_vm5, %v1782_v14, %v9673_v29  ;;  %v1750_v49 = vsel %vm1722_vm4, %v1717_v0, %v9681_v18  ;;  %v9694_v31 = vld [vmem:[#allocation81_spill] sm:$0xff]  ;;  %v9702_v18 = vld [vmem:[#allocation103_spill] sm:$0xff] }
 0x36d   : > { %v1783_v6 = vsel %vm1755_vm6, %v1750_v49, %v9682_v59  ;;  %v5539_v20 = vld [vmem:[#allocation2 + $0x168] sm:$0xff] }
 0x36e   : > { %v1816_v46 = vsel %vm1788_vm5, %v1783_v6, %v9683_v61  ;;  %v1687_v5 = vsel %vm223_vm0, %v5539_v20, %v9700_v36  ;;  %v9703_v6 = vld [vmem:[#allocation117_spill] sm:$0xff] }
 0x36f   : > { %5355 = vmatmul.msk.f32.gmra.mxu0 %vm1929_vm10, %v1901_v27  ;;  %v9662_v27 = vld [vmem:[#allocation141_spill] sm:$0xff]  ;;  %v1849_v33 = vsel %vm1821_vm7, %v1816_v46, %v9684_v44  ;;  %v9704_v46 = vld [vmem:[#allocation122_spill] sm:$0xff] }
 0x370   : > { %v1847_v37 = vsel %vm1821_vm7, %v1814_v13, %v9662_v27  ;;  %v9685_v13 = vld [vmem:[#allocation6_spill] sm:$0xff] }
 0x371   : > { %5366 = vmatmul.msk.f32.gmra.mxu3 %vm1929_vm10, %v1912_v63  ;;  %v1880_v17 = vsel %vm1854_vm9, %v1847_v37, %v6914_v12  ;;  %v1903_v12 = vsel %vm1887_vm8, %v1870_v7, %v7044_v22  ;;  %v1706_v22 = vsel %vm1689_vm2, %v1673_v54, %v9668_v56  ;;  %v5537_v27 = vld [vmem:[#allocation2 + $0x150] sm:$0xff]  ;;  %v1622_v44 = vpop.permute.xlu2 %1621 }
 0x372   : > { %v2047_v43 = vpop.f32.mrf.mxu0  ;;  %v1913_v50 = vsel %vm1887_vm8, %v1880_v17, %v1612_v21  ;;  %v9686_v37 = vld [vmem:[#allocation42_spill] sm:$0xff] }
 0x373   : > { %v2048_v40 = vadd.f32 %v7277_v57, %v2047_v43  ;;  %v9670_v43 = vld [vmem:[#allocation85_spill] sm:$0xff]  ;;  %v1685_v60 = vsel %vm223_vm0, %v5537_v27, %v9686_v37  ;;  %v9688_v7 = vld [vmem:[#allocation94_spill] sm:$0xff] }
 0x374   : > { %v1739_v39 = vsel %vm1722_vm4, %v1706_v22, %v9670_v43  ;;  %v1718_v17 = vsel %vm1689_vm2, %v1685_v60, %v9687_v48  ;;  %v9693_v43 = vld [vmem:[#allocation32_spill] sm:$0xff]  ;;  %v5540_v37 = vld [vmem:[#allocation2 + $0x170] sm:$0xff]  ;;  %v9707_v60 = vld [vmem:[#allocation45_spill] sm:$0xff] }
 0x375   : > { %v2143_v11 = vmax.f32 %v2048_v40, 0.0  ;;  %v1772_v40 = vsel %vm1755_vm6, %v1739_v39, %v9672_v52  ;;  %v1686_v39 = vsel %vm223_vm0, %v5538_v19, %v9693_v43  ;;  %v1688_v48 = vsel %vm223_vm0, %v5540_v37, %v9707_v60 }
 0x376   : > { %v1805_v38 = vsel %vm1788_vm5, %v1772_v40, %v9674_v1  ;;  %v1719_v14 = vsel %vm1689_vm2, %v1686_v39, %v9694_v31  ;;  %v9695_v40 = vld [vmem:[#allocation102_spill] sm:$0xff]  ;;  %vm3849_vm0 = vcmask 588800  }
 0x377   : > { %2231 = vst.msk [vmem:[#allocation3 + $0x19] sm:$0xff] %vm1689_vm2, %v2143_v11  ;;  %5356 = vmatmul.msk.f32.gmra.mxu0 %vm1929_vm10, %v1902_v26  ;;  %v9675_v11 = vld [vmem:[#allocation149_spill] sm:$0xff]  ;;  %v1838_v53 = vsel %vm1821_vm7, %v1805_v38, %v9676_v55  ;;  %v1752_v29 = vsel %vm1722_vm4, %v1719_v14, %v9695_v40  ;;  %v9698_v55 = vld [vmem:[#allocation151_spill] sm:$0xff] }
 0x378   : > { %v1848_v63 = vsel %vm1821_vm7, %v1815_v51, %v9675_v11  ;;  %v1871_v24 = vsel %vm1854_vm9, %v1838_v53, %v9678_v58  ;;  %v9697_v38 = vld [vmem:[#allocation129_spill] sm:$0xff] }
 0x379   : > { %5367 = vmatmul.msk.f32.gmra.mxu3 %vm1929_vm10, %v1913_v50  ;;  %v1881_v26 = vsel %vm1854_vm9, %v1848_v63, %v9677_v9  ;;  %v1904_v47 = vsel %vm1887_vm8, %v1871_v24, %v7078_v35  ;;  %v1882_v35 = vsel %vm1854_vm9, %v1849_v33, %v9685_v13  ;;  %v1751_v50 = vsel %vm1722_vm4, %v1718_v17, %v9688_v7  ;;  %v1620_v63 = vpop.permute.xlu1 %1619  ;;  %v9699_v9 = vld [vmem:[#allocation165_spill] sm:$0xff]  ;;  %v9708_v17 = vld [vmem:[#allocation82_spill] sm:$0xff] }
 0x37a   : > { %v1914_v2 = vsel %vm1887_vm8, %v1881_v26, %v1614_v41  ;;  %v1915_v32 = vsel %vm1887_vm8, %v1882_v35, %v1616_v30  ;;  %v1784_v25 = vsel %vm1755_vm6, %v1751_v50, %v9689_v4  ;;  %v9696_v41 = vld [vmem:[#allocation29_spill] sm:$0xff]  ;;  %v9706_v35 = vld [vmem:[#allocation166_spill] sm:$0xff]  ;;  %v9709_v50 = vld [vmem:[#allocation96_spill] sm:$0xff] }
 0x37b   : > { %v1785_v1 = vsel %vm1755_vm6, %v1752_v29, %v9696_v41  ;;  %v9705_v33 = vld [vmem:[#allocation153_spill] sm:$0xff] }
 0x37c   : > { %v1818_v11 = vsel %vm1788_vm5, %v1785_v1, %v9697_v38 }
 0x37d   : > { %v1851_v53 = vsel %vm1821_vm7, %v1818_v11, %v9698_v55 }
 0x37e   : > { %v7368_v16 = vld [vmem:[#allocation3 + $0x19] sm:$0xff]  ;;  %v1884_v26 = vsel %vm1854_vm9, %v1851_v53, %v9699_v9 }
 0x37f   : > { %2588 = vrot.lane.b32.xlu0 %v7368_v16, %s5571_s25  ;;  %5357 = vmatmul.msk.f32.gmra.mxu0 %vm1929_vm10, %v1903_v12  ;;  %v1817_v12 = vsel %vm1788_vm5, %v1784_v25, %v9690_v34  ;;  %v9710_v34 = vld [vmem:[#allocation118_spill] sm:$0xff] }
 0x380   : > { %v1850_v54 = vsel %vm1821_vm7, %v1817_v12, %v9691_v45 }
 0x381   : > { %5368 = vmatmul.msk.f32.gmra.mxu3 %vm1929_vm10, %v1914_v2  ;;  %v1883_v10 = vsel %vm1854_vm9, %v1850_v54, %v9692_v15  ;;  %v1917_v2 = vsel %vm1887_vm8, %v1884_v26, %v1620_v63  ;;  %v1624_v54 = vpop.permute.xlu0 %1623  ;;  %v9712_v15 = vld [vmem:[#allocation145_spill] sm:$0xff] }
 0x382   : > { %v1916_v62 = vsel %vm1887_vm8, %v1883_v10, %v1618_v3  ;;  %v9711_v3 = vld [vmem:[#allocation130_spill] sm:$0xff] }
 0x387   : > { %5358 = vmatmul.msk.f32.gmra.mxu0 %vm1929_vm10, %v1904_v47  ;;  %v9701_v47 = vld [vmem:[#allocation74_spill] sm:$0xff] }
 0x388   : > { %v1720_v28 = vsel %vm1689_vm2, %v1687_v5, %v9701_v47 }
 0x389   : > { %5369 = vmatmul.msk.f32.gmra.mxu3 %vm1929_vm10, %v1915_v32  ;;  %v1753_v49 = vsel %vm1722_vm4, %v1720_v28, %v9702_v18 }
 0x38a   : > { %v1786_v61 = vsel %vm1755_vm6, %v1753_v49, %v9703_v6 }
 0x38b   : > { %v1819_v30 = vsel %vm1788_vm5, %v1786_v61, %v9704_v46 }
 0x38c   : > { %v2050_v21 = vpop.f32.mrf.mxu0  ;;  %v1852_v13 = vsel %vm1821_vm7, %v1819_v30, %v9705_v33 }
 0x38d   : > { %v2051_v42 = vadd.f32 %v7277_v57, %v2050_v21  ;;  %v1885_v21 = vsel %vm1854_vm9, %v1852_v13, %v9706_v35 }
 0x38e   : > { %v1918_v27 = vsel %vm1887_vm8, %v1885_v21, %v1622_v44 }
 0x38f   : > { %v2144_v23 = vmax.f32 %v2051_v42, 0.0 }
 0x391   : > { %2232 = vst.msk [vmem:[#allocation3 + $0x21] sm:$0xff] %vm1689_vm2, %v2144_v23  ;;  %5370 = vmatmul.msk.f32.gmra.mxu3 %vm1929_vm10, %v1916_v62  ;;  %v1721_v23 = vsel %vm1689_vm2, %v1688_v48, %v9708_v17 }
 0x392   : > { %v1754_v4 = vsel %vm1722_vm4, %v1721_v23, %v9709_v50  ;;  %vm4772_vm4 = vcmask 1045509  }
 0x393   : > { %v1787_v12 = vsel %vm1755_vm6, %v1754_v4, %v9710_v34 }
 0x394   : > { %v2053_v56 = vpop.f32.mrf.mxu0  ;;  %v1820_v45 = vsel %vm1788_vm5, %v1787_v12, %v9711_v3  ;;  %vm4774_vm5 = vcmask 1047559  }
 0x395   : > { %v2054_v22 = vadd.f32 %v7277_v57, %v2053_v56  ;;  %v1853_v10 = vsel %vm1821_vm7, %v1820_v45, %v9712_v15 }
 0x396   : > { %v1886_v56 = vsel %vm1854_vm9, %v1853_v10, %v6934_v8  ;;  %vm5026_vm9 = vcmask 1047556  }
 0x397   : > { %v2145_v52 = vmax.f32 %v2054_v22, 0.0  ;;  %v1919_v19 = vsel %vm1887_vm8, %v1886_v56, %v1624_v54 }
 0x398   : > { %v7457_v51 = vld [vmem:[#allocation3 + $0x21] sm:$0xff] }
 0x399   : > { %2233 = vst.msk [vmem:[#allocation3 + $0x31] sm:$0xff] %vm1689_vm2, %v2145_v52  ;;  %2590 = vrot.lane.b32.xlu1 %v7457_v51, %s5571_s25  ;;  %5371 = vmatmul.msk.f32.gmra.mxu3 %vm1929_vm10, %v1917_v2 }
 0x39c   : > { %v2056_v58 = vpop.f32.mrf.mxu0 }
 0x39d   : > { %v2057_v24 = vadd.f32 %v7277_v57, %v2056_v58 }
 0x39f   : > { %v2146_v0 = vmax.f32 %v2057_v24, 0.0 }
 0x3a0   : > { %v7479_v59 = vld [vmem:[#allocation3 + $0x31] sm:$0xff] }
 0x3a1   : > { %2234 = vst.msk [vmem:[#allocation3 + $0x39] sm:$0xff] %vm1689_vm2, %v2146_v0  ;;  %2592 = vrot.lane.b32.xlu2 %v7479_v59, %s5571_s25  ;;  %5372 = vmatmul.msk.f32.gmra.mxu3 %vm1929_vm10, %v1918_v27 }
 0x3a4   : > { %v2059_v42 = vpop.f32.mrf.mxu0 }
 0x3a5   : > { %v2060_v32 = vadd.f32 %v7277_v57, %v2059_v42 }
 0x3a7   : > { %v2147_v7 = vmax.f32 %v2060_v32, 0.0 }
 0x3a8   : > { %v7501_v25 = vld [vmem:[#allocation3 + $0x39] sm:$0xff] }
 0x3a9   : > { %2235 = vst.msk [vmem:[#allocation3 + $0x49] sm:$0xff] %vm1689_vm2, %v2147_v7  ;;  %2594 = vrot.lane.b32.xlu0 %v7501_v25, %s5571_s25  ;;  %5373 = vmatmul.msk.f32.gmra.mxu3 %vm1929_vm10, %v1919_v19 }
 0x3ac   : > { %v2062_v22 = vpop.f32.mrf.mxu0 }
 0x3ad   : > { %v2063_v62 = vadd.f32 %v7277_v57, %v2062_v22 }
 0x3af   : > { %v2148_v43 = vmax.f32 %v2063_v62, 0.0 }
 0x3b0   : > { %v7517_v39 = vld [vmem:[#allocation3 + $0x49] sm:$0xff] }
 0x3b1   : > { %2236 = vst.msk [vmem:[#allocation3 + $0x51] sm:$0xff] %vm1689_vm2, %v2148_v43  ;;  %2596 = vrot.lane.b32.xlu1 %v7517_v39, %s5571_s25 }
 0x3b4   : > { %v2065_v31 = vpop.f32.mrf.mxu0 }
 0x3b5   : > { %v2066_v14 = vadd.f32 %v7277_v57, %v2065_v31 }
 0x3b7   : > { %v2149_v52 = vmax.f32 %v2066_v14, 0.0 }
 0x3b8   : > { %v7523_v8 = vld [vmem:[#allocation3 + $0x51] sm:$0xff] }
 0x3b9   : > { %2237 = vst.msk [vmem:[#allocation3 + $0x61] sm:$0xff] %vm1689_vm2, %v2149_v52  ;;  %2598 = vrot.lane.b32.xlu2 %v7523_v8, %s5571_s25 }
 0x3bc   : > { %v2068_v40 = vpop.f32.mrf.mxu0  ;;  %v2098_v38 = vpop.f32.mrf.mxu3 }
 0x3bd   : > { %v2069_v29 = vadd.f32 %v7277_v57, %v2068_v40  ;;  %v2099_v11 = vadd.f32 %v7277_v57, %v2098_v38 }
 0x3bf   : > { %v2150_v41 = vmax.f32 %v2069_v29, 0.0  ;;  %v2160_v63 = vmax.f32 %v2099_v11, 0.0 }
 0x3c0   : > { %v7529_v1 = vld [vmem:[#allocation3 + $0x61] sm:$0xff] }
 0x3c1   : > { %2238 = vst.msk [vmem:[#allocation3 + $0x69] sm:$0xff] %vm1689_vm2, %v2150_v41  ;;  %2600 = vrot.lane.b32.xlu0 %v7529_v1, %s5571_s25 }
 0x3c2   : > { %2248 = vst.msk [vmem:[#allocation3 + $0xe1] sm:$0xff] %vm1689_vm2, %v2160_v63 }
 0x3c4   : > { %v2071_v55 = vpop.f32.mrf.mxu0  ;;  %v2101_v58 = vpop.f32.mrf.mxu3 }
 0x3c5   : > { %v2072_v53 = vadd.f32 %v7277_v57, %v2071_v55  ;;  %v2102_v24 = vadd.f32 %v7277_v57, %v2101_v58 }
 0x3c7   : > { %v2151_v9 = vmax.f32 %v2072_v53, 0.0  ;;  %v2161_v2 = vmax.f32 %v2102_v24, 0.0 }
 0x3c8   : > { %v7537_v26 = vld [vmem:[#allocation3 + $0x69] sm:$0xff] }
 0x3c9   : > { %2239 = vst.msk [vmem:[#allocation3 + $0x79] sm:$0xff] %vm1689_vm2, %v2151_v9  ;;  %2602 = vrot.lane.b32.xlu1 %v7537_v26, %s5571_s25  ;;  %v7603_v24 = vld [vmem:[#allocation3 + $0xe1] sm:$0xff] }
 0x3ca   : > { %2249 = vst.msk [vmem:[#allocation3 + $0xf1] sm:$0xff] %vm1689_vm2, %v2161_v2 }
 0x3cc   : > { %v2074_v20 = vpop.f32.mrf.mxu0  ;;  %v2104_v28 = vpop.f32.mrf.mxu3 }
 0x3cd   : > { %v2075_v36 = vadd.f32 %v7277_v57, %v2074_v20  ;;  %v2105_v0 = vadd.f32 %v7277_v57, %v2104_v28 }
 0x3cf   : > { %v2152_v5 = vmax.f32 %v2075_v36, 0.0  ;;  %v2162_v18 = vmax.f32 %v2105_v0, 0.0 }
 0x3d0   : > { %v7545_v47 = vld [vmem:[#allocation3 + $0x79] sm:$0xff] }
 0x3d1   : > { %2240 = vst.msk [vmem:[#allocation3 + $0x81] sm:$0xff] %vm1689_vm2, %v2152_v5  ;;  %2604 = vrot.lane.b32.xlu2 %v7545_v47, %s5571_s25  ;;  %v7614_v28 = vld [vmem:[#allocation3 + $0xf1] sm:$0xff] }
 0x3d2   : > { %2250 = vst.msk [vmem:[#allocation3 + $0xf9] sm:$0xff] %vm1689_vm2, %v2162_v18 }
 0x3d4   : > { %v2077_v49 = vpop.f32.mrf.mxu0  ;;  %v2107_v30 = vpop.f32.mrf.mxu3 }
 0x3d5   : > { %v2078_v6 = vadd.f32 %v7277_v57, %v2077_v49  ;;  %v2108_v44 = vadd.f32 %v7277_v57, %v2107_v30 }
 0x3d7   : > { %v2153_v61 = vmax.f32 %v2078_v6, 0.0  ;;  %v2163_v33 = vmax.f32 %v2108_v44, 0.0 }
 0x3d8   : > { %v7553_v46 = vld [vmem:[#allocation3 + $0x81] sm:$0xff] }
 0x3d9   : > { %2241 = vst.msk [vmem:[#allocation3 + $0x91] sm:$0xff] %vm1689_vm2, %v2153_v61  ;;  %2606 = vrot.lane.b32.xlu0 %v7553_v46, %s5571_s25  ;;  %v7626_v61 = vld [vmem:[#allocation3 + $0xf9] sm:$0xff] }
 0x3da   : > { %2251 = vst.msk [vmem:[#allocation3 + $0x109] sm:$0xff] %vm1689_vm2, %v2163_v33 }
 0x3dc   : > { %v2080_v13 = vpop.f32.mrf.mxu0  ;;  %v2110_v32 = vpop.f32.mrf.mxu3 }
 0x3dd   : > { %v2081_v35 = vadd.f32 %v7277_v57, %v2080_v13  ;;  %v2111_v27 = vadd.f32 %v7277_v57, %v2110_v32 }
 0x3df   : > { %v2154_v21 = vmax.f32 %v2081_v35, 0.0  ;;  %v2164_v37 = vmax.f32 %v2111_v27, 0.0 }
 0x3e0   : > { %v7561_v42 = vld [vmem:[#allocation3 + $0x91] sm:$0xff] }
 0x3e1   : > { %2242 = vst.msk [vmem:[#allocation3 + $0x99] sm:$0xff] %vm1689_vm2, %v2154_v21  ;;  %2608 = vrot.lane.b32.xlu1 %v7561_v42, %s5571_s25  ;;  %v7620_v18 = vld [vmem:[#allocation3 + $0x109] sm:$0xff] }
 0x3e2   : > { %2252 = vst.msk [vmem:[#allocation3 + $0x111] sm:$0xff] %vm1689_vm2, %v2164_v37 }
 0x3e4   : > { %v2083_v60 = vpop.f32.mrf.mxu0  ;;  %v2113_v7 = vpop.f32.mrf.mxu3 }
 0x3e5   : > { %v2084_v48 = vadd.f32 %v7277_v57, %v2083_v60  ;;  %v2114_v50 = vadd.f32 %v7277_v57, %v2113_v7 }
 0x3e7   : > { %v2155_v17 = vmax.f32 %v2084_v48, 0.0  ;;  %v2165_v4 = vmax.f32 %v2114_v50, 0.0 }
 0x3e8   : > { %v7569_v23 = vld [vmem:[#allocation3 + $0x99] sm:$0xff] }
 0x3e9   : > { %2243 = vst.msk [vmem:[#allocation3 + $0xa9] sm:$0xff] %vm1689_vm2, %v2155_v17  ;;  %2610 = vrot.lane.b32.xlu2 %v7569_v23, %s5571_s25  ;;  %v7628_v30 = vld [vmem:[#allocation3 + $0x111] sm:$0xff] }
 0x3ea   : > { %2253 = vst.msk [vmem:[#allocation3 + $0x121] sm:$0xff] %vm1689_vm2, %v2165_v4 }
 0x3ec   : > { %v2086_v34 = vpop.f32.mrf.mxu0  ;;  %v2116_v54 = vpop.f32.mrf.mxu3 }
 0x3ed   : > { %v2087_v12 = vadd.f32 %v7277_v57, %v2086_v34  ;;  %v2117_v15 = vadd.f32 %v7277_v57, %v2116_v54 }
 0x3ef   : > { %v2156_v3 = vmax.f32 %v2087_v12, 0.0  ;;  %v2166_v10 = vmax.f32 %v2117_v15, 0.0  ;;  %v7667_v15 = vpop.permute.xlu2 %2586 }
 0x3f0   : > { %v7577_v45 = vld [vmem:[#allocation3 + $0xa9] sm:$0xff]  ;;  %9713 = vst [vmem:[#allocation10_spill] sm:$0xff] %v7667_v15 }
 0x3f1   : > { %2244 = vst.msk [vmem:[#allocation3 + $0xb1] sm:$0xff] %vm1689_vm2, %v2156_v3  ;;  %2612 = vrot.lane.b32.xlu0 %v7577_v45, %s5571_s25  ;;  %v7640_v21 = vld [vmem:[#allocation3 + $0x121] sm:$0xff] }
 0x3f2   : > { %2254 = vst.msk [vmem:[#allocation3 + $0x129] sm:$0xff] %vm1689_vm2, %v2166_v10  ;;  %v2327_v3 = vld [vmem:[#allocation3 + $0x2] sm:$0xff] }
 0x3f4   : > { %v2089_v56 = vpop.f32.mrf.mxu0  ;;  %v2119_v43 = vpop.f32.mrf.mxu3 }
 0x3f5   : > { %v2090_v22 = vadd.f32 %v7277_v57, %v2089_v56  ;;  %v2120_v31 = vadd.f32 %v7277_v57, %v2119_v43  ;;  %v2328_v43 = vld [vmem:[#allocation3 + $0xa] sm:$0xff] }
 0x3f7   : > { %v2157_v62 = vmax.f32 %v2090_v22, 0.0  ;;  %v2167_v14 = vmax.f32 %v2120_v31, 0.0  ;;  %v7678_v31 = vld [vmem:[#allocation3 + $0x22] sm:$0xff] }
 0x3f8   : > { %v7585_v19 = vld [vmem:[#allocation3 + $0xb1] sm:$0xff] }
 0x3f9   : > { %2245 = vst.msk [vmem:[#allocation3 + $0xc1] sm:$0xff] %vm1689_vm2, %v2157_v62  ;;  %2614 = vrot.lane.b32.xlu1 %v7585_v19, %s5571_s25  ;;  %v7634_v33 = vld [vmem:[#allocation3 + $0x129] sm:$0xff]  ;;  %v7673_v62 = vld [vmem:[#allocation3 + $0x1a] sm:$0xff] }
 0x3fa   : > { %2255 = vst.msk [vmem:[#allocation3 + $0x139] sm:$0xff] %vm1689_vm2, %v2167_v14 }
 0x3fb   : > { %v7683_v14 = vpop.permute.xlu2 %2592 }
 0x3fc   : > { %v2092_v52 = vpop.f32.mrf.mxu0  ;;  %v2122_v38 = vpop.f32.mrf.mxu3  ;;  %9714 = vst [vmem:[#allocation46_spill] sm:$0xff] %v7683_v14  ;;  %v2270_v14 = vld [vmem:[#allocation3 + $0x50] sm:$0xff] }
 0x3fd   : > { %v2093_v40 = vadd.f32 %v7277_v57, %v2092_v52  ;;  %v2123_v11 = vadd.f32 %v7277_v57, %v2122_v38  ;;  %v7685_v52 = vld [vmem:[#allocation3 + $0x3a] sm:$0xff]  ;;  %v7699_v38 = vld [vmem:[#allocation3 + $0x62] sm:$0xff] }
 0x3ff   : > { %v2158_v29 = vmax.f32 %v2093_v40, 0.0  ;;  %v2168_v63 = vmax.f32 %v2123_v11, 0.0  ;;  %v7691_v40 = vld [vmem:[#allocation3 + $0x32] sm:$0xff]  ;;  %v2336_v11 = vld [vmem:[#allocation3 + $0x6a] sm:$0xff] }
 0x400   : > { %v7593_v41 = vld [vmem:[#allocation3 + $0xc1] sm:$0xff] }
 0x401   : > { %2246 = vst.msk [vmem:[#allocation3 + $0xc9] sm:$0xff] %vm1689_vm2, %v2158_v29  ;;  %2616 = vrot.lane.b32.xlu2 %v7593_v41, %s5571_s25  ;;  %v7642_v32 = vld [vmem:[#allocation3 + $0x139] sm:$0xff] }
 0x402   : > { %2256 = vst.msk [vmem:[#allocation3 + $0x141] sm:$0xff] %vm1689_vm2, %v2168_v63  ;;  %v7703_v63 = vld [vmem:[#allocation3 + $0x52] sm:$0xff] }
 0x404   : > { %v2095_v55 = vpop.f32.mrf.mxu0  ;;  %v2125_v2 = vpop.f32.mrf.mxu3 }
 0x405   : > { %v2096_v53 = vadd.f32 %v7277_v57, %v2095_v55  ;;  %v2126_v20 = vadd.f32 %v7277_v57, %v2125_v2  ;;  %v2339_v2 = vld [vmem:[#allocation3 + $0x92] sm:$0xff] }
 0x407   : > { %v2159_v9 = vmax.f32 %v2096_v53, 0.0  ;;  %v2169_v36 = vmax.f32 %v2126_v20, 0.0  ;;  %v2338_v53 = vld [vmem:[#allocation3 + $0x82] sm:$0xff]  ;;  %v2337_v20 = vld [vmem:[#allocation3 + $0x7a] sm:$0xff] }
 0x408   : > { %v7601_v58 = vld [vmem:[#allocation3 + $0xc9] sm:$0xff] }
 0x409   : > { %2247 = vst.msk [vmem:[#allocation3 + $0xd9] sm:$0xff] %vm1689_vm2, %v2159_v9  ;;  %2618 = vrot.lane.b32.xlu0 %v7601_v58, %s5571_s25  ;;  %2622 = vrot.lane.b32.xlu2 %v7603_v24, %s5571_s25  ;;  %v7654_v17 = vld [vmem:[#allocation3 + $0x141] sm:$0xff]  ;;  %v7711_v9 = vpop.permute.xlu1 %2584 }
 0x40a   : > { %2257 = vst.msk [vmem:[#allocation3 + $0x151] sm:$0xff] %vm1689_vm2, %v2169_v36  ;;  %v7715_v36 = vpop.permute.xlu0 %2588 }
 0x40b   : > { %9717 = vst [vmem:[#allocation12_spill] sm:$0xff] %v7711_v9 }
 0x40c   : > { %v2128_v0 = vpop.f32.mrf.mxu3  ;;  %9718 = vst [vmem:[#allocation38_spill] sm:$0xff] %v7715_v36 }
 0x40d   : > { %v2129_v49 = vadd.f32 %v7277_v57, %v2128_v0 }
 0x40f   : > { %v2170_v6 = vmax.f32 %v2129_v49, 0.0  ;;  %v2341_v49 = vld [vmem:[#allocation3 + $0xaa] sm:$0xff] }
 0x410   : > { %v7612_v5 = vld [vmem:[#allocation3 + $0xd9] sm:$0xff] }
 0x411   : > { %2620 = vrot.lane.b32.xlu1 %v7612_v5, %s5571_s25  ;;  %2624 = vrot.lane.b32.xlu0 %v7614_v28, %s5571_s25  ;;  %2258 = vst.msk [vmem:[#allocation3 + $0x159] sm:$0xff] %vm1689_vm2, %v2170_v6  ;;  %v7648_v37 = vld [vmem:[#allocation3 + $0x151] sm:$0xff] }
 0x412   : > { %2628 = vrot.lane.b32.xlu2 %v7620_v18, %s5571_s25  ;;  %v2342_v6 = vld [vmem:[#allocation3 + $0xb2] sm:$0xff] }
 0x413   : > { %v7697_v29 = vpop.permute.xlu2 %2598 }
 0x414   : > { %v2131_v44 = vpop.f32.mrf.mxu3  ;;  %9715 = vst [vmem:[#allocation8_spill] sm:$0xff] %v7697_v29  ;;  %v7798_v29 = vld [vmem:[#allocation3 + $0x18] sm:$0xff] }
 0x415   : > { %v2132_v13 = vadd.f32 %v7277_v57, %v2131_v44  ;;  %v2340_v44 = vld [vmem:[#allocation3 + $0x9a] sm:$0xff]  ;;  %9738 = vst [vmem:[#allocation44_spill] sm:$0xff] %v7798_v29 }
 0x417   : > { %v2171_v35 = vmax.f32 %v2132_v13, 0.0  ;;  %v7722_v13 = vpop.permute.xlu1 %2590 }
 0x418   : > { %v7656_v7 = vld [vmem:[#allocation3 + $0x159] sm:$0xff]  ;;  %9720 = vst [vmem:[#allocation50_spill] sm:$0xff] %v7722_v13 }
 0x419   : > { %2626 = vrot.lane.b32.xlu1 %v7626_v61, %s5571_s25  ;;  %2630 = vrot.lane.b32.xlu0 %v7628_v30, %s5571_s25  ;;  %2259 = vst.msk [vmem:[#allocation3 + $0x169] sm:$0xff] %vm1689_vm2, %v2171_v35 }
 0x41a   : > { %2634 = vrot.lane.b32.xlu2 %v7634_v33, %s5571_s25 }
 0x41b   : > { %v7724_v35 = vpop.permute.xlu0 %2594 }
 0x41c   : > { %v2134_v27 = vpop.f32.mrf.mxu3  ;;  %9721 = vst [vmem:[#allocation5_spill] sm:$0xff] %v7724_v35  ;;  %v7817_v35 = vld [vmem:[#allocation3 + $0x30] sm:$0xff] }
 0x41d   : > { %v2135_v60 = vadd.f32 %v7277_v57, %v2134_v27 }
 0x41f   : > { %v2172_v48 = vmax.f32 %v2135_v60, 0.0  ;;  %v2344_v60 = vld [vmem:[#allocation3 + $0xca] sm:$0xff] }
 0x420   : > { %v7665_v54 = vld [vmem:[#allocation3 + $0x169] sm:$0xff] }
 0x421   : > { %2632 = vrot.lane.b32.xlu1 %v7640_v21, %s5571_s25  ;;  %2636 = vrot.lane.b32.xlu0 %v7642_v32, %s5571_s25  ;;  %2260 = vst.msk [vmem:[#allocation3 + $0x171] sm:$0xff] %vm1689_vm2, %v2172_v48  ;;  %v7729_v48 = vld [vmem:[#allocation3 + $0xda] sm:$0xff] }
 0x422   : > { %2640 = vrot.lane.b32.xlu2 %v7648_v37, %s5571_s25 }
 0x424   : > { %v2137_v50 = vpop.f32.mrf.mxu3 }
 0x425   : > { %v2138_v4 = vadd.f32 %v7277_v57, %v2137_v50  ;;  %v2343_v50 = vld [vmem:[#allocation3 + $0xc2] sm:$0xff] }
 0x427   : > { %v2173_v34 = vmax.f32 %v2138_v4, 0.0  ;;  %v7734_v4 = vpop.permute.xlu1 %2596 }
 0x428   : > { %v2326_v12 = vld [vmem:[#allocation3 + $0x171] sm:$0xff]  ;;  %9722 = vst [vmem:[#allocation53_spill] sm:$0xff] %v7734_v4 }
 0x429   : > { %2638 = vrot.lane.b32.xlu1 %v7654_v17, %s5571_s25  ;;  %2642 = vrot.lane.b32.xlu0 %v7656_v7, %s5571_s25  ;;  %2261 = vst.msk [vmem:[#allocation3 + $0x181] sm:$0xff] %vm1689_vm2, %v2173_v34  ;;  %v7813_v4 = vld [vmem:[#allocation3 + $0x38] sm:$0xff] }
 0x42a   : > { %2646 = vrot.lane.b32.xlu2 %v2326_v12, %s5571_s25 }
 0x42b   : > { %v7708_v55 = vpop.permute.xlu2 %2604 }
 0x42c   : > { %v2140_v10 = vpop.f32.mrf.mxu3  ;;  %9716 = vst [vmem:[#allocation49_spill] sm:$0xff] %v7708_v55 }
 0x42d   : > { %v2141_v56 = vadd.f32 %v7277_v57, %v2140_v10  ;;  %v7689_v57 = vld [vmem:[#allocation3 + $0x4a] sm:$0xff]  ;;  %v7744_v10 = vld [vmem:[#allocation3 + $0xfa] sm:$0xff] }
 0x42f   : > { %v2174_v22 = vmax.f32 %v2141_v56, 0.0  ;;  %v7746_v56 = vld [vmem:[#allocation3 + $0xe2] sm:$0xff] }
 0x431   : > { %2644 = vrot.lane.b32.xlu1 %v7665_v54, %s5571_s25  ;;  %2712 = vrot.lane.b32.xlu0 %v2327_v3, %s5573_s27  ;;  %2262 = vst.msk [vmem:[#allocation3 + $0x189] sm:$0xff] %vm1689_vm2, %v2174_v22  ;;  %v7740_v3 = vld [vmem:[#allocation3 + $0xf2] sm:$0xff] }
 0x432   : > { %2716 = vrot.lane.b32.xlu2 %v7673_v62, %s5573_s27 }
 0x433   : > { %v7736_v34 = vpop.permute.xlu0 %2600 }
 0x434   : > { %9723 = vst [vmem:[#allocation13_spill] sm:$0xff] %v7736_v34  ;;  %v2355_v34 = vld [vmem:[#allocation3 + $0x152] sm:$0xff] }
 0x439   : > { %2714 = vrot.lane.b32.xlu1 %v2328_v43, %s5573_s27  ;;  %2718 = vrot.lane.b32.xlu0 %v7678_v31, %s5573_s27 }
 0x43a   : > { %2722 = vrot.lane.b32.xlu2 %v7685_v52, %s5573_s27 }
 0x43b   : > { %v7752_v22 = vpop.permute.xlu1 %2602 }
 0x43c   : > { %9725 = vst [vmem:[#allocation14_spill] sm:$0xff] %v7752_v22  ;;  %v2357_v22 = vld [vmem:[#allocation3 + $0x16a] sm:$0xff] }
 0x441   : > { %2724 = vrot.lane.b32.xlu0 %v7689_v57, %s5573_s27  ;;  %2720 = vrot.lane.b32.xlu1 %v7691_v40, %s5573_s27 }
 0x442   : > { %2728 = vrot.lane.b32.xlu2 %v7699_v38, %s5573_s27 }
 0x443   : > { %v7717_v0 = vpop.permute.xlu2 %2610 }
 0x444   : > { %9719 = vst [vmem:[#allocation4_spill] sm:$0xff] %v7717_v0  ;;  %v7780_v0 = vld [vmem:[#allocation3 + $0x12a] sm:$0xff] }
 0x445   : > { %9732 = vst [vmem:[#allocation58_spill] sm:$0xff] %v7780_v0 }
 0x449   : > { %2730 = vrot.lane.b32.xlu0 %v2336_v11, %s5573_s27  ;;  %2726 = vrot.lane.b32.xlu1 %v7703_v63, %s5573_s27 }
 0x44a   : > { %2734 = vrot.lane.b32.xlu2 %v2338_v53, %s5573_s27  ;;  %v7758_v53 = vld [vmem:[#allocation3 + $0x112] sm:$0xff] }
 0x44b   : > { %v7754_v43 = vpop.permute.xlu0 %2606 }
 0x44c   : > { %9726 = vst [vmem:[#allocation15_spill] sm:$0xff] %v7754_v43 }
 0x451   : > { %2736 = vrot.lane.b32.xlu0 %v2339_v2, %s5573_s27  ;;  %2732 = vrot.lane.b32.xlu1 %v2337_v20, %s5573_s27  ;;  %v7762_v2 = vld [vmem:[#allocation3 + $0x122] sm:$0xff]  ;;  %v7764_v20 = vld [vmem:[#allocation3 + $0x10a] sm:$0xff] }
 0x452   : > { %2740 = vrot.lane.b32.xlu2 %v2341_v49, %s5573_s27 }
 0x453   : > { %v7770_v49 = vpop.permute.xlu1 %2608 }
 0x454   : > { %9728 = vst [vmem:[#allocation54_spill] sm:$0xff] %v7770_v49 }
 0x459   : > { %2742 = vrot.lane.b32.xlu0 %v2342_v6, %s5573_s27  ;;  %2738 = vrot.lane.b32.xlu1 %v2340_v44, %s5573_s27  ;;  %v7774_v44 = vld [vmem:[#allocation3 + $0x13a] sm:$0xff] }
 0x45a   : > { %2746 = vrot.lane.b32.xlu2 %v2344_v60, %s5573_s27  ;;  %9730 = vst [vmem:[#allocation7_spill] sm:$0xff] %v7774_v44 }
 0x45b   : > { %v7726_v27 = vpop.permute.xlu2 %2616 }
 0x461   : > { %2748 = vrot.lane.b32.xlu0 %v7729_v48, %s5573_s27  ;;  %2744 = vrot.lane.b32.xlu1 %v2343_v50, %s5573_s27  ;;  %v2354_v50 = vld [vmem:[#allocation3 + $0x142] sm:$0xff] }
 0x462   : > { %2752 = vrot.lane.b32.xlu2 %v7740_v3, %s5573_s27 }
 0x463   : > { %v7738_v12 = vpop.permute.xlu2 %2622  ;;  %v7772_v6 = vpop.permute.xlu0 %2612 }
 0x464   : > { %9724 = vst [vmem:[#allocation41_spill] sm:$0xff] %v7738_v12  ;;  %v7882_v12 = vld [vmem:[#allocation3 + $0xf8] sm:$0xff] }
 0x465   : > { %9729 = vst [vmem:[#allocation28_spill] sm:$0xff] %v7772_v6  ;;  %v2356_v6 = vld [vmem:[#allocation3 + $0x15a] sm:$0xff] }
 0x469   : > { %2754 = vrot.lane.b32.xlu0 %v7744_v10, %s5573_s27  ;;  %2750 = vrot.lane.b32.xlu1 %v7746_v56, %s5573_s27 }
 0x46a   : > { %2758 = vrot.lane.b32.xlu2 %v7758_v53, %s5573_s27 }
 0x46b   : > { %v7785_v43 = vpop.permute.xlu1 %2614 }
 0x46c   : > { %v7756_v11 = vpop.permute.xlu2 %2628  ;;  %9733 = vst [vmem:[#allocation134_spill] sm:$0xff] %v7785_v43  ;;  %v7802_v43 = vld [vmem:[#allocation3 + $0x20] sm:$0xff] }
 0x46d   : > { %9727 = vst [vmem:[#allocation71_spill] sm:$0xff] %v7756_v11  ;;  %v7819_v11 = vld [vmem:[#allocation3 + $0x48] sm:$0xff] }
 0x46e   : > { %9739 = vst [vmem:[#allocation86_spill] sm:$0xff] %v7802_v43 }
 0x471   : > { %2760 = vrot.lane.b32.xlu0 %v7762_v2, %s5573_s27  ;;  %2756 = vrot.lane.b32.xlu1 %v7764_v20, %s5573_s27 }
 0x472   : > { %2764 = vrot.lane.b32.xlu2 %v7774_v44, %s5573_s27  ;;  %v2291_v44 = vld [vmem:[#allocation3 + $0x150] sm:$0xff] }
 0x474   : > { %v7776_v60 = vpop.permute.xlu2 %2634 }
 0x475   : > { %9731 = vst [vmem:[#allocation57_spill] sm:$0xff] %v7776_v60 }
 0x479   : > { %2766 = vrot.lane.b32.xlu0 %v2354_v50, %s5573_s27  ;;  %2762 = vrot.lane.b32.xlu1 %v7780_v0, %s5573_s27  ;;  %v2390_v0 = vld [vmem:[#allocation3 + $0x188] sm:$0xff] }
 0x47a   : > { %2770 = vrot.lane.b32.xlu2 %v2356_v6, %s5573_s27 }
 0x47b   : > { %v7787_v49 = vpop.permute.xlu0 %2618 }
 0x47c   : > { %9734 = vst [vmem:[#allocation152_spill] sm:$0xff] %v7787_v49  ;;  %v7790_v55 = vpop.permute.xlu2 %2640  ;;  %v2292_v49 = vld [vmem:[#allocation3 + $0x158] sm:$0xff] }
 0x47d   : > { %9735 = vst [vmem:[#allocation33_spill] sm:$0xff] %v7790_v55  ;;  %v2358_v55 = vld [vmem:[#allocation3 + $0x172] sm:$0xff] }
 0x481   : > { %2772 = vrot.lane.b32.xlu0 %v2357_v22, %s5573_s27  ;;  %2768 = vrot.lane.b32.xlu1 %v2355_v34, %s5573_s27 }
 0x482   : > { %2840 = vrot.lane.b32.xlu2 %v7798_v29, %s5575_s29  ;;  %v2274_v29 = vld [vmem:[#allocation3 + $0x80] sm:$0xff] }
 0x483   : > { %v7794_v60 = vpop.permute.xlu1 %2620  ;;  %v7796_v50 = vpop.permute.xlu0 %2624 }
 0x484   : > { %9736 = vst [vmem:[#allocation16_spill] sm:$0xff] %v7794_v60  ;;  %v7804_v6 = vpop.permute.xlu2 %2646  ;;  %v7898_v60 = vld [vmem:[#allocation3 + $0x108] sm:$0xff] }
 0x485   : > { %9737 = vst [vmem:[#allocation72_spill] sm:$0xff] %v7796_v50  ;;  %v2272_v50 = vld [vmem:[#allocation3 + $0x68] sm:$0xff] }
 0x486   : > { %9740 = vst [vmem:[#allocation87_spill] sm:$0xff] %v7804_v6 }
 0x489   : > { %2842 = vrot.lane.b32.xlu0 %v7802_v43, %s5575_s29  ;;  %2774 = vrot.lane.b32.xlu1 %v2358_v55, %s5573_s27 }
 0x48a   : > { %2846 = vrot.lane.b32.xlu2 %v7813_v4, %s5575_s29 }
 0x48b   : > { %v7809_v34 = vpop.permute.xlu1 %2626  ;;  %v7811_v22 = vpop.permute.xlu0 %2630 }
 0x48c   : > { %9741 = vst [vmem:[#allocation31_spill] sm:$0xff] %v7809_v34  ;;  %v7821_v6 = vpop.permute.xlu2 %2716  ;;  %v2271_v34 = vld [vmem:[#allocation3 + $0x60] sm:$0xff] }
 0x48d   : > { %9742 = vst [vmem:[#allocation106_spill] sm:$0xff] %v7811_v22 }
 0x48e   : > { %9743 = vst [vmem:[#allocation121_spill] sm:$0xff] %v7821_v6 }
 0x491   : > { %2848 = vrot.lane.b32.xlu0 %v7819_v11, %s5575_s29  ;;  %2844 = vrot.lane.b32.xlu1 %v7817_v35, %s5575_s29 }
 0x492   : > { %2852 = vrot.lane.b32.xlu2 %v2271_v34, %s5575_s29 }
 0x493   : > { %v7827_v55 = vpop.permute.xlu1 %2632  ;;  %v7829_v22 = vpop.permute.xlu0 %2636 }
 0x494   : > { %9744 = vst [vmem:[#allocation47_spill] sm:$0xff] %v7827_v55  ;;  %v7832_v43 = vpop.permute.xlu2 %2722  ;;  %v2273_v55 = vld [vmem:[#allocation3 + $0x78] sm:$0xff] }
 0x495   : > { %9745 = vst [vmem:[#allocation135_spill] sm:$0xff] %v7829_v22  ;;  %v2275_v22 = vld [vmem:[#allocation3 + $0x90] sm:$0xff] }
 0x496   : > { %9746 = vst [vmem:[#allocation136_spill] sm:$0xff] %v7832_v43 }
 0x499   : > { %2854 = vrot.lane.b32.xlu0 %v2272_v50, %s5575_s29  ;;  %2850 = vrot.lane.b32.xlu1 %v2270_v14, %s5575_s29  ;;  %v2277_v14 = vld [vmem:[#allocation3 + $0xa8] sm:$0xff] }
 0x49a   : > { %2858 = vrot.lane.b32.xlu2 %v2274_v29, %s5575_s29 }
 0x49b   : > { %v7836_v13 = vpop.permute.xlu1 %2638  ;;  %v7838_v6 = vpop.permute.xlu0 %2642 }
 0x49c   : > { %9747 = vst [vmem:[#allocation156_spill] sm:$0xff] %v7836_v13  ;;  %v7841_v36 = vpop.permute.xlu2 %2728  ;;  %v2276_v13 = vld [vmem:[#allocation3 + $0x98] sm:$0xff] }
 0x49d   : > { %9748 = vst [vmem:[#allocation17_spill] sm:$0xff] %v7838_v6  ;;  %v2278_v6 = vld [vmem:[#allocation3 + $0xb0] sm:$0xff] }
 0x49e   : > { %9749 = vst [vmem:[#allocation18_spill] sm:$0xff] %v7841_v36 }
 0x4a1   : > { %2860 = vrot.lane.b32.xlu0 %v2275_v22, %s5575_s29  ;;  %2856 = vrot.lane.b32.xlu1 %v2273_v55, %s5575_s29  ;;  %v7858_v55 = vld [vmem:[#allocation3 + $0xc8] sm:$0xff] }
 0x4a2   : > { %2864 = vrot.lane.b32.xlu2 %v2277_v14, %s5575_s29  ;;  %9755 = vst [vmem:[#allocation108_spill] sm:$0xff] %v7858_v55  ;;  %v7864_v14 = vld [vmem:[#allocation3 + $0xd8] sm:$0xff] }
 0x4a3   : > { %v7845_v34 = vpop.permute.xlu1 %2644  ;;  %v7847_v50 = vpop.permute.xlu0 %2712  ;;  %9756 = vst [vmem:[#allocation123_spill] sm:$0xff] %v7864_v14 }
 0x4a4   : > { %9750 = vst [vmem:[#allocation75_spill] sm:$0xff] %v7845_v34  ;;  %v7850_v43 = vpop.permute.xlu2 %2734  ;;  %v7862_v34 = vld [vmem:[#allocation3 + $0xc0] sm:$0xff] }
 0x4a5   : > { %9751 = vst [vmem:[#allocation59_spill] sm:$0xff] %v7847_v50  ;;  %v2293_v50 = vld [vmem:[#allocation3 + $0x168] sm:$0xff] }
 0x4a6   : > { %9752 = vst [vmem:[#allocation95_spill] sm:$0xff] %v7850_v43  ;;  %v7876_v43 = vld [vmem:[#allocation3 + $0xf0] sm:$0xff] }
 0x4a9   : > { %2866 = vrot.lane.b32.xlu0 %v2278_v6, %s5575_s29  ;;  %2862 = vrot.lane.b32.xlu1 %v2276_v13, %s5575_s29 }
 0x4aa   : > { %2870 = vrot.lane.b32.xlu2 %v7858_v55, %s5575_s29  ;;  %v7918_v55 = vld [vmem:[#allocation3 + $0x140] sm:$0xff] }
 0x4ab   : > { %v7854_v29 = vpop.permute.xlu1 %2714  ;;  %v7856_v22 = vpop.permute.xlu0 %2718  ;;  %9768 = vst [vmem:[#allocation111_spill] sm:$0xff] %v7918_v55 }
 0x4ac   : > { %9753 = vst [vmem:[#allocation83_spill] sm:$0xff] %v7854_v29  ;;  %v7866_v36 = vpop.permute.xlu2 %2740  ;;  %v7900_v29 = vld [vmem:[#allocation3 + $0x120] sm:$0xff] }
 0x4ad   : > { %9754 = vst [vmem:[#allocation107_spill] sm:$0xff] %v7856_v22  ;;  %v7880_v22 = vld [vmem:[#allocation3 + $0xe0] sm:$0xff] }
 0x4ae   : > { %9757 = vst [vmem:[#allocation56_spill] sm:$0xff] %v7866_v36 }
 0x4af   : > { %9760 = vst [vmem:[#allocation157_spill] sm:$0xff] %v7880_v22 }
 0x4b1   : > { %2872 = vrot.lane.b32.xlu0 %v7864_v14, %s5575_s29  ;;  %2868 = vrot.lane.b32.xlu1 %v7862_v34, %s5575_s29  ;;  %v7894_v14 = vld [vmem:[#allocation3 + $0x110] sm:$0xff] }
 0x4b2   : > { %2876 = vrot.lane.b32.xlu2 %v7876_v43, %s5575_s29 }
 0x4b3   : > { %v7872_v13 = vpop.permute.xlu0 %2724  ;;  %v7874_v6 = vpop.permute.xlu1 %2720 }
 0x4b4   : > { %9758 = vst [vmem:[#allocation144_spill] sm:$0xff] %v7872_v13  ;;  %v7884_v36 = vpop.permute.xlu2 %2746 }
 0x4b5   : > { %9759 = vst [vmem:[#allocation131_spill] sm:$0xff] %v7874_v6 }
 0x4b6   : > { %9761 = vst [vmem:[#allocation158_spill] sm:$0xff] %v7884_v36  ;;  %v7916_v36 = vld [vmem:[#allocation3 + $0x128] sm:$0xff] }
 0x4b9   : > { %2878 = vrot.lane.b32.xlu0 %v7882_v12, %s5575_s29  ;;  %2874 = vrot.lane.b32.xlu1 %v7880_v22, %s5575_s29  ;;  %v7912_v22 = vld [vmem:[#allocation3 + $0x138] sm:$0xff] }
 0x4ba   : > { %2882 = vrot.lane.b32.xlu2 %v7894_v14, %s5575_s29  ;;  %9767 = vst [vmem:[#allocation88_spill] sm:$0xff] %v7912_v22 }
 0x4bb   : > { %v7890_v13 = vpop.permute.xlu0 %2730  ;;  %v7892_v6 = vpop.permute.xlu1 %2726 }
 0x4bc   : > { %9762 = vst [vmem:[#allocation34_spill] sm:$0xff] %v7890_v13  ;;  %v7902_v15 = vpop.permute.xlu2 %2752 }
 0x4bd   : > { %9763 = vst [vmem:[#allocation9_spill] sm:$0xff] %v7892_v6 }
 0x4be   : > { %9764 = vst [vmem:[#allocation62_spill] sm:$0xff] %v7902_v15 }
 0x4c1   : > { %2884 = vrot.lane.b32.xlu0 %v7900_v29, %s5575_s29  ;;  %2880 = vrot.lane.b32.xlu1 %v7898_v60, %s5575_s29 }
 0x4c2   : > { %2888 = vrot.lane.b32.xlu2 %v7912_v22, %s5575_s29  ;;  %v2389_v22 = vld [vmem:[#allocation3 + $0x180] sm:$0xff] }
 0x4c3   : > { %v7908_v13 = vpop.permute.xlu0 %2736  ;;  %v7910_v6 = vpop.permute.xlu1 %2732 }
 0x4c4   : > { %9765 = vst [vmem:[#allocation63_spill] sm:$0xff] %v7908_v13  ;;  %v7920_v15 = vpop.permute.xlu2 %2758 }
 0x4c5   : > { %9766 = vst [vmem:[#allocation97_spill] sm:$0xff] %v7910_v6 }
 0x4c6   : > { %9769 = vst [vmem:[#allocation104_spill] sm:$0xff] %v7920_v15 }
 0x4c9   : > { %2890 = vrot.lane.b32.xlu0 %v7918_v55, %s5575_s29  ;;  %2886 = vrot.lane.b32.xlu1 %v7916_v36, %s5575_s29 }
 0x4ca   : > { %2894 = vrot.lane.b32.xlu2 %v2292_v49, %s5575_s29 }
 0x4cb   : > { %v7926_v13 = vpop.permute.xlu0 %2742  ;;  %v7928_v6 = vpop.permute.xlu1 %2738 }
 0x4cc   : > { %9770 = vst [vmem:[#allocation60_spill] sm:$0xff] %v7926_v13  ;;  %v7931_v9 = vpop.permute.xlu2 %2764  ;;  %v2294_v13 = vld [vmem:[#allocation3 + $0x170] sm:$0xff] }
 0x4cd   : > { %9771 = vst [vmem:[#allocation61_spill] sm:$0xff] %v7928_v6 }
 0x4ce   : > { %9772 = vst [vmem:[#allocation146_spill] sm:$0xff] %v7931_v9 }
 0x4d1   : > { %2896 = vrot.lane.b32.xlu0 %v2293_v50, %s5575_s29  ;;  %2892 = vrot.lane.b32.xlu1 %v2291_v44, %s5575_s29 }
 0x4d2   : > { %2900 = vrot.lane.b32.xlu2 %v2389_v22, %s5575_s29 }
 0x4d3   : > { %v7935_v15 = vpop.permute.xlu0 %2748  ;;  %v7937_v55 = vpop.permute.xlu1 %2744 }
 0x4d4   : > { %v7940_v6 = vpop.permute.xlu2 %2770 }
 0x4d5   : > { %9773 = vst [vmem:[#allocation137_spill] sm:$0xff] %v7940_v6 }
 0x4d9   : > { %2902 = vrot.lane.b32.xlu0 %v2390_v0, %s5575_s29  ;;  %2898 = vrot.lane.b32.xlu1 %v2294_v13, %s5575_s29 }
 0x4da   : > { %2970 = vrot.lane.b32.xlu2 %v7457_v51, %s5577_s6 }
 0x4db   : > { %v7944_v49 = vpop.permute.xlu0 %2754  ;;  %v7946_v50 = vpop.permute.xlu1 %2750 }
 0x4dc   : > { %v7950_v44 = vpop.permute.xlu2 %2840 }
 0x4e1   : > { %2972 = vrot.lane.b32.xlu0 %v7479_v59, %s5577_s6  ;;  %2968 = vrot.lane.b32.xlu1 %v7368_v16, %s5577_s6 }
 0x4e2   : > { %2976 = vrot.lane.b32.xlu2 %v7517_v39, %s5577_s6 }
 0x4e3   : > { %v7956_v22 = vpop.permute.xlu0 %2760  ;;  %v7958_v0 = vpop.permute.xlu1 %2756 }
 0x4e4   : > { %v7962_v13 = vpop.permute.xlu2 %2846 }
 0x4e9   : > { %2978 = vrot.lane.b32.xlu0 %v7523_v8, %s5577_s6  ;;  %2974 = vrot.lane.b32.xlu1 %v7501_v25, %s5577_s6 }
 0x4ea   : > { %2982 = vrot.lane.b32.xlu2 %v7537_v26, %s5577_s6 }
 0x4eb   : > { %v7968_v51 = vpop.permute.xlu0 %2766  ;;  %v7970_v59 = vpop.permute.xlu1 %2762 }
 0x4ec   : > { %9774 = vst [vmem:[#allocation154_spill] sm:$0xff] %v7968_v51  ;;  %v7974_v16 = vpop.permute.xlu2 %2852 }
 0x4f1   : > { %2984 = vrot.lane.b32.xlu0 %v7545_v47, %s5577_s6  ;;  %2980 = vrot.lane.b32.xlu1 %v7529_v1, %s5577_s6 }
 0x4f2   : > { %2988 = vrot.lane.b32.xlu2 %v7561_v42, %s5577_s6 }
 0x4f3   : > { %v7980_v39 = vpop.permute.xlu0 %2772  ;;  %v7982_v8 = vpop.permute.xlu1 %2768 }
 0x4f4   : > { %9775 = vst [vmem:[#allocation36_spill] sm:$0xff] %v7980_v39  ;;  %v7986_v25 = vpop.permute.xlu2 %2858 }
 0x4f5   : > { %9776 = vst [vmem:[#allocation19_spill] sm:$0xff] %v7982_v8 }
 0x4f6   : > { %9777 = vst [vmem:[#allocation76_spill] sm:$0xff] %v7986_v25 }
 0x4f9   : > { %2990 = vrot.lane.b32.xlu0 %v7569_v23, %s5577_s6  ;;  %2986 = vrot.lane.b32.xlu1 %v7553_v46, %s5577_s6 }
 0x4fa   : > { %2994 = vrot.lane.b32.xlu2 %v7585_v19, %s5577_s6 }
 0x4fb   : > { %v7992_v26 = vpop.permute.xlu0 %2842  ;;  %v7994_v47 = vpop.permute.xlu1 %2774 }
 0x4fc   : > { %9778 = vst [vmem:[#allocation48_spill] sm:$0xff] %v7994_v47  ;;  %v7998_v1 = vpop.permute.xlu2 %2864 }
 0x4fd   : > { %9779 = vst [vmem:[#allocation89_spill] sm:$0xff] %v7998_v1  ;;  %v2488_v1 = vld [vmem:[#allocation3 + $0x31] sm:$0xff] }
 0x501   : > { %2996 = vrot.lane.b32.xlu0 %v7593_v41, %s5577_s6  ;;  %2992 = vrot.lane.b32.xlu1 %v7577_v45, %s5577_s6 }
 0x502   : > { %3000 = vrot.lane.b32.xlu2 %v7612_v5, %s5577_s6 }
 0x503   : > { %v8004_v42 = vpop.permute.xlu0 %2848  ;;  %v8006_v23 = vpop.permute.xlu1 %2844 }
 0x504   : > { %v8010_v46 = vpop.permute.xlu2 %2870 }
 0x505   : > { %9780 = vst [vmem:[#allocation90_spill] sm:$0xff] %v8010_v46 }
 0x509   : > { %3002 = vrot.lane.b32.xlu0 %v7603_v24, %s5577_s6  ;;  %2998 = vrot.lane.b32.xlu1 %v7601_v58, %s5577_s6 }
 0x50a   : > { %3006 = vrot.lane.b32.xlu2 %v7626_v61, %s5577_s6 }
 0x50b   : > { %v8016_v19 = vpop.permute.xlu0 %2854  ;;  %v8018_v41 = vpop.permute.xlu1 %2850 }
 0x50c   : > { %v8022_v45 = vpop.permute.xlu2 %2876 }
 0x511   : > { %3008 = vrot.lane.b32.xlu0 %v7620_v18, %s5577_s6  ;;  %3004 = vrot.lane.b32.xlu1 %v7614_v28, %s5577_s6 }
 0x512   : > { %3012 = vrot.lane.b32.xlu2 %v7640_v21, %s5577_s6 }
 0x513   : > { %v8028_v5 = vpop.permute.xlu0 %2860  ;;  %v8030_v24 = vpop.permute.xlu1 %2856 }
 0x514   : > { %9781 = vst [vmem:[#allocation112_spill] sm:$0xff] %v8028_v5  ;;  %v8034_v58 = vpop.permute.xlu2 %2882  ;;  %v3843_v5 = vld [vmem:[%s9321_s3 + $0x38] sm:$0xff] }
 0x519   : > { %3014 = vrot.lane.b32.xlu0 %v7634_v33, %s5577_s6  ;;  %3010 = vrot.lane.b32.xlu1 %v7628_v30, %s5577_s6 }
 0x51a   : > { %3018 = vrot.lane.b32.xlu2 %v7654_v17, %s5577_s6 }
 0x51b   : > { %v8040_v46 = vpop.permute.xlu0 %2866  ;;  %v8042_v47 = vpop.permute.xlu1 %2862 }
 0x51c   : > { %9782 = vst [vmem:[#allocation109_spill] sm:$0xff] %v8040_v46  ;;  %v8046_v39 = vpop.permute.xlu2 %2888 }
 0x51d   : > { %9783 = vst [vmem:[#allocation124_spill] sm:$0xff] %v8042_v47 }
 0x521   : > { %3020 = vrot.lane.b32.xlu0 %v7648_v37, %s5577_s6  ;;  %3016 = vrot.lane.b32.xlu1 %v7642_v32, %s5577_s6 }
 0x522   : > { %3024 = vrot.lane.b32.xlu2 %v7665_v54, %s5577_s6 }
 0x523   : > { %v8052_v21 = vpop.permute.xlu0 %2872  ;;  %v8054_v33 = vpop.permute.xlu1 %2868 }
 0x524   : > { %9784 = vst [vmem:[#allocation51_spill] sm:$0xff] %v8054_v33  ;;  %v8058_v46 = vpop.permute.xlu2 %2894 }
 0x525   : > { %9785 = vst [vmem:[#allocation138_spill] sm:$0xff] %v8058_v46 }
 0x529   : > { %3128 = vrot.lane.b32.xlu0 %v7729_v48, %s5578_s21  ;;  %3022 = vrot.lane.b32.xlu1 %v7656_v7, %s5577_s6 }
 0x52a   : > { %3384 = vrot.lane.b32.xlu2 %v7614_v28, %s5579_s22 }
 0x52b   : > { %v8064_v37 = vpop.permute.xlu0 %2878  ;;  %v8066_v17 = vpop.permute.xlu1 %2874 }
 0x52c   : > { %v8070_v32 = vpop.permute.xlu2 %2900 }
 0x52d   : > { %9786 = vst [vmem:[#allocation139_spill] sm:$0xff] %v8070_v32 }
 0x531   : > { %3512 = vrot.lane.b32.xlu0 %v7740_v3, %s5580_s23  ;;  %3256 = vrot.lane.b32.xlu1 %v7876_v43, %s5581_s24 }
 0x532   : > { %3224 = vrot.lane.b32.xlu2 %v7817_v35, %s5581_s24 }
 0x533   : > { %v8076_v54 = vpop.permute.xlu0 %2884  ;;  %v8078_v7 = vpop.permute.xlu1 %2880 }
 0x534   : > { %v8082_v48 = vpop.permute.xlu2 %2970 }
 0x539   : > { %3130 = vrot.lane.b32.xlu0 %v7746_v56, %s5578_s21  ;;  %3096 = vrot.lane.b32.xlu1 %v7673_v62, %s5578_s21 }
 0x53a   : > { %3258 = vrot.lane.b32.xlu2 %v7882_v12, %s5581_s24 }
 0x53b   : > { %v8088_v28 = vpop.permute.xlu0 %2890  ;;  %v8090_v33 = vpop.permute.xlu1 %2886 }
 0x53c   : > { %v8094_v32 = vpop.permute.xlu2 %2976 }
 0x541   : > { %3480 = vrot.lane.b32.xlu0 %v7691_v40, %s5580_s23  ;;  %3352 = vrot.lane.b32.xlu1 %v2488_v1, %s5579_s22 }
 0x542   : > { %3514 = vrot.lane.b32.xlu2 %v7744_v10, %s5580_s23 }
 0x543   : > { %v8099_v6 = vpop.permute.xlu0 %2896  ;;  %v8101_v56 = vpop.permute.xlu1 %2892 }
 0x544   : > { %9787 = vst [vmem:[#allocation159_spill] sm:$0xff] %v8099_v6  ;;  %v8105_v62 = vpop.permute.xlu2 %2982  ;;  %v2489_v6 = vld [vmem:[#allocation3 + $0x39] sm:$0xff] }
 0x545   : > { %9788 = vst [vmem:[#allocation21_spill] sm:$0xff] %v8101_v56 }
 0x549   : > { %3098 = vrot.lane.b32.xlu0 %v7678_v31, %s5578_s21  ;;  %3386 = vrot.lane.b32.xlu1 %v7626_v61, %s5579_s22 }
 0x54a   : > { %3132 = vrot.lane.b32.xlu2 %v7740_v3, %s5578_s21 }
 0x54b   : > { %v8111_v47 = vpop.permute.xlu0 %2902  ;;  %v8113_v8 = vpop.permute.xlu1 %2898 }
 0x54c   : > { %9789 = vst [vmem:[#allocation22_spill] sm:$0xff] %v8111_v47  ;;  %v8117_v1 = vpop.permute.xlu2 %2988 }
 0x54d   : > { %9790 = vst [vmem:[#allocation77_spill] sm:$0xff] %v8113_v8 }
 0x54e   : > { %9791 = vst [vmem:[#allocation64_spill] sm:$0xff] %v8117_v1 }
 0x551   : > { %3354 = vrot.lane.b32.xlu0 %v2489_v6, %s5579_s22  ;;  %3226 = vrot.lane.b32.xlu1 %v7813_v4, %s5581_s24 }
 0x552   : > { %3482 = vrot.lane.b32.xlu2 %v7685_v52, %s5580_s23 }
 0x553   : > { %v8122_v46 = vpop.permute.xlu0 %2972  ;;  %v8124_v31 = vpop.permute.xlu1 %2968 }
 0x554   : > { %v8128_v61 = vpop.permute.xlu2 %2994 }
 0x555   : > { %9792 = vst [vmem:[#allocation98_spill] sm:$0xff] %v8128_v61  ;;  %v2490_v61 = vld [vmem:[#allocation3 + $0x49] sm:$0xff] }
 0x559   : > { %3388 = vrot.lane.b32.xlu0 %v7620_v18, %s5579_s22  ;;  %3260 = vrot.lane.b32.xlu1 %v7898_v60, %s5581_s24 }
 0x55a   : > { %3100 = vrot.lane.b32.xlu2 %v7691_v40, %s5578_s21 }
 0x55b   : > { %v8134_v3 = vpop.permute.xlu0 %2978  ;;  %v8136_v6 = vpop.permute.xlu1 %2974 }
 0x55c   : > { %v8140_v4 = vpop.permute.xlu2 %3000 }
 0x561   : > { %3228 = vrot.lane.b32.xlu0 %v7819_v11, %s5581_s24  ;;  %3516 = vrot.lane.b32.xlu1 %v7764_v20, %s5580_s23 }
 0x562   : > { %3356 = vrot.lane.b32.xlu2 %v2490_v61, %s5579_s22 }
 0x563   : > { %v8146_v47 = vpop.permute.xlu0 %2984  ;;  %v8148_v18 = vpop.permute.xlu1 %2980 }
 0x564   : > { %9793 = vst [vmem:[#allocation84_spill] sm:$0xff] %v8146_v47  ;;  %v8151_v8 = vpop.permute.xlu2 %3006  ;;  %v2461_v47 = vld [vmem:[#allocation3 + $0x68] sm:$0xff] }
 0x569   : > { %3262 = vrot.lane.b32.xlu0 %v7894_v14, %s5581_s24  ;;  %3134 = vrot.lane.b32.xlu1 %v7744_v10, %s5578_s21  ;;  %v2459_v10 = vld [vmem:[#allocation3 + $0x50] sm:$0xff] }
 0x56a   : > { %3390 = vrot.lane.b32.xlu2 %v7628_v30, %s5579_s22 }
 0x56b   : > { %v8157_v40 = vpop.permute.xlu0 %2990  ;;  %v8159_v11 = vpop.permute.xlu1 %2986 }
 0x56c   : > { %9794 = vst [vmem:[#allocation20_spill] sm:$0xff] %v8157_v40  ;;  %v8163_v51 = vpop.permute.xlu2 %3012  ;;  %v3844_v40 = vld [vmem:[%s9321_s3 + $0x40] sm:$0xff] }
 0x56d   : > { %9795 = vst [vmem:[#allocation24_spill] sm:$0xff] %v8159_v11  ;;  %5478 = vmatpush.msra.mxu2 %v3844_v40  ;;  %3953 = vmatpush.msra.mxu1 %v3844_v40  ;;  %v2492_v11 = vld [vmem:[#allocation3 + $0x61] sm:$0xff] }
 0x56f   : > { %5479 = vmatpush.msra.mxu2 %v3843_v5  ;;  %3954 = vmatpush.msra.mxu1 %v3843_v5  ;;  %v2491_v5 = vld [vmem:[#allocation3 + $0x51] sm:$0xff] }
 0x571   : > { %3518 = vrot.lane.b32.xlu0 %v7758_v53, %s5580_s23  ;;  %3484 = vrot.lane.b32.xlu1 %v7689_v57, %s5580_s23 }
 0x572   : > { %3230 = vrot.lane.b32.xlu2 %v2459_v10, %s5581_s24  ;;  %v3842_v10 = vld [vmem:[%s9321_s3 + $0x30] sm:$0xff] }
 0x573   : > { %v8169_v61 = vpop.permute.xlu0 %2996  ;;  %v8171_v1 = vpop.permute.xlu1 %2992  ;;  %5480 = vmatpush.msra.mxu2 %v3842_v10  ;;  %3955 = vmatpush.msra.mxu1 %v3842_v10 }
 0x574   : > { %9796 = vst [vmem:[#allocation125_spill] sm:$0xff] %v8169_v61  ;;  %v8177_v30 = vpop.permute.xlu2 %3018 }
 0x575   : > { %9797 = vst [vmem:[#allocation65_spill] sm:$0xff] %v8171_v1  ;;  %v3841_v1 = vld [vmem:[%s9321_s3 + $0x28] sm:$0xff] }
 0x576   : > { %5481 = vmatpush.msra.mxu2 %v3841_v1  ;;  %3956 = vmatpush.msra.mxu1 %v3841_v1 }
 0x579   : > { %3136 = vrot.lane.b32.xlu0 %v7764_v20, %s5578_s21  ;;  %3102 = vrot.lane.b32.xlu1 %v7685_v52, %s5578_s21  ;;  %v3840_v52 = vld [vmem:[%s9321_s3 + $0x20] sm:$0xff] }
 0x57a   : > { %3264 = vrot.lane.b32.xlu2 %v7900_v29, %s5581_s24  ;;  %5482 = vmatpush.msra.mxu2 %v3840_v52  ;;  %v3838_v29 = vld [vmem:[%s9321_s3 + $0x10] sm:$0xff] }
 0x57b   : > { %v8189_v61 = vpop.permute.xlu0 %3002  ;;  %v8191_v40 = vpop.permute.xlu1 %2998  ;;  %3957 = vmatpush.msra.mxu1 %v3840_v52 }
 0x57c   : > { %9798 = vst [vmem:[#allocation147_spill] sm:$0xff] %v8191_v40  ;;  %v8201_v20 = vpop.permute.xlu2 %3024  ;;  %v3839_v40 = vld [vmem:[%s9321_s3 + $0x18] sm:$0xff] }
 0x57d   : > { %9799 = vst [vmem:[#allocation132_spill] sm:$0xff] %v8201_v20  ;;  %5483 = vmatpush.msra.mxu2 %v3839_v40  ;;  %v3837_v20 = vld [vmem:[%s9321_s3 + $0x8] sm:$0xff]  ;;  %3958 = vmatpush.msra.mxu1 %v3839_v40 }
 0x57f   : > { %5484 = vmatpush.msra.mxu2 %v3838_v29  ;;  %3959 = vmatpush.msra.mxu1 %v3838_v29  ;;  %v2460_v29 = vld [vmem:[#allocation3 + $0x60] sm:$0xff] }
 0x581   : > { %3486 = vrot.lane.b32.xlu0 %v7703_v63, %s5580_s23  ;;  %3358 = vrot.lane.b32.xlu1 %v2491_v5, %s5579_s22  ;;  %v3836_v63 = vld [vmem:[%s9321_s3] sm:$0xff] }
 0x582   : > { %3520 = vrot.lane.b32.xlu2 %v7762_v2, %s5580_s23  ;;  %5485 = vmatpush.msra.mxu2 %v3837_v20  ;;  %v2508_v5 = vld [vmem:[#allocation3 + $0x121] sm:$0xff] }
 0x583   : > { %v8212_v1 = vpop.permute.xlu0 %3008  ;;  %v8214_v10 = vpop.permute.xlu1 %3004  ;;  %3960 = vmatpush.msra.mxu1 %v3837_v20 }
 0x584   : > { %v3385_v52 = vpop.permute.xlu2 %3384  ;;  %5486 = vmatpush.msra.mxu2 %v3836_v63 }
 0x585   : > { %3961 = vmatpush.msra.mxu1 %v3836_v63  ;;  %v2509_v63 = vld [vmem:[#allocation3 + $0x129] sm:$0xff] }
 0x589   : > { %3104 = vrot.lane.b32.xlu0 %v7689_v57, %s5578_s21  ;;  %3392 = vrot.lane.b32.xlu1 %v2508_v5, %s5579_s22 }
 0x58a   : > { %3138 = vrot.lane.b32.xlu2 %v7758_v53, %s5578_s21 }
 0x58b   : > { %v8227_v56 = vpop.permute.xlu0 %3014  ;;  %v8229_v40 = vpop.permute.xlu1 %3010 }
 0x58c   : > { %v3225_v9 = vpop.permute.xlu2 %3224 }
 0x591   : > { %3360 = vrot.lane.b32.xlu0 %v2492_v11, %s5579_s22  ;;  %3232 = vrot.lane.b32.xlu1 %v2460_v29, %s5581_s24  ;;  %v2428_v11 = vld [vmem:[#allocation3 + $0x52] sm:$0xff]  ;;  %v3592_v29 = vsel %vm1689_vm2, %v7862_v34, %v7726_v27 }
 0x592   : > { %3488 = vrot.lane.b32.xlu2 %v7699_v38, %s5580_s23  ;;  %v3624_v38 = vsel %vm1755_vm6, %v3592_v29, %v7937_v55 }
 0x593   : > { %v8235_v25 = vpop.permute.xlu0 %3020  ;;  %v8237_v57 = vpop.permute.xlu1 %3016 }
 0x594   : > { %9800 = vst [vmem:[#allocation160_spill] sm:$0xff] %v8235_v25  ;;  %v8241_v20 = vpop.permute.xlu2 %3258 }
 0x599   : > { %3394 = vrot.lane.b32.xlu0 %v2509_v63, %s5579_s22  ;;  %3266 = vrot.lane.b32.xlu1 %v7916_v36, %s5581_s24  ;;  %v3656_v63 = vsel %vm1821_vm7, %v3624_v38, %v8052_v21  ;;  %v9802_v36 = vld [vmem:[#allocation58_spill] sm:$0xff] }
 0x59a   : > { %3106 = vrot.lane.b32.xlu2 %v2428_v11, %s5578_s21  ;;  %v3688_v11 = vsel %vm1887_vm8, %v3656_v63, %v8140_v4  ;;  %v2263_v4 = vld [vmem:[#allocation3] sm:$0xff] }
 0x59b   : > { %v3129_v53 = vpop.permute.xlu0 %3128  ;;  %v8246_v5 = vpop.permute.xlu1 %3022 }
 0x59c   : > { %9801 = vst [vmem:[#allocation161_spill] sm:$0xff] %v8246_v5  ;;  %v3515_v25 = vpop.permute.xlu2 %3514  ;;  %v3721_v27 = vsel %vm3704_vm12, %v3688_v11, %v3129_v53  ;;  %v2493_v5 = vld [vmem:[#allocation3 + $0x69] sm:$0xff] }
 0x59d   : > { %v9803_v53 = vld [vmem:[#allocation88_spill] sm:$0xff] }
 0x59e   : > { %v9804_v11 = vld [vmem:[#allocation12_spill] sm:$0xff] }
 0x5a1   : > { %3234 = vrot.lane.b32.xlu0 %v2461_v47, %s5581_s24  ;;  %3522 = vrot.lane.b32.xlu1 %v9802_v36, %s5580_s23 }
 0x5a2   : > { %3362 = vrot.lane.b32.xlu2 %v2493_v5, %s5579_s22 }
 0x5a3   : > { %v3513_v34 = vpop.permute.xlu0 %3512  ;;  %v3257_v55 = vpop.permute.xlu1 %3256 }
 0x5a4   : > { %v3754_v29 = vsel %vm3737_vm13, %v3721_v27, %v3257_v55  ;;  %v8267_v38 = vpop.permute.xlu2 %3132  ;;  %v9805_v27 = vld [vmem:[#allocation59_spill] sm:$0xff] }
 0x5a5   : > { %v3787_v21 = vsel %vm3770_vm14, %v3754_v29, %v3385_v52  ;;  %v3576_v52 = vsel %vm1689_vm2, %v2263_v4, %v9804_v11 }
 0x5a6   : > { %v3820_v47 = vsel %vm3803_vm15, %v3787_v21, %v3513_v34  ;;  %v3608_v5 = vsel %vm1755_vm6, %v3576_v52, %v9805_v27  ;;  %v2510_v34 = vld [vmem:[#allocation3 + $0x139] sm:$0xff]  ;;  %v9807_v27 = vld [vmem:[#allocation152_spill] sm:$0xff] }
 0x5a7   : > { %5390 = vmatmul.msk.f32.vlgmr.msra.gmra.mxu2 %vm3849_vm0, %v3820_v47  ;;  %v3640_v55 = vsel %vm1821_vm7, %v3608_v5, %v7950_v44  ;;  %v2525_v47 = vld [vmem:[#allocation3 + $0x6a] sm:$0xff] }
 0x5a8   : > { %v3672_v29 = vsel %vm1887_vm8, %v3640_v55, %v8124_v31  ;;  %v9808_v44 = vld [vmem:[#allocation108_spill] sm:$0xff]  ;;  %v9809_v31 = vld [vmem:[#allocation158_spill] sm:$0xff]  ;;  %v2462_v55 = vld [vmem:[#allocation3 + $0x78] sm:$0xff] }
 0x5a9   : > { %3268 = vrot.lane.b32.xlu0 %v9803_v53, %s5581_s24  ;;  %3140 = vrot.lane.b32.xlu1 %v7762_v2, %s5578_s21  ;;  %v9806_v53 = vld [vmem:[#allocation7_spill] sm:$0xff]  ;;  %v3593_v5 = vsel %vm1689_vm2, %v9808_v44, %v9807_v27 }
 0x5aa   : > { %3396 = vrot.lane.b32.xlu2 %v2510_v34, %s5579_s22 }
 0x5ab   : > { %v3131_v63 = vpop.permute.xlu0 %3130  ;;  %v3097_v36 = vpop.permute.xlu1 %3096 }
 0x5ac   : > { %v3705_v21 = vsel %vm3704_vm12, %v3672_v29, %v3097_v36  ;;  %v3483_v2 = vpop.permute.xlu2 %3482  ;;  %v3625_v36 = vsel %vm1755_vm6, %v3593_v5, %v9809_v31  ;;  %v2264_v5 = vld [vmem:[#allocation3 + $0x8] sm:$0xff]  ;;  %v9811_v31 = vld [vmem:[#allocation10_spill] sm:$0xff] }
 0x5ad   : > { %v3738_v52 = vsel %vm3737_vm13, %v3705_v21, %v3225_v9 }
 0x5b1   : > { %3524 = vrot.lane.b32.xlu0 %v9806_v53, %s5580_s23  ;;  %3490 = vrot.lane.b32.xlu1 %v2525_v47, %s5580_s23  ;;  %v3657_v53 = vsel %vm1821_vm7, %v3625_v36, %v8066_v17  ;;  %v3577_v36 = vsel %vm1689_vm2, %v2264_v5, %v9811_v31  ;;  %v8326_v5 = vld [vmem:[#allocation3 + $0x142] sm:$0xff] }
 0x5b2   : > { %3236 = vrot.lane.b32.xlu2 %v2462_v55, %s5581_s24  ;;  %v3689_v9 = vsel %vm1887_vm8, %v3657_v53, %v8189_v61  ;;  %v9812_v55 = vld [vmem:[#allocation83_spill] sm:$0xff] }
 0x5b3   : > { %v3481_v4 = vpop.permute.xlu0 %3480  ;;  %v3353_v11 = vpop.permute.xlu1 %3352  ;;  %v3722_v21 = vsel %vm3704_vm12, %v3689_v9, %v3131_v63  ;;  %v9810_v63 = vld [vmem:[#allocation111_spill] sm:$0xff]  ;;  %v2526_v9 = vld [vmem:[#allocation3 + $0x7a] sm:$0xff] }
 0x5b4   : > { %v3771_v34 = vsel %vm3770_vm14, %v3738_v52, %v3353_v11  ;;  %v8301_v27 = vpop.permute.xlu2 %3100  ;;  %v2446_v11 = vld [vmem:[#allocation3 + $0x12a] sm:$0xff]  ;;  %v2429_v52 = vld [vmem:[#allocation3 + $0x62] sm:$0xff]  ;;  %v3755_v17 = vsel %vm3737_vm13, %v3722_v21, %v8241_v20  ;;  %v2494_v20 = vld [vmem:[#allocation3 + $0x79] sm:$0xff] }
 0x5b5   : > { %v3804_v29 = vsel %vm3803_vm15, %v3771_v34, %v3481_v4 }
 0x5b6   : > { %5374 = vmatmul.msk.f32.vlgmr.msra.gmra.mxu1 %vm3849_vm0, %v3804_v29  ;;  %v3609_v29 = vsel %vm1755_vm6, %v3577_v36, %v9812_v55 }
 0x5b7   : > { %v3641_v21 = vsel %vm1821_vm7, %v3609_v29, %v7992_v26 }
 0x5b9   : > { %3142 = vrot.lane.b32.xlu0 %v2446_v11, %s5578_s21  ;;  %3108 = vrot.lane.b32.xlu1 %v2429_v52, %s5578_s21 }
 0x5ba   : > { %3270 = vrot.lane.b32.xlu2 %v9810_v63, %s5581_s24  ;;  %v2511_v63 = vld [vmem:[#allocation3 + $0x141] sm:$0xff] }
 0x5bb   : > { %v3099_v4 = vpop.permute.xlu0 %3098  ;;  %v3387_v44 = vpop.permute.xlu1 %3386 }
 0x5bc   : > { %v3788_v34 = vsel %vm3770_vm14, %v3755_v17, %v3387_v44  ;;  %v8316_v53 = vpop.permute.xlu2 %3356 }
 0x5bd   : > { %v3821_v61 = vsel %vm3803_vm15, %v3788_v34, %v3515_v25  ;;  %v3673_v25 = vsel %vm1887_vm8, %v3641_v21, %v8082_v48  ;;  %v9813_v48 = vld [vmem:[#allocation16_spill] sm:$0xff] }
 0x5be   : > { %5391 = vmatmul.msk.f32.gmra.mxu2 %vm3849_vm0, %v3821_v61  ;;  %v3706_v11 = vsel %vm3704_vm12, %v3673_v25, %v3099_v4  ;;  %v9814_v4 = vld [vmem:[#allocation123_spill] sm:$0xff] }
 0x5bf   : > { %v3594_v31 = vsel %vm1689_vm2, %v9814_v4, %v9813_v48  ;;  %v9815_v48 = vld [vmem:[#allocation41_spill] sm:$0xff] }
 0x5c0   : > { %v3626_v29 = vsel %vm1755_vm6, %v3594_v31, %v7935_v15  ;;  %v9816_v4 = vld [vmem:[#allocation157_spill] sm:$0xff] }
 0x5c1   : > { %3492 = vrot.lane.b32.xlu0 %v2526_v9, %s5580_s23  ;;  %3364 = vrot.lane.b32.xlu1 %v2494_v20, %s5579_s22  ;;  %v2447_v20 = vld [vmem:[#allocation3 + $0x13a] sm:$0xff]  ;;  %v3595_v31 = vsel %vm1689_vm2, %v9816_v4, %v9815_v48  ;;  %v2464_v48 = vld [vmem:[#allocation3 + $0x90] sm:$0xff] }
 0x5c2   : > { %3526 = vrot.lane.b32.xlu2 %v8326_v5, %s5580_s23 }
 0x5c3   : > { %v3355_v52 = vpop.permute.xlu0 %3354  ;;  %v3227_v44 = vpop.permute.xlu1 %3226 }
 0x5c4   : > { %v3739_v17 = vsel %vm3737_vm13, %v3706_v11, %v3227_v44  ;;  %v3391_v61 = vpop.permute.xlu2 %3390  ;;  %v2463_v44 = vld [vmem:[#allocation3 + $0x80] sm:$0xff] }
 0x5c5   : > { %v3772_v34 = vsel %vm3770_vm14, %v3739_v17, %v3355_v52  ;;  %v2495_v52 = vld [vmem:[#allocation3 + $0x81] sm:$0xff] }
 0x5c6   : > { %v3805_v26 = vsel %vm3803_vm15, %v3772_v34, %v3483_v2  ;;  %v3658_v2 = vsel %vm1821_vm7, %v3626_v29, %v8022_v45  ;;  %v8354_v34 = vld [vmem:[#allocation3 + $0x82] sm:$0xff]  ;;  %v9818_v29 = vld [vmem:[#allocation44_spill] sm:$0xff] }
 0x5c7   : > { %5375 = vmatmul.msk.f32.gmra.mxu1 %vm3849_vm0, %v3805_v26  ;;  %v3690_v21 = vsel %vm1887_vm8, %v3658_v2, %v8214_v10  ;;  %v2512_v26 = vld [vmem:[#allocation3 + $0x151] sm:$0xff] }
 0x5c9   : > { %3110 = vrot.lane.b32.xlu0 %v2525_v47, %s5578_s21  ;;  %3398 = vrot.lane.b32.xlu1 %v2511_v63, %s5579_s22  ;;  %v3723_v47 = vsel %vm3704_vm12, %v3690_v21, %v8267_v38  ;;  %v2480_v63 = vld [vmem:[#allocation3 + $0x150] sm:$0xff] }
 0x5ca   : > { %3144 = vrot.lane.b32.xlu2 %v2447_v20, %s5578_s21 }
 0x5cb   : > { %v3389_v36 = vpop.permute.xlu0 %3388  ;;  %v3261_v55 = vpop.permute.xlu1 %3260 }
 0x5cc   : > { %v3756_v25 = vsel %vm3737_vm13, %v3723_v47, %v3261_v55  ;;  %v8348_v11 = vpop.permute.xlu2 %3230  ;;  %v9817_v55 = vld [vmem:[#allocation38_spill] sm:$0xff] }
 0x5cd   : > { %v3789_v17 = vsel %vm3770_vm14, %v3756_v25, %v3389_v36  ;;  %v3627_v36 = vsel %vm1755_vm6, %v3595_v31, %v7946_v50  ;;  %v3578_v2 = vsel %vm1689_vm2, %v9818_v29, %v9817_v55  ;;  %v9819_v25 = vld [vmem:[#allocation121_spill] sm:$0xff]  ;;  %v9820_v29 = vld [vmem:[#allocation50_spill] sm:$0xff] }
 0x5ce   : > { %v3659_v20 = vsel %vm1821_vm7, %v3627_v36, %v8064_v37  ;;  %v2496_v31 = vld [vmem:[#allocation3 + $0x91] sm:$0xff] }
 0x5cf   : > { %v2481_v55 = vld [vmem:[#allocation3 + $0x158] sm:$0xff] }
 0x5d1   : > { %3366 = vrot.lane.b32.xlu0 %v2495_v52, %s5579_s22  ;;  %3238 = vrot.lane.b32.xlu1 %v2463_v44, %s5581_s24  ;;  %v3610_v52 = vsel %vm1755_vm6, %v3578_v2, %v9819_v25  ;;  %v3691_v44 = vsel %vm1887_vm8, %v3659_v20, %v8151_v8  ;;  %v2544_v8 = vld [vmem:[#allocation3 + $0x152] sm:$0xff]  ;;  %v9821_v2 = vld [vmem:[#allocation86_spill] sm:$0xff] }
 0x5d2   : > { %3494 = vrot.lane.b32.xlu2 %v8354_v34, %s5580_s23  ;;  %v3579_v20 = vsel %vm1689_vm2, %v9821_v2, %v9820_v29  ;;  %v2513_v25 = vld [vmem:[#allocation3 + $0x159] sm:$0xff]  ;;  %v2482_v29 = vld [vmem:[#allocation3 + $0x168] sm:$0xff] }
 0x5d3   : > { %v3229_v15 = vpop.permute.xlu0 %3228  ;;  %v3517_v45 = vpop.permute.xlu1 %3516 }
 0x5d4   : > { %v3822_v10 = vsel %vm3803_vm15, %v3789_v17, %v3517_v45  ;;  %v8359_v38 = vpop.permute.xlu2 %3264  ;;  %v3642_v45 = vsel %vm1821_vm7, %v3610_v52, %v8006_v23 }
 0x5d5   : > { %5392 = vmatmul.msk.f32.gmra.mxu2 %vm3849_vm0, %v3822_v10  ;;  %v3674_v17 = vsel %vm1887_vm8, %v3642_v45, %v8122_v46 }
 0x5d6   : > { %v3707_v37 = vsel %vm3704_vm12, %v3674_v17, %v8301_v27  ;;  %v2528_v17 = vld [vmem:[#allocation3 + $0x92] sm:$0xff] }
 0x5d7   : > { %v3740_v10 = vsel %vm3737_vm13, %v3707_v37, %v3229_v15 }
 0x5d8   : > { %v3773_v46 = vsel %vm3770_vm14, %v3740_v10, %v8316_v53 }
 0x5d9   : > { %3400 = vrot.lane.b32.xlu0 %v2512_v26, %s5579_s22  ;;  %3272 = vrot.lane.b32.xlu1 %v2480_v63, %s5581_s24 }
 0x5da   : > { %3112 = vrot.lane.b32.xlu2 %v2526_v9, %s5578_s21 }
 0x5db   : > { %v3263_v21 = vpop.permute.xlu0 %3262  ;;  %v3135_v47 = vpop.permute.xlu1 %3134 }
 0x5dc   : > { %v3724_v50 = vsel %vm3704_vm12, %v3691_v44, %v3135_v47  ;;  %v3521_v63 = vpop.permute.xlu2 %3520 }
 0x5dd   : > { %v3757_v26 = vsel %vm3737_vm13, %v3724_v50, %v3263_v21  ;;  %v9822_v21 = vld [vmem:[#allocation107_spill] sm:$0xff]  ;;  %v2545_v50 = vld [vmem:[#allocation3 + $0x15a] sm:$0xff] }
 0x5de   : > { %v3790_v9 = vsel %vm3770_vm14, %v3757_v26, %v3391_v61  ;;  %v3611_v47 = vsel %vm1755_vm6, %v3579_v20, %v9822_v21  ;;  %v2529_v21 = vld [vmem:[#allocation3 + $0x9a] sm:$0xff] }
 0x5df   : > { %v3643_v52 = vsel %vm1821_vm7, %v3611_v47, %v7962_v13  ;;  %v9823_v13 = vld [vmem:[#allocation72_spill] sm:$0xff] }
 0x5e0   : > { %v3675_v44 = vsel %vm1887_vm8, %v3643_v52, %v8136_v6 }
 0x5e1   : > { %3240 = vrot.lane.b32.xlu0 %v2464_v48, %s5581_s24  ;;  %3528 = vrot.lane.b32.xlu1 %v2544_v8, %s5580_s23  ;;  %v3596_v48 = vsel %vm1689_vm2, %v7876_v43, %v9823_v13 }
 0x5e2   : > { %3368 = vrot.lane.b32.xlu2 %v2496_v31, %s5579_s22 }
 0x5e3   : > { %v3519_v23 = vpop.permute.xlu0 %3518  ;;  %v3485_v4 = vpop.permute.xlu1 %3484 }
 0x5e4   : > { %v3806_v27 = vsel %vm3803_vm15, %v3773_v46, %v3485_v4  ;;  %v3823_v15 = vsel %vm3803_vm15, %v3790_v9, %v3519_v23  ;;  %v8397_v36 = vpop.permute.xlu2 %3138  ;;  %v9824_v23 = vld [vmem:[#allocation62_spill] sm:$0xff]  ;;  %v2465_v46 = vld [vmem:[#allocation3 + $0x98] sm:$0xff] }
 0x5e5   : > { %5376 = vmatmul.msk.f32.gmra.mxu1 %vm3849_vm0, %v3806_v27  ;;  %5393 = vmatmul.msk.f32.gmra.mxu2 %vm3849_vm0, %v3823_v15  ;;  %v3628_v4 = vsel %vm1755_vm6, %v3596_v48, %v9824_v23 }
 0x5e6   : > { %v3660_v27 = vsel %vm1821_vm7, %v3628_v4, %v8078_v7 }
 0x5e9   : > { %3274 = vrot.lane.b32.xlu0 %v2481_v55, %s5581_s24  ;;  %3146 = vrot.lane.b32.xlu1 %v8326_v5, %s5578_s21 }
 0x5ea   : > { %3402 = vrot.lane.b32.xlu2 %v2513_v25, %s5579_s22 }
 0x5eb   : > { %v3137_v53 = vpop.permute.xlu0 %3136  ;;  %v3103_v61 = vpop.permute.xlu1 %3102 }
 0x5ec   : > { %v3708_v5 = vsel %vm3704_vm12, %v3675_v44, %v3103_v61  ;;  %v3489_v45 = vpop.permute.xlu2 %3488 }
 0x5ed   : > { %v3741_v26 = vsel %vm3737_vm13, %v3708_v5, %v8348_v11  ;;  %v3692_v11 = vsel %vm1887_vm8, %v3660_v27, %v8212_v1  ;;  %v9825_v1 = vld [vmem:[#allocation46_spill] sm:$0xff]  ;;  %v8457_v5 = vld [vmem:[#allocation3 + $0x16a] sm:$0xff] }
 0x5ee   : > { %v3725_v43 = vsel %vm3704_vm12, %v3692_v11, %v3137_v53  ;;  %v9826_v53 = vld [vmem:[#allocation131_spill] sm:$0xff] }
 0x5ef   : > { %v3758_v7 = vsel %vm3737_vm13, %v3725_v43, %v8359_v38  ;;  %v2497_v38 = vld [vmem:[#allocation3 + $0x99] sm:$0xff]  ;;  %v2466_v27 = vld [vmem:[#allocation3 + $0xa8] sm:$0xff]  ;;  %v8492_v43 = vld [vmem:[#allocation3 + $0x171] sm:$0xff] }
 0x5f1   : > { %3530 = vrot.lane.b32.xlu0 %v2545_v50, %s5580_s23  ;;  %3496 = vrot.lane.b32.xlu1 %v2528_v17, %s5580_s23 }
 0x5f2   : > { %3242 = vrot.lane.b32.xlu2 %v2465_v46, %s5581_s24 }
 0x5f3   : > { %v3487_v37 = vpop.permute.xlu0 %3486  ;;  %v3359_v10 = vpop.permute.xlu1 %3358 }
 0x5f4   : > { %v3774_v6 = vsel %vm3770_vm14, %v3741_v26, %v3359_v10  ;;  %v8431_v15 = vpop.permute.xlu2 %3106  ;;  %v2514_v26 = vld [vmem:[#allocation3 + $0x169] sm:$0xff] }
 0x5f5   : > { %v3807_v9 = vsel %vm3803_vm15, %v3774_v6, %v3487_v37 }
 0x5f6   : > { %5377 = vmatmul.msk.f32.gmra.mxu1 %vm3849_vm0, %v3807_v9 }
 0x5f9   : > { %3148 = vrot.lane.b32.xlu0 %v2544_v8, %s5578_s21  ;;  %3114 = vrot.lane.b32.xlu1 %v8354_v34, %s5578_s21  ;;  %v3580_v8 = vsel %vm1689_vm2, %v7817_v35, %v9825_v1 }
 0x5fa   : > { %3276 = vrot.lane.b32.xlu2 %v2482_v29, %s5581_s24  ;;  %v3612_v34 = vsel %vm1755_vm6, %v3580_v8, %v9826_v53  ;;  %v5541_v29 = vld [vmem:[#allocation3 + $0x38] sm:$0xff] }
 0x5fb   : > { %v3105_v31 = vpop.permute.xlu0 %3104  ;;  %v3393_v55 = vpop.permute.xlu1 %3392  ;;  %v3644_v47 = vsel %vm1821_vm7, %v3612_v34, %v8004_v42 }
 0x5fc   : > { %v3791_v61 = vsel %vm3770_vm14, %v3758_v7, %v3393_v55  ;;  %v8447_v20 = vpop.permute.xlu2 %3362  ;;  %v9828_v55 = vld [vmem:[#allocation71_spill] sm:$0xff] }
 0x5fd   : > { %v3824_v2 = vsel %vm3803_vm15, %v3791_v61, %v3521_v63  ;;  %v3676_v63 = vsel %vm1887_vm8, %v3644_v47, %v8094_v32  ;;  %v9827_v32 = vld [vmem:[#allocation31_spill] sm:$0xff]  ;;  %v3598_v7 = vsel %vm1689_vm2, %v7898_v60, %v9828_v55  ;;  %v9833_v55 = vld [vmem:[#allocation106_spill] sm:$0xff] }
 0x5fe   : > { %5394 = vmatmul.msk.f32.gmra.mxu2 %vm3849_vm0, %v3824_v2  ;;  %v3709_v25 = vsel %vm3704_vm12, %v3676_v63, %v3105_v31  ;;  %v3597_v13 = vsel %vm1689_vm2, %v7882_v12, %v9827_v32  ;;  %v2498_v12 = vld [vmem:[#allocation3 + $0xa9] sm:$0xff]  ;;  %v3630_v61 = vsel %vm1755_vm6, %v3598_v7, %v7958_v0  ;;  %v9829_v2 = vld [vmem:[#allocation5_spill] sm:$0xff] }
 0x5ff   : > { %v3629_v23 = vsel %vm1755_vm6, %v3597_v13, %v7944_v49  ;;  %v2483_v31 = vld [vmem:[#allocation3 + $0x170] sm:$0xff]  ;;  %v3581_v1 = vsel %vm1689_vm2, %v5541_v29, %v9829_v2  ;;  %v3662_v8 = vsel %vm1821_vm7, %v3630_v61, %v8076_v54 }
 0x600   : > { %v3694_v47 = vsel %vm1887_vm8, %v3662_v8, %v8163_v51  ;;  %v8520_v51 = vld [vmem:[#allocation3 + $0x172] sm:$0xff] }
 0x601   : > { %3498 = vrot.lane.b32.xlu0 %v2529_v21, %s5580_s23  ;;  %3370 = vrot.lane.b32.xlu1 %v2497_v38, %s5579_s22  ;;  %v9830_v38 = vld [vmem:[#allocation136_spill] sm:$0xff] }
 0x602   : > { %3532 = vrot.lane.b32.xlu2 %v8457_v5, %s5580_s23  ;;  %v3613_v60 = vsel %vm1755_vm6, %v3581_v1, %v9830_v38  ;;  %v2499_v32 = vld [vmem:[#allocation3 + $0xb1] sm:$0xff] }
 0x603   : > { %v3361_v35 = vpop.permute.xlu0 %3360  ;;  %v3233_v52 = vpop.permute.xlu1 %3232  ;;  %v3645_v63 = vsel %vm1821_vm7, %v3613_v60, %v8018_v41  ;;  %v9834_v61 = vld [vmem:[#allocation104_spill] sm:$0xff]  ;;  %v2500_v60 = vld [vmem:[#allocation3 + $0xc1] sm:$0xff] }
 0x604   : > { %v3742_v44 = vsel %vm3737_vm13, %v3709_v25, %v3233_v52  ;;  %v3397_v10 = vpop.permute.xlu2 %3396  ;;  %v3677_v25 = vsel %vm1887_vm8, %v3645_v63, %v8134_v3  ;;  %v9835_v63 = vld [vmem:[#allocation8_spill] sm:$0xff] }
 0x605   : > { %v3775_v37 = vsel %vm3770_vm14, %v3742_v44, %v3361_v35  ;;  %v3710_v54 = vsel %vm3704_vm12, %v3677_v25, %v8431_v15  ;;  %v9836_v25 = vld [vmem:[#allocation9_spill] sm:$0xff] }
 0x606   : > { %v3808_v42 = vsel %vm3803_vm15, %v3775_v37, %v3489_v45  ;;  %v3661_v45 = vsel %vm1821_vm7, %v3629_v23, %v8034_v58  ;;  %v2467_v37 = vld [vmem:[#allocation3 + $0xb0] sm:$0xff]  ;;  %v9831_v23 = vld [vmem:[#allocation53_spill] sm:$0xff] }
 0x607   : > { %5378 = vmatmul.msk.f32.gmra.mxu1 %vm3849_vm0, %v3808_v42  ;;  %v3693_v4 = vsel %vm1887_vm8, %v3661_v45, %v8229_v40 }
 0x609   : > { %3116 = vrot.lane.b32.xlu0 %v2528_v17, %s5578_s21  ;;  %3404 = vrot.lane.b32.xlu1 %v2514_v26, %s5579_s22  ;;  %v3726_v17 = vsel %vm3704_vm12, %v3693_v4, %v8397_v36  ;;  %v9832_v4 = vld [vmem:[#allocation144_spill] sm:$0xff] }
 0x60a   : > { %3150 = vrot.lane.b32.xlu2 %v2545_v50, %s5578_s21  ;;  %v8485_v50 = vld [vmem:[#allocation3 + $0xaa] sm:$0xff] }
 0x60b   : > { %v3395_v48 = vpop.permute.xlu0 %3394  ;;  %v3267_v6 = vpop.permute.xlu1 %3266 }
 0x60c   : > { %v3759_v46 = vsel %vm3737_vm13, %v3726_v17, %v3267_v6  ;;  %v8479_v9 = vpop.permute.xlu2 %3236  ;;  %v5542_v6 = vld [vmem:[#allocation3 + $0x48] sm:$0xff] }
 0x60d   : > { %v3792_v11 = vsel %vm3770_vm14, %v3759_v46, %v3395_v48  ;;  %v2484_v48 = vld [vmem:[#allocation3 + $0x180] sm:$0xff]  ;;  %v3582_v45 = vsel %vm1689_vm2, %v5542_v6, %v9831_v23 }
 0x60e   : > { %v3614_v17 = vsel %vm1755_vm6, %v3582_v45, %v9832_v4  ;;  %v8542_v46 = vld [vmem:[#allocation3 + $0x181] sm:$0xff] }
 0x611   : > { %3372 = vrot.lane.b32.xlu0 %v2498_v12, %s5579_s22  ;;  %3244 = vrot.lane.b32.xlu1 %v2466_v27, %s5581_s24  ;;  %v3646_v12 = vsel %vm1821_vm7, %v3614_v17, %v7974_v16 }
 0x612   : > { %3500 = vrot.lane.b32.xlu2 %v8485_v50, %s5580_s23 }
 0x613   : > { %v3235_v49 = vpop.permute.xlu0 %3234  ;;  %v3523_v58 = vpop.permute.xlu1 %3522 }
 0x614   : > { %v3825_v40 = vsel %vm3803_vm15, %v3792_v11, %v3523_v58  ;;  %v8490_v36 = vpop.permute.xlu2 %3270  ;;  %v3743_v35 = vsel %vm3737_vm13, %v3710_v54, %v3235_v49  ;;  %v8551_v58 = vld [vmem:[#allocation3 + $0x182] sm:$0xff]  ;;  %v8553_v11 = vld [vmem:[#allocation3 + $0xb2] sm:$0xff] }
 0x615   : > { %5395 = vmatmul.msk.f32.gmra.mxu2 %vm3849_vm0, %v3825_v40 }
 0x619   : > { %3406 = vrot.lane.b32.xlu0 %v8492_v43, %s5579_s22  ;;  %3278 = vrot.lane.b32.xlu1 %v2483_v31, %s5581_s24 }
 0x61a   : > { %3118 = vrot.lane.b32.xlu2 %v2529_v21, %s5578_s21  ;;  %v3776_v21 = vsel %vm3770_vm14, %v3743_v35, %v8447_v20  ;;  %v2485_v35 = vld [vmem:[#allocation3 + $0x188] sm:$0xff] }
 0x61b   : > { %v3269_v53 = vpop.permute.xlu0 %3268  ;;  %v3141_v34 = vpop.permute.xlu1 %3140 }
 0x61c   : > { %v3727_v0 = vsel %vm3704_vm12, %v3694_v47, %v3141_v34  ;;  %v3527_v44 = vpop.permute.xlu2 %3526  ;;  %v5543_v47 = vld [vmem:[#allocation3 + $0x50] sm:$0xff] }
 0x61d   : > { %v3760_v52 = vsel %vm3737_vm13, %v3727_v0, %v3269_v53  ;;  %v2468_v53 = vld [vmem:[#allocation3 + $0xc0] sm:$0xff]  ;;  %v3583_v0 = vsel %vm1689_vm2, %v5543_v47, %v9835_v63 }
 0x61e   : > { %v3793_v15 = vsel %vm3770_vm14, %v3760_v52, %v3397_v10 }
 0x621   : > { %3246 = vrot.lane.b32.xlu0 %v2467_v37, %s5581_s24  ;;  %3534 = vrot.lane.b32.xlu1 %v8520_v51, %s5580_s23 }
 0x622   : > { %3374 = vrot.lane.b32.xlu2 %v2499_v32, %s5579_s22  ;;  %v5544_v32 = vld [vmem:[#allocation3 + $0x120] sm:$0xff] }
 0x623   : > { %v3525_v41 = vpop.permute.xlu0 %3524  ;;  %v3491_v3 = vpop.permute.xlu1 %3490 }
 0x624   : > { %v3809_v42 = vsel %vm3803_vm15, %v3776_v21, %v3491_v3  ;;  %v3826_v26 = vsel %vm3803_vm15, %v3793_v15, %v3525_v41  ;;  %v8533_v13 = vpop.permute.xlu2 %3144  ;;  %v8602_v21 = vld [vmem:[#allocation3 + $0x189] sm:$0xff] }
 0x625   : > { %5379 = vmatmul.msk.f32.gmra.mxu1 %vm3849_vm0, %v3809_v42  ;;  %5396 = vmatmul.msk.f32.gmra.mxu2 %vm3849_vm0, %v3826_v26  ;;  %v8613_v26 = vld [vmem:[#allocation3 + $0xc2] sm:$0xff] }
 0x629   : > { %3280 = vrot.lane.b32.xlu0 %v2484_v48, %s5581_s24  ;;  %3152 = vrot.lane.b32.xlu1 %v8457_v5, %s5578_s21  ;;  %v3678_v5 = vsel %vm1887_vm8, %v3646_v12, %v8148_v18  ;;  %v3599_v18 = vsel %vm1689_vm2, %v7894_v14, %v9833_v55  ;;  %v9837_v48 = vld [vmem:[#allocation47_spill] sm:$0xff]  ;;  %v2486_v55 = vld [vmem:[#allocation3 + $0x198] sm:$0xff] }
 0x62a   : > { %3408 = vrot.lane.b32.xlu2 %v8542_v46, %s5579_s22  ;;  %v3631_v29 = vsel %vm1755_vm6, %v3599_v18, %v9834_v61  ;;  %v8634_v12 = vld [vmem:[%s9322_s4] ss:$0 sm:$0xff] }
 0x62b   : > { %v3143_v20 = vpop.permute.xlu0 %3142  ;;  %v3109_v10 = vpop.permute.xlu1 %3108  ;;  %v3663_v1 = vsel %vm1821_vm7, %v3631_v29, %v8090_v33  ;;  %v5545_v61 = vld [vmem:[#allocation3 + $0x128] sm:$0xff]  ;;  %v9838_v29 = vld [vmem:[#allocation57_spill] sm:$0xff] }
 0x62c   : > { %v3711_v27 = vsel %vm3704_vm12, %v3678_v5, %v3109_v10  ;;  %v3495_v49 = vpop.permute.xlu2 %3494 }
 0x62d   : > { %v3744_v31 = vsel %vm3737_vm13, %v3711_v27, %v8479_v9  ;;  %v3695_v9 = vsel %vm1887_vm8, %v3663_v1, %v8227_v56 }
 0x62e   : > { %v3728_v14 = vsel %vm3704_vm12, %v3695_v9, %v3143_v20  ;;  %v3600_v20 = vsel %vm1689_vm2, %v5544_v32, %v9837_v48  ;;  %v5546_v9 = vld [vmem:[#allocation3 + $0x60] sm:$0xff]  ;;  %v8690_v32 = vld [vmem:[#allocation3 + $0xca] sm:$0xff] }
 0x62f   : > { %v3632_v23 = vsel %vm1755_vm6, %v3600_v20, %v7956_v22 }
 0x630   : > { %v3664_v45 = vsel %vm1821_vm7, %v3632_v23, %v8046_v39  ;;  %v2469_v39 = vld [vmem:[#allocation3 + $0xc8] sm:$0xff] }
 0x631   : > { %3536 = vrot.lane.b32.xlu0 %v8551_v58, %s5580_s23  ;;  %3502 = vrot.lane.b32.xlu1 %v8553_v11, %s5580_s23  ;;  %v3696_v4 = vsel %vm1887_vm8, %v3664_v45, %v8237_v57 }
 0x632   : > { %3026 = vrot.lane.b32.xlu2 %v8492_v43, %s5577_s6  ;;  %v3761_v43 = vsel %vm3737_vm13, %v3728_v14, %v8490_v36  ;;  %v3729_v17 = vsel %vm3704_vm12, %v3696_v4, %v8533_v13  ;;  %v9839_v14 = vld [vmem:[#allocation13_spill] sm:$0xff] }
 0x633   : > { %v3493_v16 = vpop.permute.xlu0 %3492  ;;  %v3365_v40 = vpop.permute.xlu1 %3364 }
 0x634   : > { %v3777_v7 = vsel %vm3770_vm14, %v3744_v31, %v3365_v40  ;;  %v8576_v8 = vpop.permute.xlu2 %3112  ;;  %v3963_v57 = vpop.f32.mrf.mxu1  ;;  %v2501_v31 = vld [vmem:[#allocation3 + $0xc9] sm:$0xff] }
 0x635   : > { %v3810_v2 = vsel %vm3803_vm15, %v3777_v7, %v3493_v16 }
 0x636   : > { %5380 = vmatmul.msk.f32.gmra.mxu1 %vm3849_vm0, %v3810_v2  ;;  %v3601_v2 = vsel %vm1689_vm2, %v5545_v61, %v9838_v29 }
 0x639   : > { %3248 = vrot.lane.b32.xlu0 %v2468_v53, %s5581_s24  ;;  %3120 = vrot.lane.b32.xlu1 %v8485_v50, %s5578_s21  ;;  %v3615_v50 = vsel %vm1755_vm6, %v3583_v0, %v9836_v25  ;;  %v3584_v53 = vsel %vm1689_vm2, %v5546_v9, %v9839_v14 }
 0x63a   : > { %3376 = vrot.lane.b32.xlu2 %v2500_v60, %s5579_s22  ;;  %v3647_v36 = vsel %vm1821_vm7, %v3615_v50, %v8016_v19 }
 0x63b   : > { %v3111_v34 = vpop.permute.xlu0 %3110  ;;  %v3399_v33 = vpop.permute.xlu1 %3398  ;;  %v3679_v52 = vsel %vm1887_vm8, %v3647_v36, %v8105_v62  ;;  %v8611_v62 = vld [vmem:[#allocation3 + $0x18a] sm:$0xff] }
 0x63c   : > { %v3794_v38 = vsel %vm3770_vm14, %v3761_v43, %v3399_v33  ;;  %v8591_v54 = vpop.permute.xlu2 %3368  ;;  %v9840_v43 = vld [vmem:[#allocation18_spill] sm:$0xff] }
 0x63d   : > { %v3827_v56 = vsel %vm3803_vm15, %v3794_v38, %v3527_v44  ;;  %v3712_v44 = vsel %vm3704_vm12, %v3679_v52, %v3111_v34  ;;  %v3633_v34 = vsel %vm1755_vm6, %v3601_v2, %v7970_v59  ;;  %v3616_v38 = vsel %vm1755_vm6, %v3584_v53, %v9840_v43  ;;  %v9841_v52 = vld [vmem:[#allocation84_spill] sm:$0xff]  ;;  %v2502_v2 = vld [vmem:[#allocation3 + $0xd9] sm:$0xff]  ;;  %v5547_v43 = vld [vmem:[#allocation3 + $0x68] sm:$0xff] }
 0x63e   : > { %5397 = vmatmul.msk.f32.gmra.mxu2 %vm3849_vm0, %v3827_v56  ;;  %v3665_v60 = vsel %vm1821_vm7, %v3633_v34, %v8088_v28  ;;  %v3648_v0 = vsel %vm1821_vm7, %v3616_v38, %v8030_v24  ;;  %v2550_v24 = vld [vmem:[#allocation3 + $0x19a] sm:$0xff] }
 0x63f   : > { %v3697_v25 = vsel %vm1887_vm8, %v3665_v60, %v8177_v30  ;;  %v9842_v38 = vld [vmem:[#allocation14_spill] sm:$0xff] }
 0x640   : > { %v3585_v60 = vsel %vm1689_vm2, %v5547_v43, %v9842_v38  ;;  %v9848_v43 = vld [vmem:[#allocation21_spill] sm:$0xff] }
 0x641   : > { %3282 = vrot.lane.b32.xlu0 %v2485_v35, %s5581_s24  ;;  %3154 = vrot.lane.b32.xlu1 %v8520_v51, %s5578_s21  ;;  %v4011_v51 = vpop.f32.mrf.mxu2 }
 0x642   : > { %3410 = vrot.lane.b32.xlu2 %v8602_v21, %s5579_s22  ;;  %v4012_v16 = vadd.f32 %v8634_v12, %v4011_v51 }
 0x643   : > { %v3367_v37 = vpop.permute.xlu0 %3366  ;;  %v3239_v41 = vpop.permute.xlu1 %3238 }
 0x644   : > { %v3745_v3 = vsel %vm3737_vm13, %v3712_v44, %v3239_v41  ;;  %v8609_v42 = vpop.permute.xlu2 %3402  ;;  %v8649_v18 = vmax.f32 %v4012_v16, 0.0  ;;  %v8663_v33 = vpop.f32.mrf.mxu1  ;;  %v3680_v44 = vsel %vm1887_vm8, %v3648_v0, %v9841_v52  ;;  %v2470_v16 = vld [vmem:[#allocation3 + $0xd8] sm:$0xff]  ;;  %v9843_v0 = vld [vmem:[#allocation34_spill] sm:$0xff] }
 0x645   : > { %v3778_v15 = vsel %vm3770_vm14, %v3745_v3, %v3367_v37  ;;  %v3964_v37 = vadd.f32 %v8634_v12, %v3963_v57  ;;  %v3713_v30 = vsel %vm3704_vm12, %v3680_v44, %v8576_v8  ;;  %v3967_v44 = vadd.f32 %v8634_v12, %v8663_v33  ;;  %v2534_v33 = vld [vmem:[#allocation3 + $0xda] sm:$0xff] }
 0x646   : > { %v3811_v19 = vsel %vm3803_vm15, %v3778_v15, %v3495_v49  ;;  %v4172_v59 = vrot.slane %v8649_v18, 4  ;;  %v4173_v50 = vrot.slane %v8649_v18, 6 }
 0x647   : > { %5381 = vmatmul.msk.f32.gmra.mxu1 %vm3849_vm0, %v3811_v19 }
 0x649   : > { %3538 = vrot.lane.b32.xlu0 %v8611_v62, %s5580_s23  ;;  %3504 = vrot.lane.b32.xlu1 %v8613_v26, %s5580_s23  ;;  %v8636_v5 = vpop.f32.mrf.mxu2 }
 0x64a   : > { %3028 = vrot.lane.b32.xlu2 %v8542_v46, %s5577_s6 }
 0x64b   : > { %v3401_v10 = vpop.permute.xlu0 %3400  ;;  %v3273_v6 = vpop.permute.xlu1 %3272 }
 0x64c   : > { %v3762_v22 = vsel %vm3737_vm13, %v3729_v17, %v3273_v6  ;;  %v8639_v27 = vpop.permute.xlu2 %3242 }
 0x64d   : > { %v3795_v49 = vsel %vm3770_vm14, %v3762_v22, %v3401_v10  ;;  %v8695_v10 = vmax.f32 %v3964_v37, 0.0 }
 0x651   : > { %3250 = vrot.lane.b32.xlu0 %v2469_v39, %s5581_s24  ;;  %3122 = vrot.lane.b32.xlu1 %v8553_v11, %s5578_s21 }
 0x652   : > { %3378 = vrot.lane.b32.xlu2 %v2501_v31, %s5579_s22 }
 0x653   : > { %v3241_v46 = vpop.permute.xlu0 %3240  ;;  %v3529_v13 = vpop.permute.xlu1 %3528 }
 0x654   : > { %v3828_v40 = vsel %vm3803_vm15, %v3795_v49, %v3529_v13  ;;  %v8651_v7 = vpop.permute.xlu2 %3276  ;;  %v3746_v15 = vsel %vm3737_vm13, %v3713_v30, %v3241_v46 }
 0x655   : > { %5398 = vmatmul.msk.f32.gmra.mxu2 %vm3849_vm0, %v3828_v40  ;;  %v3779_v17 = vsel %vm3770_vm14, %v3746_v15, %v8591_v54  ;;  %v4015_v54 = vadd.f32 %v8634_v12, %v8636_v5  ;;  %v9845_v15 = vld [vmem:[#allocation24_spill] sm:$0xff] }
 0x657   : > { %v4076_v9 = vmax.f32 %v4015_v54, 0.0 }
 0x658   : > { %v4017_v11 = vpop.f32.mrf.mxu2 }
 0x659   : > { %v4018_v1 = vadd.f32 %v8634_v12, %v4017_v11  ;;  %3284 = vrot.lane.b32.xlu0 %v2486_v55, %s5581_s24  ;;  %3156 = vrot.lane.b32.xlu1 %v8551_v58, %s5578_s21  ;;  %v2518_v58 = vld [vmem:[#allocation3 + $0x199] sm:$0xff]  ;;  %v4125_v55 = vrot.slane %v8695_v10, 6  ;;  %v4174_v52 = vrot.slane %v4076_v9, 2 }
 0x65a   : > { %3412 = vrot.lane.b32.xlu2 %v2518_v58, %s5579_s22 }
 0x65b   : > { %v8669_v56 = vmax.f32 %v4018_v1, 0.0  ;;  %v3275_v47 = vpop.permute.xlu0 %3274  ;;  %v3147_v63 = vpop.permute.xlu1 %3146 }
 0x65c   : > { %v3730_v28 = vsel %vm3704_vm12, %v3697_v25, %v3147_v63  ;;  %v8688_v51 = vpop.permute.xlu2 %3532  ;;  %v3617_v25 = vsel %vm1755_vm6, %v3585_v60, %v9843_v0  ;;  %v9849_v0 = vld [vmem:[#allocation160_spill] sm:$0xff] }
 0x65d   : > { %v4178_v35 = vrot.slane %v8669_v56, 4  ;;  %v4179_v36 = vrot.slane %v8669_v56, 6  ;;  %v3763_v19 = vsel %vm3737_vm13, %v3730_v28, %v3275_v47 }
 0x65e   : > { %v3796_v22 = vsel %vm3770_vm14, %v3763_v19, %v8609_v42  ;;  %v4124_v42 = vrot.slane %v8695_v10, 4 }
 0x65f   : > { %v4349_v41 = vmax.f32 %v4172_v59, %v4178_v35  ;;  %v4350_v3 = vmax.f32 %v4173_v50, %v4179_v36  ;;  %v9844_v35 = vld [vmem:[#allocation76_spill] sm:$0xff] }
 0x660   : > { %v3649_v36 = vsel %vm1821_vm7, %v3617_v25, %v9844_v35  ;;  %v2487_v35 = vld [vmem:[#allocation3 + $0x1a0] sm:$0xff] }
 0x661   : > { %v5440_v48 = vrot.slane %v4349_v41, 9  ;;  %v5441_v20 = vrot.slane %v4350_v3, 9  ;;  %3540 = vrot.lane.b32.xlu0 %v2550_v24, %s5580_s23  ;;  %3506 = vrot.lane.b32.xlu1 %v8690_v32, %s5580_s23  ;;  %v4176_v24 = vrot.slane %v4076_v9, 6  ;;  %v3681_v19 = vsel %vm1887_vm8, %v3649_v36, %v9845_v15 }
 0x662   : > { %v3969_v8 = vpop.f32.mrf.mxu1  ;;  %3252 = vrot.lane.b32.xlu2 %v2470_v16, %s5581_s24 }
 0x663   : > { %v4670_v6 = vmax.f32 %v4350_v3, %v5441_v20  ;;  %v3970_v23 = vadd.f32 %v8634_v12, %v3969_v8  ;;  %v3531_v45 = vpop.permute.xlu0 %3530  ;;  %v3497_v4 = vpop.permute.xlu1 %3496  ;;  %v4669_v46 = vmax.f32 %v4349_v41, %v5440_v48 }
 0x664   : > { %v3812_v39 = vsel %vm3803_vm15, %v3779_v17, %v3497_v4  ;;  %v3829_v57 = vsel %vm3803_vm15, %v3796_v22, %v3531_v45  ;;  %v8722_v34 = vpop.permute.xlu2 %3150  ;;  %v9846_v17 = vld [vmem:[#allocation135_spill] sm:$0xff] }
 0x665   : > { %v4890_v13 = vrot.slane %v4670_v6, 7  ;;  %v8704_v49 = vmax.f32 %v3970_v23, 0.0  ;;  %5382 = vmatmul.msk.f32.gmra.mxu1 %vm3849_vm0, %v3812_v39  ;;  %5399 = vmatmul.msk.f32.gmra.mxu2 %vm3849_vm0, %v3829_v57  ;;  %v4060_v57 = vmax.f32 %v3967_v44, 0.0 }
 0x667   : > { %v4891_v40 = vsel %vm4768_vm1, %v4890_v13, %v4669_v46  ;;  %v4130_v31 = vrot.slane %v8704_v49, 4  ;;  %v4131_v61 = vrot.slane %v8704_v49, 6  ;;  %v4126_v36 = vrot.slane %v4060_v57, 2 }
 0x668   : > { %v4892_v11 = vsel %vm4770_vm3, %v4890_v13, %v4891_v40  ;;  %v4020_v29 = vpop.f32.mrf.mxu2  ;;  %v2519_v40 = vld [vmem:[#allocation3 + $0x1a1] sm:$0xff]  ;;  %v4127_v44 = vrot.slane %v4060_v57, 4 }
 0x669   : > { %v4893_v5 = vsel %vm4772_vm4, %v4890_v13, %v4892_v11  ;;  %v4317_v1 = vmax.f32 %v4124_v42, %v4130_v31  ;;  %3380 = vrot.lane.b32.xlu0 %v2502_v2, %s5579_s22  ;;  %v4318_v53 = vmax.f32 %v4125_v55, %v4131_v61  ;;  %3124 = vrot.lane.b32.xlu1 %v8613_v26, %s5578_s21  ;;  %v4175_v26 = vrot.slane %v4076_v9, 4  ;;  %v9847_v2 = vld [vmem:[#allocation146_spill] sm:$0xff] }
 0x66a   : > { %v8720_v14 = vsel %vm4774_vm5, %v4890_v13, %v4893_v5  ;;  %v4021_v47 = vadd.f32 %v8634_v12, %v4020_v29  ;;  %3030 = vrot.lane.b32.xlu2 %v8602_v21, %s5577_s6  ;;  %v5548_v21 = vld [vmem:[#allocation3 + $0x138] sm:$0xff] }
 0x66b   : > { %v8729_v63 = vpop.permute.xlu0 %3148  ;;  %v3115_v58 = vpop.permute.xlu1 %3114  ;;  %v5408_v59 = vrot.slane %v4317_v1, 9  ;;  %v5409_v50 = vrot.slane %v4318_v53, 9  ;;  %v3602_v22 = vsel %vm1689_vm2, %v5548_v21, %v9846_v17 }
 0x66c   : > { %v4078_v28 = vmax.f32 %v4021_v47, 0.0  ;;  %v3714_v4 = vsel %vm3704_vm12, %v3681_v19, %v3115_v58  ;;  %v8750_v11 = vpop.permute.xlu2 %3500  ;;  %v3634_v5 = vsel %vm1755_vm6, %v3602_v22, %v9847_v2  ;;  %v2551_v58 = vld [vmem:[#allocation3 + $0x1a2] sm:$0xff] }
 0x66d   : > { %v4638_v37 = vmax.f32 %v4318_v53, %v5409_v50  ;;  %v4637_v48 = vmax.f32 %v4317_v1, %v5408_v59  ;;  %v3747_v61 = vsel %vm3737_vm13, %v3714_v4, %v8639_v27  ;;  %v3666_v38 = vsel %vm1821_vm7, %v3634_v5, %v9848_v43  ;;  %v2503_v5 = vld [vmem:[#allocation3 + $0xe1] sm:$0xff] }
 0x66e   : > { %v4180_v30 = vrot.slane %v4078_v28, 2  ;;  %v4181_v41 = vrot.slane %v4078_v28, 4  ;;  %v4182_v3 = vrot.slane %v4078_v28, 6  ;;  %v4351_v8 = vmax.f32 %v4076_v9, %v4078_v28 }
 0x66f   : > { %v4778_v20 = vrot.slane %v4638_v37, 7  ;;  %v3698_v25 = vsel %vm1887_vm8, %v3666_v38, %v9849_v0  ;;  %v4128_v37 = vrot.slane %v4060_v57, 6  ;;  %v9853_v38 = vld [vmem:[#allocation64_spill] sm:$0xff] }
 0x670   : > { %v4352_v6 = vmax.f32 %v4174_v52, %v4180_v30  ;;  %v4353_v23 = vmax.f32 %v4175_v26, %v4181_v41  ;;  %v4354_v45 = vmax.f32 %v4176_v24, %v4182_v3  ;;  %v5442_v13 = vrot.slane %v4351_v8, 9 }
 0x671   : > { %3158 = vrot.lane.b32.xlu0 %v8611_v62, %s5578_s21  ;;  %v4779_v39 = vsel %vm4768_vm1, %v4778_v20, %v4637_v48  ;;  %3508 = vrot.lane.b32.xlu1 %v2534_v33, %s5580_s23  ;;  %v3731_v30 = vsel %vm3704_vm12, %v3698_v25, %v8729_v63 }
 0x672   : > { %v4780_v46 = vsel %vm4770_vm3, %v4778_v20, %v4779_v39  ;;  %v5443_v16 = vrot.slane %v4352_v6, 9  ;;  %v5444_v62 = vrot.slane %v4353_v23, 9  ;;  %v5445_v55 = vrot.slane %v4354_v45, 9  ;;  %3414 = vrot.lane.b32.xlu2 %v2519_v40, %s5579_s22  ;;  %v9850_v40 = vld [vmem:[#allocation49_spill] sm:$0xff] }
 0x673   : > { %v3499_v54 = vpop.permute.xlu0 %3498  ;;  %v3371_v42 = vpop.permute.xlu1 %3370  ;;  %v4781_v31 = vsel %vm4772_vm4, %v4778_v20, %v4780_v46  ;;  %v4671_v59 = vmax.f32 %v4351_v8, %v5442_v13  ;;  %v3764_v39 = vsel %vm3737_vm13, %v3731_v30, %v8651_v7  ;;  %v2471_v46 = vld [vmem:[#allocation3 + $0xe0] sm:$0xff] }
 0x674   : > { %v3972_v29 = vpop.f32.mrf.mxu1  ;;  %v8757_v1 = vsel %vm4774_vm5, %v4778_v20, %v4781_v31  ;;  %v4672_v9 = vmax.f32 %v4352_v6, %v5443_v16  ;;  %v3780_v53 = vsel %vm3770_vm14, %v3747_v61, %v3371_v42  ;;  %v4674_v60 = vmax.f32 %v4354_v45, %v5445_v55  ;;  %v5549_v42 = vld [vmem:[#allocation3 + $0x78] sm:$0xff] }
 0x675   : > { %v3973_v47 = vadd.f32 %v8634_v12, %v3972_v29  ;;  %v3813_v27 = vsel %vm3803_vm15, %v3780_v53, %v3499_v54  ;;  %v4673_v28 = vmax.f32 %v4353_v23, %v5444_v62  ;;  %v3586_v31 = vsel %vm1689_vm2, %v5549_v42, %v9850_v40  ;;  %v9851_v29 = vld [vmem:[#allocation97_spill] sm:$0xff] }
 0x676   : > { %v4897_v50 = vrot.slane %v4672_v9, 7  ;;  %5383 = vmatmul.msk.f32.gmra.mxu1 %vm3849_vm0, %v3813_v27  ;;  %v4904_v52 = vrot.slane %v4674_v60, 7  ;;  %v3618_v7 = vsel %vm1755_vm6, %v3586_v31, %v9851_v29  ;;  %v9852_v9 = vld [vmem:[#allocation112_spill] sm:$0xff]  ;;  %v4171_v40 = vrot.slane %v8649_v18, 2  ;;  %v9859_v29 = vld [vmem:[#allocation19_spill] sm:$0xff] }
 0x677   : > { %v4062_v26 = vmax.f32 %v3973_v47, 0.0  ;;  %v3650_v53 = vsel %vm1821_vm7, %v3618_v7, %v9852_v9 }
 0x678   : > { %v4898_v24 = vsel %vm4768_vm1, %v4897_v50, %v4671_v59  ;;  %v4905_v3 = vsel %vm4768_vm1, %v4904_v52, %v4673_v28  ;;  %v3682_v60 = vsel %vm1887_vm8, %v3650_v53, %v9853_v38  ;;  %v9861_v53 = vld [vmem:[#allocation159_spill] sm:$0xff] }
 0x679   : > { %3542 = vrot.lane.b32.xlu0 %v2551_v58, %s5580_s23  ;;  %v4899_v41 = vsel %vm4770_vm3, %v4897_v50, %v4898_v24  ;;  %v4132_v15 = vrot.slane %v4062_v26, 2  ;;  %v4133_v19 = vrot.slane %v4062_v26, 4  ;;  %3286 = vrot.lane.b32.xlu1 %v2487_v35, %s5581_s24  ;;  %v4906_v20 = vsel %vm4770_vm3, %v4904_v52, %v4905_v3  ;;  %v2535_v3 = vld [vmem:[#allocation3 + $0xe2] sm:$0xff] }
 0x67a   : > { %v4900_v48 = vsel %vm4772_vm4, %v4897_v50, %v4899_v41  ;;  %v4134_v8 = vrot.slane %v4062_v26, 6  ;;  %v4319_v6 = vmax.f32 %v4060_v57, %v4062_v26  ;;  %v4907_v4 = vsel %vm4772_vm4, %v4904_v52, %v4906_v20  ;;  %v8786_v57 = vpop.permute.xlu2 %3118  ;;  %3254 = vrot.lane.b32.xlu2 %v2471_v46, %s5581_s24 }
 0x67b   : > { %v3117_v23 = vpop.permute.xlu0 %3116  ;;  %v3405_v45 = vpop.permute.xlu1 %3404  ;;  %v8778_v63 = vsel %vm4774_vm5, %v4897_v50, %v4900_v48  ;;  %v4320_v33 = vmax.f32 %v4126_v36, %v4132_v15  ;;  %v4321_v21 = vmax.f32 %v4127_v44, %v4133_v19  ;;  %v8782_v17 = vsel %vm4774_vm5, %v4904_v52, %v4907_v4  ;;  %v5550_v15 = vld [vmem:[#allocation3 + $0x140] sm:$0xff]  ;;  %v9854_v19 = vld [vmem:[#allocation156_spill] sm:$0xff] }
 0x67c   : > { %v4322_v22 = vmax.f32 %v4128_v37, %v4134_v8  ;;  %v5410_v13 = vrot.slane %v4319_v6, 9  ;;  %v3797_v54 = vsel %vm3770_vm14, %v3764_v39, %v3405_v45  ;;  %v3715_v0 = vsel %vm3704_vm12, %v3682_v60, %v3117_v23  ;;  %v9856_v45 = vld [vmem:[#allocation138_spill] sm:$0xff] }
 0x67d   : > { %v5411_v16 = vrot.slane %v4320_v33, 9  ;;  %v5412_v62 = vrot.slane %v4321_v21, 9  ;;  %v3830_v61 = vsel %vm3803_vm15, %v3797_v54, %v8688_v51  ;;  %v3603_v48 = vsel %vm1689_vm2, %v5550_v15, %v9854_v19 }
 0x67e   : > { %v5413_v55 = vrot.slane %v4322_v22, 9  ;;  %5400 = vmatmul.msk.f32.gmra.mxu2 %vm3849_vm0, %v3830_v61  ;;  %v4639_v47 = vmax.f32 %v4319_v6, %v5410_v13  ;;  %v9855_v6 = vld [vmem:[#allocation154_spill] sm:$0xff]  ;;  %v4177_v54 = vrot.slane %v8669_v56, 2  ;;  %v9858_v61 = vld [vmem:[#allocation33_spill] sm:$0xff] }
 0x67f   : > { %v4640_v2 = vmax.f32 %v4320_v33, %v5411_v16  ;;  %v4641_v51 = vmax.f32 %v4321_v21, %v5412_v62  ;;  %v3635_v23 = vsel %vm1755_vm6, %v3603_v48, %v9855_v6  ;;  %v9857_v33 = vld [vmem:[#allocation161_spill] sm:$0xff] }
 0x680   : > { %v4642_v43 = vmax.f32 %v4322_v22, %v5413_v55  ;;  %v3667_v4 = vsel %vm1821_vm7, %v3635_v23, %v9856_v45  ;;  %v4348_v31 = vmax.f32 %v4171_v40, %v4177_v54  ;;  %v5551_v55 = vld [vmem:[#allocation3 + $0x150] sm:$0xff] }
 0x681   : > { %3382 = vrot.lane.b32.xlu0 %v2503_v5, %s5579_s22  ;;  %v4785_v27 = vrot.slane %v4640_v2, 7  ;;  %3126 = vrot.lane.b32.xlu1 %v8690_v32, %s5578_s21  ;;  %v4023_v62 = vpop.f32.mrf.mxu2  ;;  %v5552_v2 = vld [vmem:[#allocation3 + $0x80] sm:$0xff]  ;;  %v9860_v5 = vld [vmem:[#allocation15_spill] sm:$0xff]  ;;  %v5553_v54 = vld [vmem:[#allocation3 + $0x90] sm:$0xff] }
 0x682   : > { %v4792_v58 = vrot.slane %v4642_v43, 7  ;;  %v3375_v30 = vpop.permute.xlu2 %3374  ;;  %v3587_v9 = vsel %vm1689_vm2, %v5552_v2, %v9860_v5 }
 0x683   : > { %v3373_v25 = vpop.permute.xlu0 %3372  ;;  %v3245_v59 = vpop.permute.xlu1 %3244  ;;  %v4786_v50 = vsel %vm4768_vm1, %v4785_v27, %v4639_v47  ;;  %v9862_v47 = vld [vmem:[#allocation95_spill] sm:$0xff] }
 0x684   : > { %v3748_v35 = vsel %vm3737_vm13, %v3715_v0, %v3245_v59  ;;  %v4787_v36 = vsel %vm4770_vm3, %v4785_v27, %v4786_v50  ;;  %v4793_v28 = vsel %vm4768_vm1, %v4792_v58, %v4641_v51  ;;  %v9863_v51 = vld [vmem:[#allocation132_spill] sm:$0xff]  ;;  %v5439_v0 = vrot.slane %v4348_v31, 9  ;;  %v3975_v45 = vpop.f32.mrf.mxu1 }
 0x685   : > { %v3781_v52 = vsel %vm3770_vm14, %v3748_v35, %v3373_v25  ;;  %v4788_v26 = vsel %vm4772_vm4, %v4785_v27, %v4787_v36  ;;  %v4794_v32 = vsel %vm4770_vm3, %v4792_v58, %v4793_v28  ;;  %v9864_v59 = vld [vmem:[#allocation124_spill] sm:$0xff] }
 0x686   : > { %v8813_v44 = vsel %vm4774_vm5, %v4785_v27, %v4788_v26  ;;  %v4795_v37 = vsel %vm4772_vm4, %v4792_v58, %v4794_v32  ;;  %v3814_v41 = vsel %vm3803_vm15, %v3781_v52, %v8750_v11  ;;  %v3699_v11 = vsel %vm1887_vm8, %v3667_v4, %v9857_v33  ;;  %v9865_v36 = vld [vmem:[#allocation20_spill] sm:$0xff] }
 0x687   : > { %v8817_v24 = vsel %vm4774_vm5, %v4792_v58, %v4795_v37  ;;  %5384 = vmatmul.msk.f32.gmra.mxu1 %vm3849_vm0, %v3814_v41  ;;  %v3732_v21 = vsel %vm3704_vm12, %v3699_v11, %v8722_v34  ;;  %v3604_v34 = vsel %vm1689_vm2, %v5551_v55, %v9858_v61  ;;  %v3619_v27 = vsel %vm1755_vm6, %v3587_v9, %v9862_v47  ;;  %v5554_v55 = vld [vmem:[#allocation3 + $0x158] sm:$0xff] }
 0x688   : > { %v3636_v7 = vsel %vm1755_vm6, %v3604_v34, %v9859_v29  ;;  %v3651_v50 = vsel %vm1821_vm7, %v3619_v27, %v9864_v59  ;;  %v4347_v52 = vmax.f32 %v8649_v18, %v8669_v56  ;;  %v4129_v26 = vrot.slane %v8704_v49, 2  ;;  %v9867_v61 = vld [vmem:[#allocation17_spill] sm:$0xff]  ;;  %v9868_v29 = vld [vmem:[#allocation63_spill] sm:$0xff] }
 0x689   : > { %3510 = vrot.lane.b32.xlu1 %v2535_v3, %s5580_s23  ;;  %v3668_v43 = vsel %vm1821_vm7, %v3636_v7, %v9861_v53  ;;  %v3683_v28 = vsel %vm1887_vm8, %v3651_v50, %v9865_v36  ;;  %v4123_v37 = vrot.slane %v8695_v10, 2  ;;  %v4668_v41 = vmax.f32 %v4348_v31, %v5439_v0  ;;  %v9869_v0 = vld [vmem:[#allocation137_spill] sm:$0xff] }
 0x68a   : > { %v3409_v39 = vpop.permute.xlu2 %3408  ;;  %v3700_v58 = vsel %vm1887_vm8, %v3668_v43, %v9863_v51  ;;  %v3716_v32 = vsel %vm3704_vm12, %v3683_v28, %v8786_v57  ;;  %v5438_v48 = vrot.slane %v4347_v52, 9  ;;  %v4024_v57 = vadd.f32 %v8634_v12, %v4023_v62  ;;  %v9870_v50 = vld [vmem:[#allocation89_spill] sm:$0xff] }
 0x68b   : > { %v3407_v20 = vpop.permute.xlu0 %3406  ;;  %v3279_v8 = vpop.permute.xlu1 %3278  ;;  %v4883_v23 = vrot.slane %v4668_v41, 7  ;;  %v3976_v62 = vadd.f32 %v8634_v12, %v3975_v45  ;;  %v3605_v34 = vsel %vm1689_vm2, %v5554_v55, %v9867_v61  ;;  %v9871_v41 = vld [vmem:[#allocation65_spill] sm:$0xff] }
 0x68c   : > { %v3765_v22 = vsel %vm3737_vm13, %v3732_v21, %v3279_v8  ;;  %v4667_v11 = vmax.f32 %v4347_v52, %v5438_v48  ;;  %v3637_v59 = vsel %vm1755_vm6, %v3605_v34, %v9869_v0 }
 0x68d   : > { %v3798_v16 = vsel %vm3770_vm14, %v3765_v22, %v3407_v20  ;;  %v4316_v20 = vmax.f32 %v4123_v37, %v4129_v26  ;;  %v4063_v28 = vmax.f32 %v3976_v62, 0.0 }
 0x68f   : > { %v5407_v21 = vrot.slane %v4316_v20, 9 }
 0x691   : > { %v4636_v31 = vmax.f32 %v4316_v20, %v5407_v21 }
 0x692   : > { %v8851_v25 = vpop.permute.xlu2 %3026 }
 0x693   : > { %v3247_v46 = vpop.permute.xlu0 %3246  ;;  %v3535_v13 = vpop.permute.xlu1 %3534  ;;  %v8895_v36 = vrot.slane %v4636_v31, 7 }
 0x694   : > { %v3831_v42 = vsel %vm3803_vm15, %v3798_v16, %v3535_v13  ;;  %v3749_v3 = vsel %vm3737_vm13, %v3716_v32, %v3247_v46  ;;  %v4079_v46 = vmax.f32 %v4024_v57, 0.0  ;;  %v9872_v57 = vld [vmem:[#allocation77_spill] sm:$0xff] }
 0x695   : > { %5401 = vmatmul.msk.f32.gmra.mxu2 %vm3849_vm0, %v3831_v42  ;;  %v3782_v18 = vsel %vm3770_vm14, %v3749_v3, %v3375_v30  ;;  %v4884_v30 = vsel %vm4768_vm1, %v4883_v23, %v4667_v11  ;;  %v9866_v42 = vld [vmem:[#allocation54_spill] sm:$0xff]  ;;  %v3669_v45 = vsel %vm1821_vm7, %v3637_v59, %v9872_v57  ;;  %v4135_v11 = vrot.slane %v4063_v28, 2  ;;  %v5555_v57 = vld [vmem:[#allocation3 + $0x98] sm:$0xff] }
 0x696   : > { %v3588_v40 = vsel %vm1689_vm2, %v5553_v54, %v9866_v42  ;;  %v4183_v53 = vrot.slane %v4079_v46, 2  ;;  %v4184_v43 = vrot.slane %v4079_v46, 4  ;;  %v3701_v21 = vsel %vm1887_vm8, %v3669_v45, %v8851_v25  ;;  %v9873_v45 = vld [vmem:[#allocation4_spill] sm:$0xff] }
 0x697   : > { %v3620_v7 = vsel %vm1755_vm6, %v3588_v40, %v9868_v29  ;;  %v4136_v25 = vrot.slane %v4063_v28, 4 }
 0x698   : > { %v8865_v15 = vpop.f32.mrf.mxu2 }
 0x69a   : > { %v8875_v22 = vpop.permute.xlu2 %3376 }
 0x69b   : > { %v3281_v38 = vpop.permute.xlu0 %3280  ;;  %v3153_v60 = vpop.permute.xlu1 %3152 }
 0x69c   : > { %v3733_v35 = vsel %vm3704_vm12, %v3700_v58, %v3153_v60 }
 0x69d   : > { %v3766_v19 = vsel %vm3737_vm13, %v3733_v35, %v3281_v38  ;;  %v4185_v38 = vrot.slane %v4079_v46, 6  ;;  %v3652_v35 = vsel %vm1821_vm7, %v3620_v7, %v9870_v50  ;;  %v4137_v7 = vrot.slane %v4063_v28, 6 }
 0x69e   : > { %v3799_v56 = vsel %vm3770_vm14, %v3766_v19, %v3409_v39  ;;  %v4315_v39 = vmax.f32 %v8695_v10, %v8704_v49  ;;  %v4885_v10 = vsel %vm4770_vm3, %v4883_v23, %v4884_v30  ;;  %v3684_v3 = vsel %vm1887_vm8, %v3652_v35, %v9871_v41 }
 0x69f   : > { %v4886_v52 = vsel %vm4772_vm4, %v4883_v23, %v4885_v10  ;;  %v4027_v10 = vadd.f32 %v8634_v12, %v8865_v15 }
 0x6a0   : > { %v5406_v9 = vrot.slane %v4315_v39, 9 }
 0x6a2   : > { %v8889_v60 = vpop.f32.mrf.mxu1  ;;  %v4635_v19 = vmax.f32 %v4315_v39, %v5406_v9  ;;  %v3411_v48 = vpop.permute.xlu2 %3410 }
 0x6a3   : > { %v3537_v8 = vpop.permute.xlu0 %3536  ;;  %v3503_v6 = vpop.permute.xlu1 %3502 }
 0x6a4   : > { %v3815_v4 = vsel %vm3803_vm15, %v3782_v18, %v3503_v6  ;;  %v3832_v33 = vsel %vm3803_vm15, %v3799_v56, %v3537_v8 }
 0x6a5   : > { %5385 = vmatmul.msk.f32.gmra.mxu1 %vm3849_vm0, %v3815_v4  ;;  %5402 = vmatmul.msk.f32.gmra.mxu2 %vm3849_vm0, %v3832_v33  ;;  %v4887_v4 = vsel %vm4774_vm5, %v4883_v23, %v4886_v52  ;;  %v4769_v33 = vsel %vm4768_vm1, %v8895_v36, %v4635_v19 }
 0x6a6   : > { %v4771_v19 = vsel %vm4770_vm3, %v8895_v36, %v4769_v33  ;;  %v3589_v33 = vsel %vm1689_vm2, %v5555_v57, %v9873_v45 }
 0x6a8   : > { %v4029_v13 = vpop.f32.mrf.mxu2 }
 0x6a9   : > { %v4030_v16 = vadd.f32 %v8634_v12, %v4029_v13 }
 0x6aa   : > { %v8925_v0 = vpop.permute.xlu2 %3028 }
 0x6ab   : > { %v4081_v49 = vmax.f32 %v4030_v16, 0.0  ;;  %v3249_v2 = vpop.permute.xlu0 %3248  ;;  %v3121_v5 = vpop.permute.xlu1 %3120 }
 0x6ac   : > { %v3717_v56 = vsel %vm3704_vm12, %v3684_v3, %v3121_v5 }
 0x6ad   : > { %v4189_v47 = vrot.slane %v4081_v49, 2  ;;  %v4190_v27 = vrot.slane %v4081_v49, 4  ;;  %v4191_v51 = vrot.slane %v4081_v49, 6  ;;  %v4355_v58 = vmax.f32 %v4079_v46, %v4081_v49 }
 0x6ae   : > { %v5582_v46 = vmov 1934713408   ;;  %v3750_v31 = vsel %vm3737_vm13, %v3717_v56, %v3249_v2 }
 0x6af   : > { %v4356_v26 = vmax.f32 %v4183_v53, %v4189_v47  ;;  %v4357_v32 = vmax.f32 %v4184_v43, %v4190_v27  ;;  %v4358_v37 = vmax.f32 %v4185_v38, %v4191_v51  ;;  %v5446_v20 = vrot.slane %v4355_v58, 9 }
 0x6b0   : > { %v5029_v13 = vunpack.c.l.s4 %v5582_v46  ;;  %v3783_v38 = vsel %vm3770_vm14, %v3750_v31, %v8875_v22  ;;  %v9875_v46 = vld [vmem:[#allocation61_spill] sm:$0xff] }
 0x6b1   : > { %v5447_v8 = vrot.slane %v4356_v26, 9  ;;  %v5448_v6 = vrot.slane %v4357_v32, 9  ;;  %v5449_v18 = vrot.slane %v4358_v37, 9  ;;  %v4675_v42 = vmax.f32 %v4355_v58, %v5446_v20  ;;  %v9877_v31 = vld [vmem:[#allocation109_spill] sm:$0xff] }
 0x6b2   : > { %v8916_v2 = vunpack.c.0.s8 %v5029_v13  ;;  %v3621_v13 = vsel %vm1755_vm6, %v3589_v33, %v9875_v46 }
 0x6b3   : > { %v4676_v30 = vmax.f32 %v4356_v26, %v5447_v8  ;;  %v4678_v39 = vmax.f32 %v4358_v37, %v5449_v18  ;;  %v3283_v16 = vpop.permute.xlu0 %3282  ;;  %v3155_v54 = vpop.permute.xlu1 %3154  ;;  %v4677_v40 = vmax.f32 %v4357_v32, %v5448_v6 }
 0x6b4   : > { %v3734_v62 = vsel %vm3704_vm12, %v3701_v21, %v3155_v54  ;;  %v3981_v23 = vpop.f32.mrf.mxu1 }
 0x6b5   : > { %v4911_v55 = vrot.slane %v4676_v30, 7  ;;  %v4918_v61 = vrot.slane %v4678_v39, 7  ;;  %v3767_v34 = vsel %vm3737_vm13, %v3734_v62, %v3283_v16  ;;  %v3982_v29 = vadd.f32 %v8634_v12, %v3981_v23  ;;  %v9874_v39 = vld [vmem:[#allocation75_spill] sm:$0xff] }
 0x6b6   : > { %v3800_v47 = vsel %vm3770_vm14, %v3767_v34, %v3411_v48  ;;  %v4080_v16 = vmax.f32 %v4027_v10, 0.0  ;;  %v3653_v62 = vsel %vm1821_vm7, %v3621_v13, %v9877_v31  ;;  %v4773_v23 = vsel %vm4772_vm4, %v8895_v36, %v4771_v19 }
 0x6b7   : > { %v4912_v49 = vsel %vm4768_vm1, %v4911_v55, %v4675_v42  ;;  %v4919_v5 = vsel %vm4768_vm1, %v4918_v61, %v4677_v40  ;;  %v4065_v9 = vmax.f32 %v3982_v29, 0.0  ;;  %v9876_v42 = vld [vmem:[#allocation36_spill] sm:$0xff]  ;;  %v3979_v29 = vadd.f32 %v8634_v12, %v8889_v60 }
 0x6b8   : > { %v4913_v53 = vsel %vm4770_vm3, %v4911_v55, %v4912_v49  ;;  %v4920_v43 = vsel %vm4770_vm3, %v4918_v61, %v4919_v5  ;;  %v9879_v49 = vld [vmem:[#allocation98_spill] sm:$0xff]  ;;  %v4188_v60 = vrot.slane %v4080_v16, 6 }
 0x6b9   : > { %v4914_v27 = vsel %vm4772_vm4, %v4911_v55, %v4913_v53  ;;  %v4921_v15 = vsel %vm4772_vm4, %v4918_v61, %v4920_v43  ;;  %v4141_v51 = vrot.slane %v4065_v9, 2  ;;  %v4142_v58 = vrot.slane %v4065_v9, 4 }
 0x6ba   : > { %v4915_v59 = vsel %vm4774_vm5, %v4911_v55, %v4914_v27  ;;  %v4922_v50 = vsel %vm4774_vm5, %v4918_v61, %v4921_v15  ;;  %v4143_v35 = vrot.slane %v4065_v9, 6  ;;  %v4323_v52 = vmax.f32 %v4063_v28, %v4065_v9  ;;  %v9878_v61 = vld [vmem:[#allocation139_spill] sm:$0xff] }
 0x6bb   : > { %v5042_v26 = vrot.slane %v4915_v59, 4  ;;  %v5074_v32 = vrot.slane %v4922_v50, 4  ;;  %v4324_v37 = vmax.f32 %v4135_v11, %v4141_v51  ;;  %v4325_v22 = vmax.f32 %v4136_v25, %v4142_v58  ;;  %v3539_v41 = vpop.permute.xlu0 %3538  ;;  %v3505_v3 = vpop.permute.xlu1 %3504 }
 0x6bc   : > { %v4326_v48 = vmax.f32 %v4137_v7, %v4143_v35  ;;  %v3816_v20 = vsel %vm3803_vm15, %v3783_v38, %v3505_v3  ;;  %v3833_v8 = vsel %vm3803_vm15, %v3800_v47, %v3539_v41  ;;  %v5414_v28 = vrot.slane %v4323_v52, 9 }
 0x6bd   : > { %v5043_v6 = vsel %vm5026_vm9, %v5042_v26, %v4887_v4  ;;  %v8936_v18 = vsel %vm5026_vm9, %v5074_v32, %v8720_v14  ;;  %v5415_v56 = vrot.slane %v4324_v37, 9  ;;  %5386 = vmatmul.msk.f32.gmra.mxu1 %vm3849_vm0, %v3816_v20  ;;  %5403 = vmatmul.msk.f32.gmra.mxu2 %vm3849_vm0, %v3833_v8  ;;  %v5416_v21 = vrot.slane %v4325_v22, 9  ;;  %v5556_v4 = vld [vmem:[#allocation3 + $0x168] sm:$0xff]  ;;  %v8968_v32 = vpop.permute.xlu2 %3378 }
 0x6be   : > { %v8943_v11 = vperm.slane %v5043_v6, %v8916_v2  ;;  %v5417_v30 = vrot.slane %v4326_v48, 9  ;;  %v3606_v14 = vsel %vm1689_vm2, %v5556_v4, %v9874_v39  ;;  %v4643_v25 = vmax.f32 %v4323_v52, %v5414_v28 }
 0x6bf   : > { %v4644_v54 = vmax.f32 %v4324_v37, %v5415_v56  ;;  %v3638_v40 = vsel %vm1755_vm6, %v3606_v14, %v9876_v42  ;;  %v3685_v5 = vsel %vm1887_vm8, %v3653_v62, %v9879_v49  ;;  %v4645_v9 = vmax.f32 %v4325_v22, %v5416_v21 }
 0x6c0   : > { %5162 = vst [vmem:[#allocation1 + $0x2] ss:$4 sm:$0xff] %v8943_v11  ;;  %v4646_v55 = vmax.f32 %v4326_v48, %v5417_v30  ;;  %v3670_v34 = vsel %vm1821_vm7, %v3638_v40, %v9878_v61  ;;  %v4775_v38 = vsel %vm4774_vm5, %v8895_v36, %v4773_v23  ;;  %v4186_v47 = vrot.slane %v4080_v16, 2 }
 0x6c1   : > { %v4799_v7 = vrot.slane %v4644_v54, 7  ;;  %v4032_v10 = vpop.f32.mrf.mxu2  ;;  %v4187_v27 = vrot.slane %v4080_v16, 4  ;;  %v4064_v26 = vmax.f32 %v3979_v29, 0.0 }
 0x6c2   : > { %v4806_v53 = vrot.slane %v4646_v55, 7  ;;  %v4033_v43 = vadd.f32 %v8634_v12, %v4032_v10  ;;  %v3702_v55 = vsel %vm1887_vm8, %v3670_v34, %v8925_v0 }
 0x6c3   : > { %v4800_v15 = vsel %vm4768_vm1, %v4799_v7, %v4643_v25  ;;  %v3251_v51 = vpop.permute.xlu0 %3250  ;;  %v3123_v58 = vpop.permute.xlu1 %3122  ;;  %v4138_v21 = vrot.slane %v4064_v26, 2  ;;  %v4140_v23 = vrot.slane %v4064_v26, 6 }
 0x6c4   : > { %v4801_v59 = vsel %vm4770_vm3, %v4799_v7, %v4800_v15  ;;  %v4807_v50 = vsel %vm4768_vm1, %v4806_v53, %v4645_v9  ;;  %v4082_v35 = vmax.f32 %v4033_v43, 0.0  ;;  %v3984_v52 = vpop.f32.mrf.mxu1 }
 0x6c5   : > { %v4802_v37 = vsel %vm4772_vm4, %v4799_v7, %v4801_v59  ;;  %v4808_v36 = vsel %vm4770_vm3, %v4806_v53, %v4807_v50  ;;  %v3985_v22 = vadd.f32 %v8634_v12, %v3984_v52  ;;  %v3718_v12 = vsel %vm3704_vm12, %v3685_v5, %v3123_v58  ;;  %v3413_v43 = vpop.permute.xlu2 %3412 }
 0x6c6   : > { %v4803_v41 = vsel %vm4774_vm5, %v4799_v7, %v4802_v37  ;;  %v4809_v3 = vsel %vm4772_vm4, %v4806_v53, %v4808_v36  ;;  %v4192_v19 = vrot.slane %v4082_v35, 2  ;;  %v4193_v48 = vrot.slane %v4082_v35, 4 }
 0x6c7   : > { %v4810_v20 = vsel %vm4774_vm5, %v4806_v53, %v4809_v3  ;;  %v5025_v8 = vrot.slane %v4803_v41, 4  ;;  %v4194_v6 = vrot.slane %v4082_v35, 6  ;;  %v4359_v28 = vmax.f32 %v4080_v16, %v4082_v35 }
 0x6c8   : > { %v5058_v56 = vrot.slane %v4810_v20, 4  ;;  %v4360_v57 = vmax.f32 %v4186_v47, %v4192_v19  ;;  %v4361_v45 = vmax.f32 %v4187_v27, %v4193_v48  ;;  %v4066_v33 = vmax.f32 %v3985_v22, 0.0 }
 0x6c9   : > { %v5027_v30 = vsel %vm5026_vm9, %v5025_v8, %v4775_v38  ;;  %v4362_v4 = vmax.f32 %v4188_v60, %v4194_v6  ;;  %v5450_v46 = vrot.slane %v4359_v28, 9  ;;  %v4139_v16 = vrot.slane %v4064_v26, 4 }
 0x6ca   : > { %v8979_v39 = vperm.slane %v5027_v30, %v8916_v2  ;;  %v8983_v14 = vsel %vm5026_vm9, %v5058_v56, %v8757_v1  ;;  %v5451_v13 = vrot.slane %v4360_v57, 9  ;;  %v5452_v54 = vrot.slane %v4361_v45, 9 }
 0x6cb   : > { %v5453_v42 = vrot.slane %v4362_v4, 9  ;;  %v4144_v40 = vrot.slane %v4066_v33, 2  ;;  %v3285_v31 = vpop.permute.xlu0 %3284  ;;  %v3157_v62 = vpop.permute.xlu1 %3156  ;;  %v4145_v29 = vrot.slane %v4066_v33, 4  ;;  %v3751_v1 = vsel %vm3737_vm13, %v3718_v12, %v3251_v51 }
 0x6cc   : > { %5158 = vst [vmem:[#allocation1] ss:$4 sm:$0xff] %v8979_v39  ;;  %v4680_v61 = vmax.f32 %v4360_v57, %v5451_v13  ;;  %v4146_v7 = vrot.slane %v4066_v33, 6  ;;  %v4327_v10 = vmax.f32 %v4064_v26, %v4066_v33  ;;  %v4679_v49 = vmax.f32 %v4359_v28, %v5450_v46 }
 0x6cd   : > { %v4682_v25 = vmax.f32 %v4362_v4, %v5453_v42  ;;  %v4328_v9 = vmax.f32 %v4138_v21, %v4144_v40  ;;  %v4329_v53 = vmax.f32 %v4139_v16, %v4145_v29  ;;  %v4681_v38 = vmax.f32 %v4361_v45, %v5452_v54  ;;  %v3253_v54 = vpop.permute.xlu2 %3252 }
 0x6ce   : > { %v4925_v5 = vrot.slane %v4680_v61, 7  ;;  %v4330_v27 = vmax.f32 %v4140_v23, %v4146_v7  ;;  %v5418_v15 = vrot.slane %v4327_v10, 9  ;;  %v3735_v60 = vsel %vm3704_vm12, %v3702_v55, %v3157_v62  ;;  %v9880_v62 = vld [vmem:[#allocation28_spill] sm:$0xff]  ;;  %v9882_v7 = vld [vmem:[#allocation51_spill] sm:$0xff] }
 0x6cf   : > { %v4932_v47 = vrot.slane %v4682_v25, 7  ;;  %v5419_v34 = vrot.slane %v4328_v9, 9  ;;  %v5420_v58 = vrot.slane %v4329_v53, 9  ;;  %v3768_v19 = vsel %vm3737_vm13, %v3735_v60, %v3285_v31  ;;  %v5557_v31 = vld [vmem:[#allocation3 + $0xa8] sm:$0xff]  ;;  %v9881_v61 = vld [vmem:[#allocation56_spill] sm:$0xff] }
 0x6d0   : > { %v4926_v0 = vsel %vm4768_vm1, %v4925_v5, %v4679_v49  ;;  %v5421_v50 = vrot.slane %v4330_v27, 9  ;;  %v4647_v35 = vmax.f32 %v4327_v10, %v5418_v15  ;;  %v3784_v56 = vsel %vm3770_vm14, %v3751_v1, %v8968_v32  ;;  %v9884_v60 = vld [vmem:[#allocation87_spill] sm:$0xff] }
 0x6d1   : > { %v4927_v59 = vsel %vm4770_vm3, %v4925_v5, %v4926_v0  ;;  %v4933_v51 = vsel %vm4768_vm1, %v4932_v47, %v4681_v38  ;;  %v4648_v37 = vmax.f32 %v4328_v9, %v5419_v34  ;;  %v4649_v36 = vmax.f32 %v4329_v53, %v5420_v58  ;;  %v9883_v9 = vld [vmem:[#allocation125_spill] sm:$0xff]  ;;  %v5558_v58 = vld [vmem:[#allocation3 + $0x170] sm:$0xff] }
 0x6d2   : > { %v4928_v52 = vsel %vm4772_vm4, %v4925_v5, %v4927_v59  ;;  %v4934_v26 = vsel %vm4770_vm3, %v4932_v47, %v4933_v51  ;;  %v4650_v3 = vmax.f32 %v4330_v27, %v5421_v50  ;;  %v3801_v21 = vsel %vm3770_vm14, %v3768_v19, %v3413_v43  ;;  %v9885_v51 = vld [vmem:[#allocation48_spill] sm:$0xff]  ;;  %v9886_v50 = vld [vmem:[#allocation22_spill] sm:$0xff] }
 0x6d3   : > { %v4929_v22 = vsel %vm4774_vm5, %v4925_v5, %v4928_v52  ;;  %v4935_v41 = vsel %vm4772_vm4, %v4932_v47, %v4934_v26  ;;  %v3541_v48 = vpop.permute.xlu0 %3540  ;;  %v3507_v20 = vpop.permute.xlu1 %3506  ;;  %v4813_v28 = vrot.slane %v4648_v37, 7  ;;  %v3607_v59 = vsel %vm1689_vm2, %v5558_v58, %v9884_v60 }
 0x6d4   : > { %v4936_v8 = vsel %vm4774_vm5, %v4932_v47, %v4935_v41  ;;  %v5106_v6 = vrot.slane %v4929_v22, 4  ;;  %v4820_v45 = vrot.slane %v4650_v3, 7  ;;  %v3817_v33 = vsel %vm3803_vm15, %v3784_v56, %v3507_v20  ;;  %v9887_v20 = vld [vmem:[#allocation134_spill] sm:$0xff] }
 0x6d5   : > { %v5138_v57 = vrot.slane %v4936_v8, 4  ;;  %v4814_v4 = vsel %vm4768_vm1, %v4813_v28, %v4647_v35  ;;  %5387 = vmatmul.msk.f32.gmra.mxu1 %vm3849_vm0, %v3817_v33  ;;  %v3834_v12 = vsel %vm3803_vm15, %v3801_v21, %v3541_v48  ;;  %v3031_v27 = vpop.permute.xlu2 %3030  ;;  %v5559_v48 = vld [vmem:[#allocation3 + $0xb0] sm:$0xff]  ;;  %v9889_v56 = vld [vmem:[#allocation90_spill] sm:$0xff]  ;;  %v9890_v33 = vld [vmem:[#allocation147_spill] sm:$0xff] }
 0x6d6   : > { %v9005_v30 = vsel %vm5026_vm9, %v5106_v6, %v8778_v63  ;;  %v4815_v32 = vsel %vm4770_vm3, %v4813_v28, %v4814_v4  ;;  %v4821_v13 = vsel %vm4768_vm1, %v4820_v45, %v4649_v36  ;;  %5404 = vmatmul.msk.f32.gmra.mxu2 %vm3849_vm0, %v3834_v12  ;;  %v3591_v8 = vsel %vm1689_vm2, %v5559_v48, %v9887_v20  ;;  %v9888_v6 = vld [vmem:[#allocation60_spill] sm:$0xff] }
 0x6d7   : > { %v9012_v46 = vsel %vm5026_vm9, %v5138_v57, %v8782_v17  ;;  %v4816_v16 = vsel %vm4772_vm4, %v4813_v28, %v4815_v32  ;;  %v4822_v63 = vsel %vm4770_vm3, %v4820_v45, %v4821_v13  ;;  %v3590_v17 = vsel %vm1689_vm2, %v5557_v31, %v9880_v62 }
 0x6d8   : > { %v4817_v42 = vsel %vm4774_vm5, %v4813_v28, %v4816_v16  ;;  %v4823_v40 = vsel %vm4772_vm4, %v4820_v45, %v4822_v63  ;;  %v3622_v29 = vsel %vm1755_vm6, %v3590_v17, %v9881_v61  ;;  %v3623_v28 = vsel %vm1755_vm6, %v3591_v8, %v9888_v6 }
 0x6d9   : > { %v4824_v23 = vsel %vm4774_vm5, %v4820_v45, %v4823_v40  ;;  %v5090_v55 = vrot.slane %v4817_v42, 4  ;;  %v3654_v10 = vsel %vm1821_vm7, %v3622_v29, %v9882_v7  ;;  %v3655_v57 = vsel %vm1821_vm7, %v3623_v28, %v9889_v56  ;;  %v9068_v42 = vpop.f32.mrf.mxu2 }
 0x6da   : > { %v5122_v25 = vrot.slane %v4824_v23, 4  ;;  %v3686_v53 = vsel %vm1887_vm8, %v3654_v10, %v9883_v9  ;;  %v3687_v21 = vsel %vm1887_vm8, %v3655_v57, %v9890_v33  ;;  %v9077_v23 = vld [vmem:[%s9322_s4] ss:$0 sm:$0xff] }
 0x6db   : > { %v3381_v1 = vpop.permute.xlu0 %3380  ;;  %v9030_v49 = vsel %vm5026_vm9, %v5090_v55, %v8813_v44  ;;  %v3125_v5 = vpop.permute.xlu1 %3124 }
 0x6dc   : > { %v9036_v43 = vsel %vm5026_vm9, %v5122_v25, %v8817_v24  ;;  %v3719_v38 = vsel %vm3704_vm12, %v3686_v53, %v3125_v5  ;;  %v3639_v24 = vsel %vm1755_vm6, %v3607_v59, %v9885_v51 }
 0x6dd   : > { %v3752_v47 = vsel %vm3737_vm13, %v3719_v38, %v3253_v54  ;;  %v3671_v35 = vsel %vm1821_vm7, %v3639_v24, %v9886_v50  ;;  %v3415_v36 = vpop.permute.xlu2 %3414 }
 0x6de   : > { %v3785_v34 = vsel %vm3770_vm14, %v3752_v47, %v3381_v1  ;;  %v3703_v52 = vsel %vm1887_vm8, %v3671_v35, %v3031_v27 }
 0x6e2   : > { %v9070_v31 = vpop.f32.mrf.mxu1 }
 0x6e3   : > { %v3159_v15 = vpop.permute.xlu0 %3158  ;;  %v3509_v0 = vpop.permute.xlu1 %3508 }
 0x6e4   : > { %v3818_v44 = vsel %vm3803_vm15, %v3785_v34, %v3509_v0  ;;  %v3736_v26 = vsel %vm3704_vm12, %v3703_v52, %v3159_v15 }
 0x6e5   : > { %5388 = vmatmul.msk.f32.gmra.mxu1 %vm3849_vm0, %v3818_v44  ;;  %v3255_v12 = vpop.permute.xlu2 %3254 }
 0x6e8   : > { %v4038_v40 = vpop.f32.mrf.mxu2 }
 0x6e9   : > { %v4039_v55 = vadd.f32 %v9077_v23, %v4038_v40 }
 0x6eb   : > { %v3287_v37 = vpop.permute.xlu1 %3286  ;;  %v3543_v41 = vpop.permute.xlu0 %3542  ;;  %v4084_v61 = vmax.f32 %v4039_v55, 0.0 }
 0x6ec   : > { %v3769_v22 = vsel %vm3737_vm13, %v3736_v26, %v3287_v37 }
 0x6ed   : > { %v3802_v3 = vsel %vm3770_vm14, %v3769_v22, %v3415_v36  ;;  %v4198_v10 = vrot.slane %v4084_v61, 2  ;;  %v4199_v5 = vrot.slane %v4084_v61, 4  ;;  %v4200_v9 = vrot.slane %v4084_v61, 6 }
 0x6ee   : > { %v3835_v19 = vsel %vm3803_vm15, %v3802_v3, %v3543_v41 }
 0x6ef   : > { %5405 = vmatmul.msk.f32.gmra.mxu2 %vm3849_vm0, %v3835_v19 }
 0x6f3   : > { %v3127_v45 = vpop.permute.xlu1 %3126  ;;  %v3383_v13 = vpop.permute.xlu0 %3382 }
 0x6f4   : > { %v3720_v4 = vsel %vm3704_vm12, %v3687_v21, %v3127_v45  ;;  %v3990_v17 = vpop.f32.mrf.mxu1 }
 0x6f5   : > { %v3753_v32 = vsel %vm3737_vm13, %v3720_v4, %v3255_v12  ;;  %v3991_v15 = vadd.f32 %v9077_v23, %v3990_v17 }
 0x6f6   : > { %v3786_v63 = vsel %vm3770_vm14, %v3753_v32, %v3383_v13 }
 0x6f7   : > { %v4068_v24 = vmax.f32 %v3991_v15, 0.0 }
 0x6f9   : > { %v4150_v19 = vrot.slane %v4068_v24, 2  ;;  %v4151_v48 = vrot.slane %v4068_v24, 4  ;;  %v4152_v20 = vrot.slane %v4068_v24, 6 }
 0x6fb   : > { %v3511_v16 = vpop.permute.xlu1 %3510 }
 0x6fc   : > { %v3819_v54 = vsel %vm3803_vm15, %v3786_v63, %v3511_v16 }
 0x6fd   : > { %5389 = vmatmul.msk.f32.gmra.mxu1 %vm3849_vm0, %v3819_v54 }
 0x701   : > { %v9072_v62 = vpop.f32.mrf.mxu2 }
 0x704   : > { %v9081_v1 = vpop.f32.mrf.mxu1 }
 0x718   : > { %v4044_v29 = vpop.f32.mrf.mxu2 }
 0x719   : > { %v4045_v25 = vadd.f32 %v9077_v23, %v4044_v29 }
 0x71b   : > { %v4086_v7 = vmax.f32 %v4045_v25, 0.0 }
 0x71d   : > { %v4204_v53 = vrot.slane %v4086_v7, 2  ;;  %v4205_v38 = vrot.slane %v4086_v7, 4  ;;  %v4206_v47 = vrot.slane %v4086_v7, 6  ;;  %v4367_v27 = vmax.f32 %v4084_v61, %v4086_v7 }
 0x71f   : > { %v4368_v0 = vmax.f32 %v4198_v10, %v4204_v53  ;;  %v4369_v34 = vmax.f32 %v4199_v5, %v4205_v38  ;;  %v4370_v44 = vmax.f32 %v4200_v9, %v4206_v47  ;;  %v5458_v58 = vrot.slane %v4367_v27, 9 }
 0x721   : > { %v5459_v60 = vrot.slane %v4368_v0, 9  ;;  %v5460_v59 = vrot.slane %v4369_v34, 9  ;;  %v5461_v51 = vrot.slane %v4370_v44, 9  ;;  %v4687_v37 = vmax.f32 %v4367_v27, %v5458_v58 }
 0x722   : > { %v3996_v50 = vpop.f32.mrf.mxu1  ;;  %v4042_v58 = vadd.f32 %v9077_v23, %v9072_v62  ;;  %v3988_v62 = vadd.f32 %v9077_v23, %v9070_v31 }
 0x723   : > { %v4688_v35 = vmax.f32 %v4368_v0, %v5459_v60  ;;  %v4690_v52 = vmax.f32 %v4370_v44, %v5461_v51  ;;  %v3997_v26 = vadd.f32 %v9077_v23, %v3996_v50  ;;  %v4689_v36 = vmax.f32 %v4369_v34, %v5460_v59 }
 0x724   : > { %v4036_v60 = vadd.f32 %v9077_v23, %v9068_v42  ;;  %v9113_v51 = vmax.f32 %v4042_v58, 0.0 }
 0x725   : > { %v4953_v22 = vrot.slane %v4688_v35, 7  ;;  %v4960_v41 = vrot.slane %v4690_v52, 7  ;;  %v4070_v3 = vmax.f32 %v3997_v26, 0.0  ;;  %v3994_v35 = vadd.f32 %v9077_v23, %v9081_v1 }
 0x726   : > { %v4201_v50 = vrot.slane %v9113_v51, 2 }
 0x727   : > { %v4954_v8 = vsel %vm4768_vm1, %v4953_v22, %v4687_v37  ;;  %v4961_v6 = vsel %vm4768_vm1, %v4960_v41, %v4689_v36  ;;  %v4156_v28 = vrot.slane %v4070_v3, 2  ;;  %v4157_v56 = vrot.slane %v4070_v3, 4 }
 0x728   : > { %v4955_v57 = vsel %vm4770_vm3, %v4953_v22, %v4954_v8  ;;  %v4962_v45 = vsel %vm4770_vm3, %v4960_v41, %v4961_v6  ;;  %v4158_v33 = vrot.slane %v4070_v3, 6  ;;  %v4335_v21 = vmax.f32 %v4068_v24, %v4070_v3  ;;  %v4047_v59 = vpop.f32.mrf.mxu2 }
 0x729   : > { %v4956_v4 = vsel %vm4772_vm4, %v4953_v22, %v4955_v57  ;;  %v4963_v12 = vsel %vm4772_vm4, %v4960_v41, %v4962_v45  ;;  %v4336_v32 = vmax.f32 %v4150_v19, %v4156_v28  ;;  %v4337_v13 = vmax.f32 %v4151_v48, %v4157_v56 }
 0x72a   : > { %v9092_v16 = vsel %vm4774_vm5, %v4953_v22, %v4956_v4  ;;  %v9095_v63 = vsel %vm4774_vm5, %v4960_v41, %v4963_v12  ;;  %v4338_v54 = vmax.f32 %v4152_v20, %v4158_v33  ;;  %v5426_v40 = vrot.slane %v4335_v21, 9 }
 0x72b   : > { %v5427_v17 = vrot.slane %v4336_v32, 9  ;;  %v5428_v55 = vrot.slane %v4337_v13, 9  ;;  %v9115_v24 = vmax.f32 %v4036_v60, 0.0  ;;  %v9125_v42 = vmax.f32 %v3994_v35, 0.0 }
 0x72c   : > { %v5429_v61 = vrot.slane %v4338_v54, 9  ;;  %v4655_v7 = vmax.f32 %v4335_v21, %v5426_v40  ;;  %v9127_v22 = vmax.f32 %v3988_v62, 0.0  ;;  %v4048_v41 = vadd.f32 %v9077_v23, %v4047_v59 }
 0x72d   : > { %v4656_v29 = vmax.f32 %v4336_v32, %v5427_v17  ;;  %v4657_v5 = vmax.f32 %v4337_v13, %v5428_v55  ;;  %v4195_v52 = vrot.slane %v9115_v24, 2  ;;  %v4153_v19 = vrot.slane %v9125_v42, 2 }
 0x72e   : > { %v4658_v25 = vmax.f32 %v4338_v54, %v5429_v61  ;;  %v4363_v1 = vmax.f32 %v9115_v24, %v9113_v51  ;;  %v4147_v20 = vrot.slane %v9127_v22, 2  ;;  %v9134_v8 = vmax.f32 %v4048_v41, 0.0 }
 0x72f   : > { %v4841_v10 = vrot.slane %v4656_v29, 7  ;;  %v4364_v36 = vmax.f32 %v4195_v52, %v4201_v50  ;;  %v4331_v17 = vmax.f32 %v9127_v22, %v9125_v42 }
 0x730   : > { %v4848_v9 = vrot.slane %v4658_v25, 7  ;;  %v4332_v56 = vmax.f32 %v4147_v20, %v4153_v19  ;;  %v5454_v45 = vrot.slane %v4363_v1, 9  ;;  %v4207_v33 = vrot.slane %v9134_v8, 2 }
 0x731   : > { %v4842_v53 = vsel %vm4768_vm1, %v4841_v10, %v4655_v7  ;;  %v5455_v3 = vrot.slane %v4364_v36, 9  ;;  %v4155_v19 = vrot.slane %v9125_v42, 6 }
 0x732   : > { %v4843_v38 = vsel %vm4770_vm3, %v4841_v10, %v4842_v53  ;;  %v4849_v47 = vsel %vm4768_vm1, %v4848_v9, %v4657_v5  ;;  %v5423_v13 = vrot.slane %v4332_v56, 9  ;;  %v4683_v40 = vmax.f32 %v4363_v1, %v5454_v45 }
 0x733   : > { %v4844_v27 = vsel %vm4772_vm4, %v4841_v10, %v4843_v38  ;;  %v4850_v15 = vsel %vm4770_vm3, %v4848_v9, %v4849_v47  ;;  %v4684_v28 = vmax.f32 %v4364_v36, %v5455_v3  ;;  %v4197_v53 = vrot.slane %v9115_v24, 6 }
 0x734   : > { %v9103_v0 = vsel %vm4774_vm5, %v4841_v10, %v4844_v27  ;;  %v4851_v34 = vsel %vm4772_vm4, %v4848_v9, %v4850_v15  ;;  %v4652_v5 = vmax.f32 %v4332_v56, %v5423_v13  ;;  %v4149_v38 = vrot.slane %v9127_v22, 6 }
 0x735   : > { %v9107_v44 = vsel %vm4774_vm5, %v4848_v9, %v4851_v34  ;;  %v4939_v12 = vrot.slane %v4684_v28, 7  ;;  %v5422_v47 = vrot.slane %v4331_v17, 9 }
 0x736   : > { %v4827_v62 = vrot.slane %v4652_v5, 7 }
 0x737   : > { %v4940_v25 = vsel %vm4768_vm1, %v4939_v12, %v4683_v40  ;;  %v4651_v20 = vmax.f32 %v4331_v17, %v5422_v47 }
 0x738   : > { %v4941_v15 = vsel %vm4770_vm3, %v4939_v12, %v4940_v25  ;;  %v4334_v25 = vmax.f32 %v4149_v38, %v4155_v19 }
 0x739   : > { %v4942_v3 = vsel %vm4772_vm4, %v4939_v12, %v4941_v15 }
 0x73a   : > { %v3999_v37 = vpop.f32.mrf.mxu1  ;;  %v4943_v13 = vsel %vm4774_vm5, %v4939_v12, %v4942_v3 }
 0x73b   : > { %v4000_v32 = vadd.f32 %v9077_v23, %v3999_v37  ;;  %v4209_v37 = vrot.slane %v9134_v8, 6 }
 0x73d   : > { %v4071_v7 = vmax.f32 %v4000_v32, 0.0  ;;  %v4203_v32 = vrot.slane %v9113_v51, 6 }
 0x73f   : > { %v4159_v59 = vrot.slane %v4071_v7, 2  ;;  %v4161_v36 = vrot.slane %v4071_v7, 6 }
 0x740   : > { %v9121_v26 = vpop.f32.mrf.mxu2 }
 0x741   : > { %v4051_v3 = vadd.f32 %v9077_v23, %v9121_v26 }
 0x752   : > { %v9136_v31 = vpop.f32.mrf.mxu1 }
 0x759   : > { %v4053_v48 = vpop.f32.mrf.mxu2 }
 0x75a   : > { %v4054_v6 = vadd.f32 %v9077_v23, %v4053_v48 }
 0x75c   : > { %v9139_v57 = vmax.f32 %v4054_v6, 0.0 }
 0x75e   : > { %v4213_v21 = vrot.slane %v9139_v57, 2  ;;  %v4371_v4 = vmax.f32 %v9134_v8, %v9139_v57  ;;  %v4215_v34 = vrot.slane %v9139_v57, 6 }
 0x760   : > { %v4372_v54 = vmax.f32 %v4207_v33, %v4213_v21  ;;  %v5462_v55 = vrot.slane %v4371_v4, 9  ;;  %v4374_v6 = vmax.f32 %v4209_v37, %v4215_v34  ;;  %v4196_v34 = vrot.slane %v9115_v24, 4 }
 0x762   : > { %v5463_v61 = vrot.slane %v4372_v54, 9  ;;  %v4005_v29 = vpop.f32.mrf.mxu1  ;;  %v4691_v58 = vmax.f32 %v4371_v4, %v5462_v55  ;;  %v4160_v55 = vrot.slane %v4071_v7, 4  ;;  %v5465_v5 = vrot.slane %v4374_v6, 9 }
 0x763   : > { %v4006_v10 = vadd.f32 %v9077_v23, %v4005_v29 }
 0x764   : > { %v4692_v9 = vmax.f32 %v4372_v54, %v5463_v61  ;;  %v4828_v54 = vsel %vm4768_vm1, %v4827_v62, %v4651_v20  ;;  %v4214_v61 = vrot.slane %v9139_v57, 4  ;;  %v4154_v57 = vrot.slane %v9125_v42, 4 }
 0x765   : > { %v4073_v27 = vmax.f32 %v4006_v10, 0.0  ;;  %v4208_v10 = vrot.slane %v9134_v8, 4 }
 0x766   : > { %v4967_v60 = vrot.slane %v4692_v9, 7 }
 0x767   : > { %v4165_v50 = vrot.slane %v4073_v27, 2  ;;  %v4167_v35 = vrot.slane %v4073_v27, 6  ;;  %v4339_v52 = vmax.f32 %v4071_v7, %v4073_v27  ;;  %v4166_v33 = vrot.slane %v4073_v27, 4 }
 0x768   : > { %v4968_v41 = vsel %vm4768_vm1, %v4967_v60, %v4691_v58  ;;  %v4366_v58 = vmax.f32 %v4197_v53, %v4203_v32  ;;  %v4829_v7 = vsel %vm4770_vm3, %v4827_v62, %v4828_v54  ;;  %v4694_v53 = vmax.f32 %v4374_v6, %v5465_v5 }
 0x769   : > { %v4969_v1 = vsel %vm4770_vm3, %v4967_v60, %v4968_v41  ;;  %v4340_v48 = vmax.f32 %v4159_v59, %v4165_v50  ;;  %v4342_v56 = vmax.f32 %v4161_v36, %v4167_v35  ;;  %v5430_v21 = vrot.slane %v4339_v52, 9 }
 0x76a   : > { %v4970_v28 = vsel %vm4772_vm4, %v4967_v60, %v4969_v1  ;;  %v4341_v27 = vmax.f32 %v4160_v55, %v4166_v33  ;;  %v4148_v59 = vrot.slane %v9127_v22, 4  ;;  %v4202_v50 = vrot.slane %v9113_v51, 4 }
 0x76b   : > { %v4971_v45 = vsel %vm4774_vm5, %v4967_v60, %v4970_v28  ;;  %v5431_v4 = vrot.slane %v4340_v48, 9  ;;  %v5433_v17 = vrot.slane %v4342_v56, 9  ;;  %v4659_v15 = vmax.f32 %v4339_v52, %v5430_v21 }
 0x76c   : > { %v5050_v40 = vrot.slane %v4971_v45, 4  ;;  %v4373_v60 = vmax.f32 %v4208_v10, %v4214_v61  ;;  %v5425_v35 = vrot.slane %v4334_v25, 9  ;;  %v4830_v24 = vsel %vm4772_vm4, %v4827_v62, %v4829_v7 }
 0x76d   : > { %v4660_v29 = vmax.f32 %v4340_v48, %v5431_v4  ;;  %v4662_v8 = vmax.f32 %v4342_v56, %v5433_v17  ;;  %v5432_v36 = vrot.slane %v4341_v27, 9  ;;  %v5457_v41 = vrot.slane %v4366_v58, 9 }
 0x76e   : > { %v5051_v9 = vsel %vm5026_vm9, %v5050_v40, %v4943_v13  ;;  %v4333_v1 = vmax.f32 %v4148_v59, %v4154_v57  ;;  %v5464_v51 = vrot.slane %v4373_v60, 9  ;;  %v4365_v28 = vmax.f32 %v4196_v34, %v4202_v50 }
 0x76f   : > { %v9168_v47 = vperm.slane %v5051_v9, %v8916_v2  ;;  %v4855_v12 = vrot.slane %v4660_v29, 7  ;;  %v4862_v48 = vrot.slane %v4662_v8, 7  ;;  %v4654_v56 = vmax.f32 %v4334_v25, %v5425_v35 }
 0x770   : > { %v4831_v45 = vsel %vm4774_vm5, %v4827_v62, %v4830_v24  ;;  %v4003_v33 = vadd.f32 %v9077_v23, %v9136_v31  ;;  %v4974_v21 = vrot.slane %v4694_v53, 7  ;;  %v4661_v4 = vmax.f32 %v4341_v27, %v5432_v36 }
 0x771   : > { %5164 = vst [vmem:[#allocation1 + $0x3] ss:$4 sm:$0xff] %v9168_v47  ;;  %v4856_v38 = vsel %vm4768_vm1, %v4855_v12, %v4659_v15  ;;  %v9190_v32 = vmax.f32 %v4051_v3, 0.0  ;;  %v4686_v54 = vmax.f32 %v4366_v58, %v5457_v41  ;;  %v5424_v40 = vrot.slane %v4333_v1, 9 }
 0x772   : > { %v4857_v52 = vsel %vm4770_vm3, %v4855_v12, %v4856_v38  ;;  %v4056_v37 = vpop.f32.mrf.mxu2  ;;  %v4693_v55 = vmax.f32 %v4373_v60, %v5464_v51  ;;  %v4863_v61 = vsel %vm4768_vm1, %v4862_v48, %v4661_v4  ;;  %v5456_v17 = vrot.slane %v4365_v28, 9 }
 0x773   : > { %v4858_v42 = vsel %vm4772_vm4, %v4855_v12, %v4857_v52  ;;  %v4057_v22 = vadd.f32 %v9077_v23, %v4056_v37  ;;  %v4834_v25 = vrot.slane %v4654_v56, 7  ;;  %v9195_v31 = vmax.f32 %v4003_v33, 0.0 }
 0x774   : > { %v4859_v19 = vsel %vm4774_vm5, %v4855_v12, %v4858_v42  ;;  %v4975_v10 = vsel %vm4768_vm1, %v4974_v21, %v4693_v55  ;;  %v5048_v9 = vrot.slane %v8943_v11, 4  ;;  %v4210_v27 = vrot.slane %v9190_v32, 2 }
 0x775   : > { %v5034_v20 = vrot.slane %v4859_v19, 4  ;;  %v9185_v6 = vmax.f32 %v4057_v22, 0.0  ;;  %v4864_v15 = vsel %vm4770_vm3, %v4862_v48, %v4863_v61  ;;  %v5032_v12 = vrot.slane %v8979_v39, 4 }
 0x776   : > { %v4946_v34 = vrot.slane %v4686_v54, 7  ;;  %v4653_v58 = vmax.f32 %v4333_v1, %v5424_v40  ;;  %v4685_v57 = vmax.f32 %v4365_v28, %v5456_v17  ;;  %v4976_v60 = vsel %vm4770_vm3, %v4974_v21, %v4975_v10 }
 0x777   : > { %v5035_v26 = vsel %vm5026_vm9, %v5034_v20, %v4831_v45  ;;  %v4216_v62 = vrot.slane %v9185_v6, 2  ;;  %v4865_v11 = vsel %vm4772_vm4, %v4862_v48, %v4864_v15  ;;  %v5056_v35 = vrot.slane %v9168_v47, 4 }
 0x778   : > { %v5039_v13 = vperm.slane %v5035_v26, %v8916_v2  ;;  %v4835_v59 = vsel %vm4768_vm1, %v4834_v25, %v4653_v58  ;;  %v5033_v39 = vsel %vm5026_vm9, 0.0, %v5032_v12  ;;  %v4947_v52 = vsel %vm4768_vm1, %v4946_v34, %v4685_v57 }
 0x779   : > { %v4376_v38 = vmax.f32 %v4210_v27, %v4216_v62  ;;  %v4977_v37 = vsel %vm4772_vm4, %v4974_v21, %v4976_v60  ;;  %v4836_v36 = vsel %vm4770_vm3, %v4834_v25, %v4835_v59  ;;  %v4866_v42 = vsel %vm4774_vm5, %v4862_v48, %v4865_v11 }
 0x77a   : > { %5160 = vst [vmem:[#allocation1 + $0x1] ss:$4 sm:$0xff] %v5039_v13  ;;  %v4008_v29 = vpop.f32.mrf.mxu1  ;;  %v5040_v8 = vrot.slane %v5039_v13, 4  ;;  %v5049_v19 = vsel %vm5026_vm9, 0.0, %v5048_v9  ;;  %v4948_v47 = vsel %vm4770_vm3, %v4946_v34, %v4947_v52  ;;  %v4978_v22 = vsel %vm4774_vm5, %v4974_v21, %v4977_v37 }
 0x77b   : > { %v4009_v5 = vadd.f32 %v9077_v23, %v4008_v29  ;;  %v4162_v23 = vrot.slane %v9195_v31, 2  ;;  %v5467_v3 = vrot.slane %v4376_v38, 9  ;;  %v5057_v1 = vsel %vm5026_vm9, 0.0, %v5056_v35 }
 0x77c   : > { %v5041_v41 = vsel %vm5026_vm9, 0.0, %v5040_v8  ;;  %v4375_v51 = vmax.f32 %v9190_v32, %v9185_v6  ;;  %v4837_v20 = vsel %vm4772_vm4, %v4834_v25, %v4836_v36  ;;  %v5066_v48 = vrot.slane %v4866_v42, 4 }
 0x77d   : > { %v9203_v7 = vmax.f32 %v4009_v5, 0.0  ;;  %v4696_v56 = vmax.f32 %v4376_v38, %v5467_v3  ;;  %v4949_v45 = vsel %vm4772_vm4, %v4946_v34, %v4948_v47  ;;  %v5082_v33 = vrot.slane %v4978_v22, 4 }
 0x77e   : > { %v4838_v21 = vsel %vm4774_vm5, %v4834_v25, %v4837_v20  ;;  %v5466_v26 = vrot.slane %v4375_v51, 9  ;;  %v4950_v40 = vsel %vm4774_vm5, %v4946_v34, %v4949_v45  ;;  %v5063_v61 = vperm.slane %v8983_v14, %v8916_v2 }
 0x77f   : > { %v4168_v50 = vrot.slane %v9203_v7, 2  ;;  %v4343_v4 = vmax.f32 %v9195_v31, %v9203_v7  ;;  %v5067_v13 = vsel %vm5026_vm9, %v5066_v48, %v4838_v21  ;;  %v4981_v55 = vrot.slane %v4696_v56, 7 }
 0x780   : > { %v5083_v17 = vsel %vm5026_vm9, %v5082_v33, %v4950_v40  ;;  %v5071_v29 = vperm.slane %v5067_v13, %v8916_v2  ;;  %v4695_v5 = vmax.f32 %v4375_v51, %v5466_v26  ;;  %v5079_v25 = vperm.slane %v8936_v18, %v8916_v2 }
 0x781   : > { %v9214_v24 = vld.sshfl [vmem:[#allocation1] sm:$0xff pattern:$0x73625140]  ;;  %v4344_v53 = vmax.f32 %v4162_v23, %v4168_v50  ;;  %v5434_v62 = vrot.slane %v4343_v4, 9  ;;  %v5087_v27 = vperm.slane %v5083_v17, %v8916_v2  ;;  %v4170_v34 = vrot.slane %v9203_v7, 6 }
 0x782   : > { %5171 = vst [vmem:[#allocation1] ss:$4 sm:$0xff] %v5033_v39  ;;  %v4982_v15 = vsel %vm4768_vm1, %v4981_v55, %v4695_v5  ;;  %v4218_v18 = vrot.slane %v9185_v6, 6  ;;  %v4164_v57 = vrot.slane %v9195_v31, 6  ;;  %v5072_v60 = vrot.slane %v5071_v29, 4 }
 0x783   : > { %5173 = vst [vmem:[#allocation1 + $0x1] ss:$4 sm:$0xff] %v5041_v41  ;;  %v5435_v28 = vrot.slane %v4344_v53, 9  ;;  %v4663_v14 = vmax.f32 %v4343_v4, %v5434_v62  ;;  %v4983_v12 = vsel %vm4770_vm3, %v4981_v55, %v4982_v15  ;;  %v5064_v8 = vrot.slane %v5063_v61, 4 }
 0x784   : > { %5175 = vst [vmem:[#allocation1 + $0x2] ss:$4 sm:$0xff] %v5049_v19  ;;  %v4212_v38 = vrot.slane %v9190_v32, 6  ;;  %v4984_v59 = vsel %vm4772_vm4, %v4981_v55, %v4983_v12  ;;  %v5080_v11 = vrot.slane %v5079_v25, 4  ;;  %v4346_v50 = vmax.f32 %v4164_v57, %v4170_v34 }
 0x785   : > { %5177 = vst [vmem:[#allocation1 + $0x3] ss:$4 sm:$0xff] %v5057_v1  ;;  %v4664_v54 = vmax.f32 %v4344_v53, %v5435_v28  ;;  %v5088_v35 = vrot.slane %v5087_v27, 4  ;;  %v5073_v52 = vsel %vm5026_vm9, 0.0, %v5072_v60  ;;  %v4985_v53 = vsel %vm4774_vm5, %v4981_v55, %v4984_v59 }
 0x786   : > { %v4378_v39 = vmax.f32 %v4212_v38, %v4218_v18  ;;  %v4169_v36 = vrot.slane %v9203_v7, 4  ;;  %v5065_v41 = vsel %vm5026_vm9, 0.0, %v5064_v8  ;;  %v5081_v3 = vsel %vm5026_vm9, 0.0, %v5080_v11 }
 0x787   : > { %v4869_v9 = vrot.slane %v4664_v54, 7  ;;  %v4163_v19 = vrot.slane %v9195_v31, 4  ;;  %v4217_v47 = vrot.slane %v9185_v6, 4  ;;  %v5437_v22 = vrot.slane %v4346_v50, 9 }
 0x788   : > { %v5089_v1 = vsel %vm5026_vm9, 0.0, %v5088_v35  ;;  %v5114_v51 = vrot.slane %v4985_v53, 4  ;;  %v4211_v20 = vrot.slane %v9190_v32, 4  ;;  %v5469_v48 = vrot.slane %v4378_v39, 9 }
 0x789   : > { %v4870_v58 = vsel %vm4768_vm1, %v4869_v9, %v4663_v14  ;;  %v4345_v28 = vmax.f32 %v4163_v19, %v4169_v36  ;;  %v4666_v45 = vmax.f32 %v4346_v50, %v5437_v22  ;;  %v5095_v32 = vperm.slane %v9030_v49, %v8916_v2 }
 0x78a   : > { %v4871_v23 = vsel %vm4770_vm3, %v4869_v9, %v4870_v58  ;;  %v4377_v56 = vmax.f32 %v4211_v20, %v4217_v47  ;;  %v5115_v31 = vsel %vm5026_vm9, %v5114_v51, %v9092_v16  ;;  %v4698_v4 = vmax.f32 %v4378_v39, %v5469_v48 }
 0x78b   : > { %v4872_v42 = vsel %vm4772_vm4, %v4869_v9, %v4871_v23  ;;  %v5436_v6 = vrot.slane %v4345_v28, 9  ;;  %v5119_v26 = vperm.slane %v5115_v31, %v8916_v2  ;;  %v4876_v13 = vrot.slane %v4666_v45, 7 }
 0x78c   : > { %v5178_v10 = vld.sshfl [vmem:[#allocation1] sm:$0xff pattern:$0x73625140]  ;;  %v4873_v7 = vsel %vm4774_vm5, %v4869_v9, %v4872_v42  ;;  %v5468_v21 = vrot.slane %v4377_v56, 9  ;;  %v5111_v55 = vperm.slane %v9005_v30, %v8916_v2  ;;  %v5127_v23 = vperm.slane %v9036_v43, %v8916_v2 }
 0x78d   : > { %5186 = vst [vmem:[#allocation1] ss:$4 sm:$0xff] %v5063_v61  ;;  %5179 = vrot.lane.b32.xlu2 %v5178_v10, %s5571_s25  ;;  %v5098_v33 = vrot.slane %v4873_v7, 4  ;;  %v4988_v61 = vrot.slane %v4698_v4, 7  ;;  %v4665_v17 = vmax.f32 %v4345_v28, %v5436_v6  ;;  %v5096_v10 = vrot.slane %v5095_v32, 4  ;;  %s5340_s25 = sshll.u32 %s9892_s19, 3 }
 0x78e   : > { %5188 = vst [vmem:[#allocation1 + $0x1] ss:$4 sm:$0xff] %v5071_v29  ;;  %v4697_v62 = vmax.f32 %v4377_v56, %v5468_v21  ;;  %v5143_v39 = vperm.slane %v9012_v46, %v8916_v2 }
 0x78f   : > { %5190 = vst [vmem:[#allocation1 + $0x2] ss:$4 sm:$0xff] %v5079_v25  ;;  %v5099_v54 = vsel %vm5026_vm9, %v5098_v33, %v9103_v0  ;;  %v4877_v29 = vsel %vm4768_vm1, %v4876_v13, %v4665_v17  ;;  %v5112_v25 = vrot.slane %v5111_v55, 4  ;;  %v5097_v15 = vsel %vm5026_vm9, 0.0, %v5096_v10 }
 0x790   : > { %5192 = vst [vmem:[#allocation1 + $0x3] ss:$4 sm:$0xff] %v5087_v27  ;;  %v5103_v16 = vperm.slane %v5099_v54, %v8916_v2  ;;  %v4989_v0 = vsel %vm4768_vm1, %v4988_v61, %v4697_v62  ;;  %v4878_v49 = vsel %vm4770_vm3, %v4876_v13, %v4877_v29  ;;  %v5120_v27 = vrot.slane %v5119_v26, 4 }
 0x791   : > { %v4990_v30 = vsel %vm4770_vm3, %v4988_v61, %v4989_v0  ;;  %v4879_v9 = vsel %vm4772_vm4, %v4876_v13, %v4878_v49  ;;  %v5113_v18 = vsel %vm5026_vm9, 0.0, %v5112_v25  ;;  %v5144_v43 = vrot.slane %v5143_v39, 4 }
 0x792   : > { %v5104_v5 = vrot.slane %v5103_v16, 4  ;;  %v4991_v14 = vsel %vm4772_vm4, %v4988_v61, %v4990_v30  ;;  %v4880_v34 = vsel %vm4774_vm5, %v4876_v13, %v4879_v9  ;;  %v5121_v60 = vsel %vm5026_vm9, 0.0, %v5120_v27 }
 0x793   : > { %v4992_v57 = vsel %vm4774_vm5, %v4988_v61, %v4991_v14  ;;  %v5130_v8 = vrot.slane %v4880_v34, 4  ;;  %v5145_v46 = vsel %vm5026_vm9, 0.0, %v5144_v43 }
 0x794   : > { %v5105_v58 = vsel %vm5026_vm9, 0.0, %v5104_v5  ;;  %v5146_v38 = vrot.slane %v4992_v57, 4 }
 0x795   : > { %v5131_v59 = vsel %vm5026_vm9, %v5130_v8, %v9107_v44  ;;  %v5128_v44 = vrot.slane %v5127_v23, 4 }
 0x796   : > { %v5147_v11 = vsel %vm5026_vm9, %v5146_v38, %v9095_v63  ;;  %v5135_v50 = vperm.slane %v5131_v59, %v8916_v2 }
 0x797   : > { %v5193_v37 = vld.sshfl [vmem:[#allocation1] sm:$0xff pattern:$0x73625140]  ;;  %v5129_v63 = vsel %vm5026_vm9, 0.0, %v5128_v44 }
 0x798   : > { %5203 = vst [vmem:[#allocation1 + $0x1] ss:$4 sm:$0xff] %v5073_v52  ;;  %5194 = vrot.lane.b32.xlu0 %v5193_v37, %s5573_s27  ;;  %v5151_v52 = vperm.slane %v5147_v11, %v8916_v2  ;;  %v5136_v37 = vrot.slane %v5135_v50, 4 }
 0x799   : > { %5201 = vst [vmem:[#allocation1] ss:$4 sm:$0xff] %v5065_v41 }
 0x79a   : > { %5205 = vst [vmem:[#allocation1 + $0x2] ss:$4 sm:$0xff] %v5081_v3  ;;  %v5152_v53 = vrot.slane %v5151_v52, 4  ;;  %v5137_v42 = vsel %vm5026_vm9, 0.0, %v5136_v37 }
 0x79b   : > { %5207 = vst [vmem:[#allocation1 + $0x3] ss:$4 sm:$0xff] %v5089_v1 }
 0x79c   : > { %v5153_v2 = vsel %vm5026_vm9, 0.0, %v5152_v53 }
 0x7a2   : > { %v5208_v40 = vld.sshfl [vmem:[#allocation1] sm:$0xff pattern:$0x73625140] }
 0x7a3   : > { %5222 = vst [vmem:[#allocation1 + $0x3] ss:$4 sm:$0xff] %v5119_v26  ;;  %5209 = vrot.lane.b32.xlu1 %v5208_v40, %s5575_s29 }
 0x7a4   : > { %5216 = vst [vmem:[#allocation1] ss:$4 sm:$0xff] %v5095_v32 }
 0x7a5   : > { %5220 = vst [vmem:[#allocation1 + $0x2] ss:$4 sm:$0xff] %v5111_v55 }
 0x7a6   : > { %5218 = vst [vmem:[#allocation1 + $0x1] ss:$4 sm:$0xff] %v5103_v16 }
 0x7ad   : > { %v5223_v12 = vld.sshfl [vmem:[#allocation1] sm:$0xff pattern:$0x73625140] }
 0x7ae   : > { %5224 = vrot.lane.b32.xlu2 %v5223_v12, %s5577_s6  ;;  %5231 = vst [vmem:[#allocation1] ss:$4 sm:$0xff] %v5097_v15  ;;  %s222_s6 = scalar_lea.vmem %s9323_s5, %s5340_s25 }
 0x7af   : > { %5233 = vst [vmem:[#allocation1 + $0x1] ss:$4 sm:$0xff] %v5105_v58 }
 0x7b0   : > { %5235 = vst [vmem:[#allocation1 + $0x2] ss:$4 sm:$0xff] %v5113_v18 }
 0x7b1   : > { %5237 = vst [vmem:[#allocation1 + $0x3] ss:$4 sm:$0xff] %v5121_v60 }
 0x7b8   : > { %v5238_v35 = vld.sshfl [vmem:[#allocation1] sm:$0xff pattern:$0x73625140] }
 0x7b9   : > { %5239 = vrot.lane.b32.xlu0 %v5238_v35, %s5578_s21  ;;  %5246 = vst [vmem:[#allocation1] ss:$4 sm:$0xff] %v5127_v23 }
 0x7ba   : > { %5248 = vst [vmem:[#allocation1 + $0x1] ss:$4 sm:$0xff] %v5135_v50 }
 0x7bb   : > { %5250 = vst [vmem:[#allocation1 + $0x2] ss:$4 sm:$0xff] %v5143_v39 }
 0x7bc   : > { %5252 = vst [vmem:[#allocation1 + $0x3] ss:$4 sm:$0xff] %v5151_v52 }
 0x7c3   : > { %v5253_v36 = vld.sshfl [vmem:[#allocation1] sm:$0xff pattern:$0x73625140] }
 0x7c4   : > { %5254 = vrot.lane.b32.xlu1 %v5253_v36, %s5581_s24  ;;  %5261 = vst [vmem:[#allocation1] ss:$4 sm:$0xff] %v5129_v63 }
 0x7c5   : > { %5263 = vst [vmem:[#allocation1 + $0x1] ss:$4 sm:$0xff] %v5137_v42 }
 0x7c6   : > { %5265 = vst [vmem:[#allocation1 + $0x2] ss:$4 sm:$0xff] %v5145_v46 }
 0x7c7   : > { %5267 = vst [vmem:[#allocation1 + $0x3] ss:$4 sm:$0xff] %v5153_v2 }
 0x7ce   : > { %v5268_v41 = vld.sshfl [vmem:[#allocation1] sm:$0xff pattern:$0x73625140] }
 0x7cf   : > { %5269 = vrot.lane.b32.xlu2 %v5268_v41, %s5579_s22 }
 0x7e7   : > { %v5180_v3 = vpop.permute.xlu2 %5179 }
 0x7e8   : > { %v5272_v1 = vsel %vm1689_vm2, %v9214_v24, %v5180_v3 }
 0x808   : > { %v5225_v22 = vpop.permute.xlu2 %5224 }
 0x80a   : > { %v5195_v19 = vpop.permute.xlu0 %5194 }
 0x80b   : > { %v5273_v51 = vsel %vm1755_vm6, %v5272_v1, %v5195_v19 }
 0x815   : > { %v5210_v47 = vpop.permute.xlu1 %5209 }
 0x816   : > { %v5274_v7 = vsel %vm1821_vm7, %v5273_v51, %v5210_v47 }
 0x817   : > { %v5275_v48 = vsel %vm1887_vm8, %v5274_v7, %v5225_v22 }
 0x829   : > { %v5270_v45 = vpop.permute.xlu2 %5269 }
 0x82b   : > { %v5240_v20 = vpop.permute.xlu0 %5239 }
 0x82c   : > { %v5276_v28 = vsel %vm3704_vm12, %v5275_v48, %v5240_v20 }
 0x836   : > { %v5255_v56 = vpop.permute.xlu1 %5254 }
 0x837   : > { %v5277_v33 = vsel %vm3737_vm13, %v5276_v28, %v5255_v56 }
 0x838   : > { %v5278_v24 = vsel %vm3770_vm14, %v5277_v33, %v5270_v45 }
 0x839   : > { %5279 = vst.msk [vmem:[%s222_s6] sm:$0xff] %vm3803_vm15, %v5278_v24 }
 0x83a PF: > { %s15_s18 = sadd.s32 1, %s5567_s18  }
 0x83b   : > { %p12_p4 = scmp.ge.s32.totalorder %s15_s18, 4  }
 0x83d   :  { %14 = sbr.rel (!%p12_p4) target bundleno = 1 (0x1), region = 98 }

</bundles_post_ra>
